<compile_context>
chip_gen: v7x
topology: tpu7x:2x2x1
jax: 0.10.0
libtpu: 0.0.40
codegen_flags: <defaults>
</compile_context>

<pallas_src>
import math
import functools

import jax
import jax.numpy as jnp
from jax.experimental import pallas as pl
from jax.experimental.pallas import tpu as pltpu

# ----------------------------- config (tiny t5) -----------------------------
VOCAB = 32
D_MODEL = 32
D_FF = 64
N_HEADS = 4
D_KV = 8            # head dim; N_HEADS * D_KV == D_MODEL (as in t5-base)
N_LAYERS = 2
NUM_BUCKETS = 32
MAX_DISTANCE = 128
LN_EPS = 1e-6
NEG_INF = -1e9

# fused weight-slab column layout
W_QKVO = 2 * D_MODEL + N_HEADS * D_MODEL          # [Wq | Wk | Wvo(all heads)] = 192
W_KVO = D_MODEL + N_HEADS * D_MODEL               # [Wk | Wvo(all heads)]      = 160
ENC_WI0 = W_QKVO                                  # 192
ENC_W = ENC_WI0 + D_FF                            # 256
DEC_CQ0 = W_QKVO                                  # 192
DEC_CKVO0 = DEC_CQ0 + D_MODEL                     # 224
DEC_WI0 = DEC_CKVO0 + W_KVO                       # 384
DEC_W = DEC_WI0 + D_FF                            # 448

_VMEM = pl.BlockSpec(memory_space=pltpu.MemorySpace.VMEM)


# --------------------------- fused whole-model kernel ------------------------
def _make_t5_kernel(B, Te, Td):
    """Returns a kernel closing over static batch/seq sizes."""
    NE, ND = B * Te, B * Td
    HB = N_HEADS * B
    bf16 = jnp.bfloat16

    def rmsnorm(x, w):
        # T5LayerNorm: no mean subtraction, no bias; f32 VPU math.
        var = jnp.mean(x * x, axis=-1, keepdims=True)
        return x * jax.lax.rsqrt(var + LN_EPS) * w

    def heads_attention(q3, k3, vo3, bias_g, Tq):
        # q3/k3: (B, Tq|Tk, D); vo3: (B, Tk, H*D); bias_g: (H*B, Tq, Tk)
        # Fold heads into the einsum batch dim (head-major): one batched score einsum
        # and one batched PV einsum for ALL heads.  No output projection (folded).
        q_g = jnp.concatenate(
            [q3[:, :, h * D_KV:(h + 1) * D_KV] for h in range(N_HEADS)], axis=0)
        k_g = jnp.concatenate(
            [k3[:, :, h * D_KV:(h + 1) * D_KV] for h in range(N_HEADS)], axis=0)
        v_g = jnp.concatenate(
            [vo3[:, :, h * D_MODEL:(h + 1) * D_MODEL] for h in range(N_HEADS)], axis=0)
        # T5 attention has NO 1/sqrt(d) scaling.
        s = jnp.einsum('gqd,gkd->gqk', q_g.astype(bf16), k_g.astype(bf16),
                       preferred_element_type=jnp.float32) + bias_g
        m = jnp.max(s, axis=-1, keepdims=True)
        p = jnp.exp(s - m)
        p = p * pl.reciprocal(jnp.sum(p, axis=-1, keepdims=True), approx=True)
        o_g = jnp.einsum('gqk,gkd->gqd', p.astype(bf16), v_g.astype(bf16),
                         preferred_element_type=jnp.float32)      # (H*B, Tq, D)
        out = o_g[0:B]
        for h in range(1, N_HEADS):
            out = out + o_g[h * B:(h + 1) * B]
        return out.reshape(B * Tq, D_MODEL)

    def self_attention(x2, w_qkvo, bias_g, T):
        # ONE fused projection dot for Q, K and the (Wo-folded) V of all heads.
        proj = jnp.dot(x2.astype(bf16), w_qkvo.astype(bf16),
                       preferred_element_type=jnp.float32).reshape(B, T, W_QKVO)
        q3 = proj[:, :, 0:D_MODEL]
        k3 = proj[:, :, D_MODEL:2 * D_MODEL]
        vo3 = proj[:, :, 2 * D_MODEL:]
        return heads_attention(q3, k3, vo3, bias_g, T)

    def cross_attention(x2, enc2, w_q, w_kvo, bias_g, Tq, Tk):
        q3 = jnp.dot(x2.astype(bf16), w_q.astype(bf16),
                     preferred_element_type=jnp.float32).reshape(B, Tq, D_MODEL)
        kvo = jnp.dot(enc2.astype(bf16), w_kvo.astype(bf16),
                      preferred_element_type=jnp.float32).reshape(B, Tk, W_KVO)
        k3 = kvo[:, :, 0:D_MODEL]
        vo3 = kvo[:, :, D_MODEL:]
        return heads_attention(q3, k3, vo3, bias_g, Tq)

    def ffn(x2, wi, wo2):
        h = jnp.maximum(jnp.dot(x2.astype(bf16), wi.astype(bf16),
                                preferred_element_type=jnp.float32), 0.0)
        return jnp.dot(h.astype(bf16), wo2.astype(bf16),
                       preferred_element_type=jnp.float32)

    def kernel(ids_ref, mask_ref, pos_enc_ref, pos_dec_ref, embed_ref,
               enc_mats_ref, dec_mats_ref, wo2_ref, ln_ref,
               logits_ref, loss_ref):
        embed = embed_ref[...]                              # (V, D) bf16
        ln = ln_ref[...]                                    # (5L+2, D) f32

        # ---- token embedding for encoder + decoder in ONE one-hot MXU matmul ----
        ids = ids_ref[...]                                  # (NE+ND, 2) int32
        tok = ids[:, 0:1]
        iota_v = jax.lax.broadcasted_iota(jnp.int32, (NE + ND, VOCAB), 1)
        onehot = (iota_v == tok).astype(bf16)
        emb_all = jnp.dot(onehot, embed, preferred_element_type=jnp.float32)
        x_enc = emb_all[0:NE]                               # (B*Te, D)
        x_dec = emb_all[NE:NE + ND]                         # (B*Td, D)

        # ---- attention biases: compact inputs broadcast in VMEM, hoisted once ----
        mask_bias = (1.0 - mask_ref[...].astype(jnp.float32)) * NEG_INF    # (B, Te)
        enc_bias = (pos_enc_ref[...][:, None, :, :]
                    + mask_bias[None, :, None, :]).reshape(HB, Te, Te)
        row = jax.lax.broadcasted_iota(jnp.int32, (Td, Td), 0)
        col = jax.lax.broadcasted_iota(jnp.int32, (Td, Td), 1)
        causal = jnp.where(col > row, NEG_INF, 0.0)
        dec_bias = jnp.broadcast_to(
            pos_dec_ref[...][:, None, :, :] + causal[None, None, :, :],
            (N_HEADS, B, Td, Td)).reshape(HB, Td, Td)
        cross_bias = jnp.broadcast_to(
            mask_bias[None, :, None, :], (N_HEADS, B, Td, Te)).reshape(HB, Td, Te)

        # ------------------------------ encoder ------------------------------
        x = x_enc
        for l in range(N_LAYERS):
            em = enc_mats_ref[l]                            # (D, ENC_W) f32
            h = rmsnorm(x, ln[2 * l:2 * l + 1, :])
            x = x + self_attention(h, em[:, 0:W_QKVO], enc_bias, Te)
            h = rmsnorm(x, ln[2 * l + 1:2 * l + 2, :])
            x = x + ffn(h, em[:, ENC_WI0:ENC_W], wo2_ref[l])
        enc_out = rmsnorm(x, ln[2 * N_LAYERS:2 * N_LAYERS + 1, :])   # (B*Te, D)

        # ------------------------------ decoder ------------------------------
        dl0 = 2 * N_LAYERS + 1
        x = x_dec
        for l in range(N_LAYERS):
            dm = dec_mats_ref[l]                            # (D, DEC_W) f32
            h = rmsnorm(x, ln[dl0 + 3 * l:dl0 + 3 * l + 1, :])
            x = x + self_attention(h, dm[:, 0:W_QKVO], dec_bias, Td)
            h = rmsnorm(x, ln[dl0 + 3 * l + 1:dl0 + 3 * l + 2, :])
            x = x + cross_attention(h, enc_out,
                                    dm[:, DEC_CQ0:DEC_CQ0 + D_MODEL],
                                    dm[:, DEC_CKVO0:DEC_CKVO0 + W_KVO],
                                    cross_bias, Td, Te)
            h = rmsnorm(x, ln[dl0 + 3 * l + 2:dl0 + 3 * l + 3, :])
            x = x + ffn(h, dm[:, DEC_WI0:DEC_W], wo2_ref[N_LAYERS + l])
        dec_out = rmsnorm(x, ln[dl0 + 3 * N_LAYERS:dl0 + 3 * N_LAYERS + 1, :])

        # ------------- tied lm_head (d_model**-0.5 rescale) + masked CE -------------
        dec_scaled = (dec_out * (D_MODEL ** -0.5)).astype(bf16)
        logits = jnp.einsum('nd,vd->nv', dec_scaled, embed,
                            preferred_element_type=jnp.float32)    # (B*Td, V)
        logits_ref[...] = logits

        labels = ids[0:ND, 1:2]                                     # (B*Td, 1) int32
        m = jnp.max(logits, axis=-1, keepdims=True)
        lse = jnp.log(jnp.sum(jnp.exp(logits - m), axis=-1, keepdims=True)) + m
        tgt = jnp.where(labels < 0, 0, labels)                      # map -100 -> 0
        cols = jax.lax.broadcasted_iota(jnp.int32, (ND, VOCAB), 1)
        onehot_t = (cols == tgt).astype(jnp.float32)                # VMEM only
        picked = jnp.sum(onehot_t * logits, axis=-1, keepdims=True)
        per_tok = lse - picked                                      # (B*Td, 1)
        valid = (labels != -100).astype(jnp.float32)
        num = jnp.sum(per_tok * valid, axis=0, keepdims=True)       # (1, 1)
        den = jnp.sum(valid, axis=0, keepdims=True)                 # (1, 1)
        loss_ref[...] = num / jnp.maximum(den, 1.0)

    return kernel


# ----------------------- T5 relative position bias (glue) -------------------
def _relative_position_bucket(relative_position, bidirectional, num_buckets, max_distance):
    relative_buckets = jnp.zeros_like(relative_position)
    if bidirectional:
        num_buckets //= 2
        relative_buckets = relative_buckets + (relative_position > 0).astype(jnp.int32) * num_buckets
        relative_position = jnp.abs(relative_position)
    else:
        relative_position = -jnp.minimum(relative_position, 0)
    max_exact = num_buckets // 2
    is_small = relative_position < max_exact
    rp = jnp.maximum(relative_position.astype(jnp.float32), 1.0)
    rp_large = max_exact + (
        jnp.log(rp / max_exact) / math.log(max_distance / max_exact) * (num_buckets - max_exact)
    ).astype(jnp.int32)
    rp_large = jnp.minimum(rp_large, num_buckets - 1)
    return relative_buckets + jnp.where(is_small, relative_position, rp_large)


def compute_position_bias(q_len, k_len, table, bidirectional):
    ctx = jnp.arange(q_len, dtype=jnp.int32)[:, None]
    mem = jnp.arange(k_len, dtype=jnp.int32)[None, :]
    buckets = _relative_position_bucket(mem - ctx, bidirectional, NUM_BUCKETS, MAX_DISTANCE)
    values = table[buckets]                      # (q, k, H)  -- gather stays in XLA glue
    return jnp.transpose(values, (2, 0, 1))      # (H, q, k)


def shift_right(labels):
    # T5._shift_right: decoder_start_token_id = pad_token_id = 0, replace -100 -> 0
    B = labels.shape[0]
    shifted = jnp.concatenate([jnp.zeros((B, 1), dtype=labels.dtype), labels[:, :-1]], axis=1)
    return jnp.where(shifted == -100, 0, shifted)


# --------------------------------- forward -----------------------------------
def t5_forward(params, input_ids, attention_mask, labels, decoder_input_ids=None):
    if decoder_input_ids is None:
        decoder_input_ids = shift_right(labels)
    B, Te = input_ids.shape
    Td = decoder_input_ids.shape[1]
    NE, ND = B * Te, B * Td

    # Packed int buffer: col 0 = [enc ids ; dec ids], col 1 = labels (padded).
    tok_col = jnp.concatenate(
        [input_ids.reshape(-1), decoder_input_ids.reshape(-1)]).astype(jnp.int32)
    lab_col = jnp.pad(labels.reshape(-1).astype(jnp.int32), (0, NE))
    ids_cols = jnp.stack([tok_col, lab_col], axis=1)                 # (NE+ND, 2)

    pos_e = compute_position_bias(Te, Te, params['enc_rel_bias'], True)   # (H, Te, Te)
    pos_d = compute_position_bias(Td, Td, params['dec_rel_bias'], False)  # (H, Td, Td)

    kernel = _make_t5_kernel(B, Te, Td)
    logits2, loss_arr = pl.pallas_call(
        kernel,
        out_shape=(jax.ShapeDtypeStruct((ND, VOCAB), jnp.float32),
                   jax.ShapeDtypeStruct((1, 1), jnp.float32)),
        in_specs=[_VMEM] * 9,
        out_specs=(_VMEM, _VMEM),
    )(ids_cols, attention_mask.astype(jnp.int32), pos_e, pos_d,
      params['embed'], params['enc_mats'], params['dec_mats'],
      params['wo2_all'], params['ln_all'])

    logits = logits2.reshape(B, Td, VOCAB)
    loss = loss_arr[0, 0]
    return loss, logits
    # TODO(synk): dropout omitted (HF module in eval / deterministic setting);
    # pretrained t5-base weights replaced by deterministic synthetic init.
    # TODO(synk): single-TC execution accepted (no batch grid) -- working set is
    # overhead-bound at these shapes; add grid=(B,) "parallel" if B/T grow (v7x).


# ------------------------------ parameter init -------------------------------
def init_params(key):
    keys = iter(jax.random.split(key, 128))

    def nrm(shape, scale=0.05):
        return scale * jax.random.normal(next(keys), shape, dtype=jnp.float32)

    def fold_vo(wv, wo):
        # Fold the per-head output projection into the value projection:
        # Wvo_h = Wv[:, h] @ Wo[h, :]  (exact in real arithmetic).
        return jnp.concatenate(
            [wv[:, h * D_KV:(h + 1) * D_KV] @ wo[h * D_KV:(h + 1) * D_KV, :]
             for h in range(N_HEADS)], axis=1)                      # (D, H*D)

    embed = nrm((VOCAB, D_MODEL), scale=1.0)

    enc_mats, dec_mats, wo2 = [], [], []
    for _ in range(N_LAYERS):
        wq = nrm((D_MODEL, D_MODEL)); wk = nrm((D_MODEL, D_MODEL))
        wv = nrm((D_MODEL, D_MODEL)); wo = nrm((D_MODEL, D_MODEL))
        wi = nrm((D_MODEL, D_FF))
        enc_mats.append(jnp.concatenate([wq, wk, fold_vo(wv, wo), wi], axis=1))  # (D, 256)
        wo2.append(nrm((D_FF, D_MODEL)))
    for _ in range(N_LAYERS):
        sq = nrm((D_MODEL, D_MODEL)); sk = nrm((D_MODEL, D_MODEL))
        sv = nrm((D_MODEL, D_MODEL)); so = nrm((D_MODEL, D_MODEL))
        cq = nrm((D_MODEL, D_MODEL)); ck = nrm((D_MODEL, D_MODEL))
        cv = nrm((D_MODEL, D_MODEL)); co = nrm((D_MODEL, D_MODEL))
        wi = nrm((D_MODEL, D_FF))
        dec_mats.append(jnp.concatenate(
            [sq, sk, fold_vo(sv, so), cq, ck, fold_vo(cv, co), wi], axis=1))      # (D, 448)
        wo2.append(nrm((D_FF, D_MODEL)))

    ln_all = jnp.ones((2 * N_LAYERS + 1 + 3 * N_LAYERS + 1, D_MODEL), jnp.float32)

    return {
        'embed': embed.astype(jnp.bfloat16),          # tied embedding / lm_head (MXU bf16)
        'enc_rel_bias': nrm((NUM_BUCKETS, N_HEADS)),
        'dec_rel_bias': nrm((NUM_BUCKETS, N_HEADS)),
        'enc_mats': jnp.stack(enc_mats),              # (L, D, 256)
        'dec_mats': jnp.stack(dec_mats),              # (L, D, 448)
        'wo2_all': jnp.stack(wo2),                    # (2L, FF, D)  enc layers first
        'ln_all': ln_all,                             # (5L+2, D)
    }


# ----------------------------------- main ------------------------------------
if __name__ == "__main__":
    key = jax.random.PRNGKey(0)
    k_param, k_in, k_lab = jax.random.split(key, 3)

    B, T_ENC, T_DEC = 2, 8, 8
    params = init_params(k_param)

    input_ids = jax.random.randint(k_in, (B, T_ENC), 0, VOCAB, dtype=jnp.int32)
    attention_mask = jnp.concatenate(
        [jnp.ones((B, T_ENC - 2), jnp.int32), jnp.array([[1, 1], [0, 0]], jnp.int32)], axis=1)
    labels = jax.random.randint(k_lab, (B, T_DEC), 0, VOCAB, dtype=jnp.int32)

    fwd = jax.jit(functools.partial(t5_forward, params))
    loss, logits = fwd(input_ids, attention_mask, labels)
    jax.block_until_ready((loss, logits))

    assert logits.shape == (B, T_DEC, VOCAB)
    assert loss.shape == ()
    assert bool(jnp.isfinite(loss))
    print("KERNEL_OK")
</pallas_src>

<mosaic_0001>
module attributes {stable_mosaic.version = 11 : i64} {
  func.func @kernel(%arg0: memref<32x2xi32, #tpu.memory_space<vmem>>, %arg1: memref<2x8xi32, #tpu.memory_space<vmem>>, %arg2: memref<4x8x8xf32, #tpu.memory_space<vmem>>, %arg3: memref<4x8x8xf32, #tpu.memory_space<vmem>>, %arg4: memref<32x32xbf16, #tpu.memory_space<vmem>>, %arg5: memref<2x32x256xf32, #tpu.memory_space<vmem>>, %arg6: memref<2x32x448xf32, #tpu.memory_space<vmem>>, %arg7: memref<4x64x32xf32, #tpu.memory_space<vmem>>, %arg8: memref<12x32xf32, #tpu.memory_space<vmem>>, %arg9: memref<16x32xf32, #tpu.memory_space<vmem>>, %arg10: memref<1x1xf32, #tpu.memory_space<vmem>>) attributes {dimension_semantics = [], scalar_prefetch = 0 : i64, scratch_operands = 0 : i64, tpu.core_type = #tpu.core_type<tc>} {
    %c0 = arith.constant 0 : index
    %c0_0 = arith.constant 0 : index
    %0 = vector.load %arg4[%c0, %c0_0] : memref<32x32xbf16, #tpu.memory_space<vmem>>, vector<32x32xbf16>
    %c0_1 = arith.constant 0 : index
    %c0_2 = arith.constant 0 : index
    %1 = vector.load %arg8[%c0_1, %c0_2] : memref<12x32xf32, #tpu.memory_space<vmem>>, vector<12x32xf32>
    %c0_3 = arith.constant 0 : index
    %c0_4 = arith.constant 0 : index
    %2 = vector.load %arg0[%c0_3, %c0_4] : memref<32x2xi32, #tpu.memory_space<vmem>>, vector<32x2xi32>
    %3 = vector.extract_strided_slice %2 {offsets = [0, 0], sizes = [32, 1], strides = [1, 1]} : vector<32x2xi32> to vector<32x1xi32>
    %4 = tpu.iota {dimensions = array<i32: 1>} : vector<32x32xi32>
    %5 = vector.broadcast %3 : vector<32x1xi32> to vector<32x32xi32>
    %6 = arith.cmpi eq, %4, %5 : vector<32x32xi32>
    %7 = arith.extui %6 : vector<32x32xi1> to vector<32x32xi32>
    %8 = arith.sitofp %7 : vector<32x32xi32> to vector<32x32xf32>
    %9 = arith.truncf %8 : vector<32x32xf32> to vector<32x32xbf16>
    %cst = arith.constant dense<0.000000e+00> : vector<32x32xf32>
    %10 = tpu.matmul %9, %0, %cst {dimension_numbers = #tpu.dot_dimension_numbers<[1], [0], [0], [1], [0, 0, 1, 1], [], []>} : vector<32x32xbf16>, vector<32x32xbf16>, vector<32x32xf32> -> vector<32x32xf32>
    %11 = vector.extract_strided_slice %10 {offsets = [0, 0], sizes = [16, 32], strides = [1, 1]} : vector<32x32xf32> to vector<16x32xf32>
    %12 = vector.extract_strided_slice %10 {offsets = [16, 0], sizes = [16, 32], strides = [1, 1]} : vector<32x32xf32> to vector<16x32xf32>
    %c0_5 = arith.constant 0 : index
    %c0_6 = arith.constant 0 : index
    %13 = vector.load %arg1[%c0_5, %c0_6] : memref<2x8xi32, #tpu.memory_space<vmem>>, vector<2x8xi32>
    %14 = arith.sitofp %13 : vector<2x8xi32> to vector<2x8xf32>
    %cst_7 = arith.constant 1.000000e+00 : f32
    %15 = vector.broadcast %cst_7 : f32 to vector<2x8xf32>
    %16 = arith.subf %15, %14 : vector<2x8xf32>
    %cst_8 = arith.constant -1.000000e+09 : f32
    %17 = vector.broadcast %cst_8 : f32 to vector<2x8xf32>
    %18 = arith.mulf %16, %17 : vector<2x8xf32>
    %c0_9 = arith.constant 0 : index
    %c0_10 = arith.constant 0 : index
    %c0_11 = arith.constant 0 : index
    %19 = vector.load %arg2[%c0_9, %c0_10, %c0_11] : memref<4x8x8xf32, #tpu.memory_space<vmem>>, vector<4x8x8xf32>
    %20 = vector.shape_cast %19 : vector<4x8x8xf32> to vector<4x1x8x8xf32>
    %21 = vector.shape_cast %18 : vector<2x8xf32> to vector<1x2x1x8xf32>
    %22 = vector.broadcast %20 : vector<4x1x8x8xf32> to vector<4x2x8x8xf32>
    %23 = vector.broadcast %21 : vector<1x2x1x8xf32> to vector<4x2x8x8xf32>
    %24 = arith.addf %22, %23 : vector<4x2x8x8xf32>
    %25 = vector.shape_cast %24 : vector<4x2x8x8xf32> to vector<8x8x8xf32>
    %26 = tpu.iota {dimensions = array<i32: 0>} : vector<8x8xi32>
    %27 = tpu.iota {dimensions = array<i32: 1>} : vector<8x8xi32>
    %28 = arith.cmpi sgt, %27, %26 : vector<8x8xi32>
    %cst_12 = arith.constant -1.000000e+09 : f32
    %cst_13 = arith.constant 0.000000e+00 : f32
    %29 = vector.broadcast %cst_12 : f32 to vector<8x8xf32>
    %30 = vector.broadcast %cst_13 : f32 to vector<8x8xf32>
    %31 = arith.select %28, %29, %30 : vector<8x8xi1>, vector<8x8xf32>
    %c0_14 = arith.constant 0 : index
    %c0_15 = arith.constant 0 : index
    %c0_16 = arith.constant 0 : index
    %32 = vector.load %arg3[%c0_14, %c0_15, %c0_16] : memref<4x8x8xf32, #tpu.memory_space<vmem>>, vector<4x8x8xf32>
    %33 = vector.shape_cast %32 : vector<4x8x8xf32> to vector<4x1x8x8xf32>
    %34 = vector.shape_cast %31 : vector<8x8xf32> to vector<1x1x8x8xf32>
    %35 = vector.broadcast %34 : vector<1x1x8x8xf32> to vector<4x1x8x8xf32>
    %36 = arith.addf %33, %35 : vector<4x1x8x8xf32>
    %37 = vector.shape_cast %36 : vector<4x1x8x8xf32> to vector<4x1x8x8xf32>
    %38 = vector.broadcast %37 : vector<4x1x8x8xf32> to vector<4x2x8x8xf32>
    %39 = vector.shape_cast %38 : vector<4x2x8x8xf32> to vector<8x8x8xf32>
    %40 = vector.shape_cast %18 : vector<2x8xf32> to vector<1x2x1x8xf32>
    %41 = vector.shape_cast %40 : vector<1x2x1x8xf32> to vector<1x2x1x8xf32>
    %42 = vector.broadcast %41 : vector<1x2x1x8xf32> to vector<4x2x8x8xf32>
    %43 = vector.shape_cast %42 : vector<4x2x8x8xf32> to vector<8x8x8xf32>
    %c0_17 = arith.constant 0 : index
    %c0_18 = arith.constant 0 : index
    %c0_19 = arith.constant 0 : index
    %44 = vector.load %arg5[%c0_17, %c0_18, %c0_19] : memref<2x32x256xf32, #tpu.memory_space<vmem>>, vector<1x32x256xf32>
    %45 = vector.shape_cast %44 : vector<1x32x256xf32> to vector<32x256xf32>
    %46 = vector.extract_strided_slice %1 {offsets = [0, 0], sizes = [1, 32], strides = [1, 1]} : vector<12x32xf32> to vector<1x32xf32>
    %47 = arith.mulf %11, %11 : vector<16x32xf32>
    %cst_20 = arith.constant dense<0.000000e+00> : vector<16xf32>
    %48 = vector.multi_reduction <add>, %47, %cst_20 [1] : vector<16x32xf32> to vector<16xf32>
    %49 = vector.shape_cast %48 : vector<16xf32> to vector<16x1xf32>
    %cst_21 = arith.constant 3.200000e+01 : f32
    %50 = vector.broadcast %cst_21 : f32 to vector<16x1xf32>
    %51 = arith.divf %49, %50 : vector<16x1xf32>
    %cst_22 = arith.constant 9.99999997E-7 : f32
    %52 = vector.broadcast %cst_22 : f32 to vector<16x1xf32>
    %53 = arith.addf %51, %52 : vector<16x1xf32>
    %54 = math.rsqrt %53 : vector<16x1xf32>
    %55 = vector.broadcast %54 : vector<16x1xf32> to vector<16x32xf32>
    %56 = arith.mulf %11, %55 : vector<16x32xf32>
    %57 = vector.broadcast %46 : vector<1x32xf32> to vector<16x32xf32>
    %58 = arith.mulf %56, %57 : vector<16x32xf32>
    %59 = vector.extract_strided_slice %45 {offsets = [0, 0], sizes = [32, 192], strides = [1, 1]} : vector<32x256xf32> to vector<32x192xf32>
    %60 = arith.truncf %58 : vector<16x32xf32> to vector<16x32xbf16>
    %61 = arith.truncf %59 : vector<32x192xf32> to vector<32x192xbf16>
    %cst_23 = arith.constant dense<0.000000e+00> : vector<16x192xf32>
    %62 = tpu.matmul %60, %61, %cst_23 {dimension_numbers = #tpu.dot_dimension_numbers<[1], [0], [0], [1], [0, 0, 1, 1], [], []>} : vector<16x32xbf16>, vector<32x192xbf16>, vector<16x192xf32> -> vector<16x192xf32>
    %63 = vector.shape_cast %62 : vector<16x192xf32> to vector<2x8x192xf32>
    %64 = vector.extract_strided_slice %63 {offsets = [0, 0, 0], sizes = [2, 8, 32], strides = [1, 1, 1]} : vector<2x8x192xf32> to vector<2x8x32xf32>
    %65 = vector.extract_strided_slice %63 {offsets = [0, 0, 32], sizes = [2, 8, 32], strides = [1, 1, 1]} : vector<2x8x192xf32> to vector<2x8x32xf32>
    %66 = vector.extract_strided_slice %63 {offsets = [0, 0, 64], sizes = [2, 8, 128], strides = [1, 1, 1]} : vector<2x8x192xf32> to vector<2x8x128xf32>
    %67 = vector.extract_strided_slice %64 {offsets = [0, 0, 0], sizes = [2, 8, 8], strides = [1, 1, 1]} : vector<2x8x32xf32> to vector<2x8x8xf32>
    %68 = vector.extract_strided_slice %64 {offsets = [0, 0, 8], sizes = [2, 8, 8], strides = [1, 1, 1]} : vector<2x8x32xf32> to vector<2x8x8xf32>
    %69 = vector.extract_strided_slice %64 {offsets = [0, 0, 16], sizes = [2, 8, 8], strides = [1, 1, 1]} : vector<2x8x32xf32> to vector<2x8x8xf32>
    %70 = vector.extract_strided_slice %64 {offsets = [0, 0, 24], sizes = [2, 8, 8], strides = [1, 1, 1]} : vector<2x8x32xf32> to vector<2x8x8xf32>
    %71 = tpu.concatenate %67, %68, %69, %70 in 0 : vector<2x8x8xf32>, vector<2x8x8xf32>, vector<2x8x8xf32>, vector<2x8x8xf32> -> vector<8x8x8xf32>
    %72 = vector.extract_strided_slice %65 {offsets = [0, 0, 0], sizes = [2, 8, 8], strides = [1, 1, 1]} : vector<2x8x32xf32> to vector<2x8x8xf32>
    %73 = vector.extract_strided_slice %65 {offsets = [0, 0, 8], sizes = [2, 8, 8], strides = [1, 1, 1]} : vector<2x8x32xf32> to vector<2x8x8xf32>
    %74 = vector.extract_strided_slice %65 {offsets = [0, 0, 16], sizes = [2, 8, 8], strides = [1, 1, 1]} : vector<2x8x32xf32> to vector<2x8x8xf32>
    %75 = vector.extract_strided_slice %65 {offsets = [0, 0, 24], sizes = [2, 8, 8], strides = [1, 1, 1]} : vector<2x8x32xf32> to vector<2x8x8xf32>
    %76 = tpu.concatenate %72, %73, %74, %75 in 0 : vector<2x8x8xf32>, vector<2x8x8xf32>, vector<2x8x8xf32>, vector<2x8x8xf32> -> vector<8x8x8xf32>
    %77 = vector.extract_strided_slice %66 {offsets = [0, 0, 0], sizes = [2, 8, 32], strides = [1, 1, 1]} : vector<2x8x128xf32> to vector<2x8x32xf32>
    %78 = vector.extract_strided_slice %66 {offsets = [0, 0, 32], sizes = [2, 8, 32], strides = [1, 1, 1]} : vector<2x8x128xf32> to vector<2x8x32xf32>
    %79 = vector.extract_strided_slice %66 {offsets = [0, 0, 64], sizes = [2, 8, 32], strides = [1, 1, 1]} : vector<2x8x128xf32> to vector<2x8x32xf32>
    %80 = vector.extract_strided_slice %66 {offsets = [0, 0, 96], sizes = [2, 8, 32], strides = [1, 1, 1]} : vector<2x8x128xf32> to vector<2x8x32xf32>
    %81 = tpu.concatenate %77, %78, %79, %80 in 0 : vector<2x8x32xf32>, vector<2x8x32xf32>, vector<2x8x32xf32>, vector<2x8x32xf32> -> vector<8x8x32xf32>
    %82 = arith.truncf %71 : vector<8x8x8xf32> to vector<8x8x8xbf16>
    %83 = arith.truncf %76 : vector<8x8x8xf32> to vector<8x8x8xbf16>
    "tpu.trace_start"() <{level = 10 : i32, message = "gqd,gkd->gqk"}> : () -> ()
    %cst_24 = arith.constant dense<0.000000e+00> : vector<8x8x8xf32>
    %84 = tpu.matmul %82, %83, %cst_24 {dimension_numbers = #tpu.dot_dimension_numbers<[2], [2], [1], [1], [0, 0, 0, 1, 1, 1], [0], [0]>} : vector<8x8x8xbf16>, vector<8x8x8xbf16>, vector<8x8x8xf32> -> vector<8x8x8xf32>
    "tpu.trace_stop"() : () -> ()
    %85 = arith.addf %84, %25 : vector<8x8x8xf32>
    %cst_25 = arith.constant dense<0xFF800000> : vector<8x8xf32>
    %86 = vector.multi_reduction <maximumf>, %85, %cst_25 [2] : vector<8x8x8xf32> to vector<8x8xf32>
    %87 = vector.shape_cast %86 : vector<8x8xf32> to vector<8x8x1xf32>
    %88 = vector.broadcast %87 : vector<8x8x1xf32> to vector<8x8x8xf32>
    %89 = arith.subf %85, %88 : vector<8x8x8xf32>
    %90 = math.exp %89 : vector<8x8x8xf32>
    %cst_26 = arith.constant dense<0.000000e+00> : vector<8x8xf32>
    %91 = vector.multi_reduction <add>, %90, %cst_26 [2] : vector<8x8x8xf32> to vector<8x8xf32>
    %92 = vector.shape_cast %91 : vector<8x8xf32> to vector<8x8x1xf32>
    %93 = tpu.reciprocal %92 {approx = true} : vector<8x8x1xf32> -> vector<8x8x1xf32>
    %94 = vector.broadcast %93 : vector<8x8x1xf32> to vector<8x8x8xf32>
    %95 = arith.mulf %90, %94 : vector<8x8x8xf32>
    %96 = arith.truncf %95 : vector<8x8x8xf32> to vector<8x8x8xbf16>
    %97 = arith.truncf %81 : vector<8x8x32xf32> to vector<8x8x32xbf16>
    "tpu.trace_start"() <{level = 10 : i32, message = "gqk,gkd->gqd"}> : () -> ()
    %cst_27 = arith.constant dense<0.000000e+00> : vector<8x8x32xf32>
    %98 = tpu.matmul %96, %97, %cst_27 {dimension_numbers = #tpu.dot_dimension_numbers<[2], [1], [1], [2], [0, 0, 0, 1, 1, 2], [0], [0]>} : vector<8x8x8xbf16>, vector<8x8x32xbf16>, vector<8x8x32xf32> -> vector<8x8x32xf32>
    "tpu.trace_stop"() : () -> ()
    %99 = vector.extract_strided_slice %98 {offsets = [0, 0, 0], sizes = [2, 8, 32], strides = [1, 1, 1]} : vector<8x8x32xf32> to vector<2x8x32xf32>
    %100 = vector.extract_strided_slice %98 {offsets = [2, 0, 0], sizes = [2, 8, 32], strides = [1, 1, 1]} : vector<8x8x32xf32> to vector<2x8x32xf32>
    %101 = arith.addf %99, %100 : vector<2x8x32xf32>
    %102 = vector.extract_strided_slice %98 {offsets = [4, 0, 0], sizes = [2, 8, 32], strides = [1, 1, 1]} : vector<8x8x32xf32> to vector<2x8x32xf32>
    %103 = arith.addf %101, %102 : vector<2x8x32xf32>
    %104 = vector.extract_strided_slice %98 {offsets = [6, 0, 0], sizes = [2, 8, 32], strides = [1, 1, 1]} : vector<8x8x32xf32> to vector<2x8x32xf32>
    %105 = arith.addf %103, %104 : vector<2x8x32xf32>
    %106 = vector.shape_cast %105 : vector<2x8x32xf32> to vector<16x32xf32>
    %107 = arith.addf %11, %106 : vector<16x32xf32>
    %108 = vector.extract_strided_slice %1 {offsets = [1, 0], sizes = [1, 32], strides = [1, 1]} : vector<12x32xf32> to vector<1x32xf32>
    %109 = arith.mulf %107, %107 : vector<16x32xf32>
    %cst_28 = arith.constant dense<0.000000e+00> : vector<16xf32>
    %110 = vector.multi_reduction <add>, %109, %cst_28 [1] : vector<16x32xf32> to vector<16xf32>
    %111 = vector.shape_cast %110 : vector<16xf32> to vector<16x1xf32>
    %cst_29 = arith.constant 3.200000e+01 : f32
    %112 = vector.broadcast %cst_29 : f32 to vector<16x1xf32>
    %113 = arith.divf %111, %112 : vector<16x1xf32>
    %cst_30 = arith.constant 9.99999997E-7 : f32
    %114 = vector.broadcast %cst_30 : f32 to vector<16x1xf32>
    %115 = arith.addf %113, %114 : vector<16x1xf32>
    %116 = math.rsqrt %115 : vector<16x1xf32>
    %117 = vector.broadcast %116 : vector<16x1xf32> to vector<16x32xf32>
    %118 = arith.mulf %107, %117 : vector<16x32xf32>
    %119 = vector.broadcast %108 : vector<1x32xf32> to vector<16x32xf32>
    %120 = arith.mulf %118, %119 : vector<16x32xf32>
    %121 = vector.extract_strided_slice %45 {offsets = [0, 192], sizes = [32, 64], strides = [1, 1]} : vector<32x256xf32> to vector<32x64xf32>
    %c0_31 = arith.constant 0 : index
    %c0_32 = arith.constant 0 : index
    %c0_33 = arith.constant 0 : index
    %122 = vector.load %arg7[%c0_31, %c0_32, %c0_33] : memref<4x64x32xf32, #tpu.memory_space<vmem>>, vector<1x64x32xf32>
    %123 = vector.shape_cast %122 : vector<1x64x32xf32> to vector<64x32xf32>
    %124 = arith.truncf %120 : vector<16x32xf32> to vector<16x32xbf16>
    %125 = arith.truncf %121 : vector<32x64xf32> to vector<32x64xbf16>
    %cst_34 = arith.constant dense<0.000000e+00> : vector<16x64xf32>
    %126 = tpu.matmul %124, %125, %cst_34 {dimension_numbers = #tpu.dot_dimension_numbers<[1], [0], [0], [1], [0, 0, 1, 1], [], []>} : vector<16x32xbf16>, vector<32x64xbf16>, vector<16x64xf32> -> vector<16x64xf32>
    %cst_35 = arith.constant 0.000000e+00 : f32
    %127 = vector.broadcast %cst_35 : f32 to vector<16x64xf32>
    %128 = arith.maximumf %126, %127 : vector<16x64xf32>
    %129 = arith.truncf %128 : vector<16x64xf32> to vector<16x64xbf16>
    %130 = arith.truncf %123 : vector<64x32xf32> to vector<64x32xbf16>
    %cst_36 = arith.constant dense<0.000000e+00> : vector<16x32xf32>
    %131 = tpu.matmul %129, %130, %cst_36 {dimension_numbers = #tpu.dot_dimension_numbers<[1], [0], [0], [1], [0, 0, 1, 1], [], []>} : vector<16x64xbf16>, vector<64x32xbf16>, vector<16x32xf32> -> vector<16x32xf32>
    %132 = arith.addf %107, %131 : vector<16x32xf32>
    %c1 = arith.constant 1 : index
    %c0_37 = arith.constant 0 : index
    %c0_38 = arith.constant 0 : index
    %133 = vector.load %arg5[%c1, %c0_37, %c0_38] : memref<2x32x256xf32, #tpu.memory_space<vmem>>, vector<1x32x256xf32>
    %134 = vector.shape_cast %133 : vector<1x32x256xf32> to vector<32x256xf32>
    %135 = vector.extract_strided_slice %1 {offsets = [2, 0], sizes = [1, 32], strides = [1, 1]} : vector<12x32xf32> to vector<1x32xf32>
    %136 = arith.mulf %132, %132 : vector<16x32xf32>
    %cst_39 = arith.constant dense<0.000000e+00> : vector<16xf32>
    %137 = vector.multi_reduction <add>, %136, %cst_39 [1] : vector<16x32xf32> to vector<16xf32>
    %138 = vector.shape_cast %137 : vector<16xf32> to vector<16x1xf32>
    %cst_40 = arith.constant 3.200000e+01 : f32
    %139 = vector.broadcast %cst_40 : f32 to vector<16x1xf32>
    %140 = arith.divf %138, %139 : vector<16x1xf32>
    %cst_41 = arith.constant 9.99999997E-7 : f32
    %141 = vector.broadcast %cst_41 : f32 to vector<16x1xf32>
    %142 = arith.addf %140, %141 : vector<16x1xf32>
    %143 = math.rsqrt %142 : vector<16x1xf32>
    %144 = vector.broadcast %143 : vector<16x1xf32> to vector<16x32xf32>
    %145 = arith.mulf %132, %144 : vector<16x32xf32>
    %146 = vector.broadcast %135 : vector<1x32xf32> to vector<16x32xf32>
    %147 = arith.mulf %145, %146 : vector<16x32xf32>
    %148 = vector.extract_strided_slice %134 {offsets = [0, 0], sizes = [32, 192], strides = [1, 1]} : vector<32x256xf32> to vector<32x192xf32>
    %149 = arith.truncf %147 : vector<16x32xf32> to vector<16x32xbf16>
    %150 = arith.truncf %148 : vector<32x192xf32> to vector<32x192xbf16>
    %cst_42 = arith.constant dense<0.000000e+00> : vector<16x192xf32>
    %151 = tpu.matmul %149, %150, %cst_42 {dimension_numbers = #tpu.dot_dimension_numbers<[1], [0], [0], [1], [0, 0, 1, 1], [], []>} : vector<16x32xbf16>, vector<32x192xbf16>, vector<16x192xf32> -> vector<16x192xf32>
    %152 = vector.shape_cast %151 : vector<16x192xf32> to vector<2x8x192xf32>
    %153 = vector.extract_strided_slice %152 {offsets = [0, 0, 0], sizes = [2, 8, 32], strides = [1, 1, 1]} : vector<2x8x192xf32> to vector<2x8x32xf32>
    %154 = vector.extract_strided_slice %152 {offsets = [0, 0, 32], sizes = [2, 8, 32], strides = [1, 1, 1]} : vector<2x8x192xf32> to vector<2x8x32xf32>
    %155 = vector.extract_strided_slice %152 {offsets = [0, 0, 64], sizes = [2, 8, 128], strides = [1, 1, 1]} : vector<2x8x192xf32> to vector<2x8x128xf32>
    %156 = vector.extract_strided_slice %153 {offsets = [0, 0, 0], sizes = [2, 8, 8], strides = [1, 1, 1]} : vector<2x8x32xf32> to vector<2x8x8xf32>
    %157 = vector.extract_strided_slice %153 {offsets = [0, 0, 8], sizes = [2, 8, 8], strides = [1, 1, 1]} : vector<2x8x32xf32> to vector<2x8x8xf32>
    %158 = vector.extract_strided_slice %153 {offsets = [0, 0, 16], sizes = [2, 8, 8], strides = [1, 1, 1]} : vector<2x8x32xf32> to vector<2x8x8xf32>
    %159 = vector.extract_strided_slice %153 {offsets = [0, 0, 24], sizes = [2, 8, 8], strides = [1, 1, 1]} : vector<2x8x32xf32> to vector<2x8x8xf32>
    %160 = tpu.concatenate %156, %157, %158, %159 in 0 : vector<2x8x8xf32>, vector<2x8x8xf32>, vector<2x8x8xf32>, vector<2x8x8xf32> -> vector<8x8x8xf32>
    %161 = vector.extract_strided_slice %154 {offsets = [0, 0, 0], sizes = [2, 8, 8], strides = [1, 1, 1]} : vector<2x8x32xf32> to vector<2x8x8xf32>
    %162 = vector.extract_strided_slice %154 {offsets = [0, 0, 8], sizes = [2, 8, 8], strides = [1, 1, 1]} : vector<2x8x32xf32> to vector<2x8x8xf32>
    %163 = vector.extract_strided_slice %154 {offsets = [0, 0, 16], sizes = [2, 8, 8], strides = [1, 1, 1]} : vector<2x8x32xf32> to vector<2x8x8xf32>
    %164 = vector.extract_strided_slice %154 {offsets = [0, 0, 24], sizes = [2, 8, 8], strides = [1, 1, 1]} : vector<2x8x32xf32> to vector<2x8x8xf32>
    %165 = tpu.concatenate %161, %162, %163, %164 in 0 : vector<2x8x8xf32>, vector<2x8x8xf32>, vector<2x8x8xf32>, vector<2x8x8xf32> -> vector<8x8x8xf32>
    %166 = vector.extract_strided_slice %155 {offsets = [0, 0, 0], sizes = [2, 8, 32], strides = [1, 1, 1]} : vector<2x8x128xf32> to vector<2x8x32xf32>
    %167 = vector.extract_strided_slice %155 {offsets = [0, 0, 32], sizes = [2, 8, 32], strides = [1, 1, 1]} : vector<2x8x128xf32> to vector<2x8x32xf32>
    %168 = vector.extract_strided_slice %155 {offsets = [0, 0, 64], sizes = [2, 8, 32], strides = [1, 1, 1]} : vector<2x8x128xf32> to vector<2x8x32xf32>
    %169 = vector.extract_strided_slice %155 {offsets = [0, 0, 96], sizes = [2, 8, 32], strides = [1, 1, 1]} : vector<2x8x128xf32> to vector<2x8x32xf32>
    %170 = tpu.concatenate %166, %167, %168, %169 in 0 : vector<2x8x32xf32>, vector<2x8x32xf32>, vector<2x8x32xf32>, vector<2x8x32xf32> -> vector<8x8x32xf32>
    %171 = arith.truncf %160 : vector<8x8x8xf32> to vector<8x8x8xbf16>
    %172 = arith.truncf %165 : vector<8x8x8xf32> to vector<8x8x8xbf16>
    "tpu.trace_start"() <{level = 10 : i32, message = "gqd,gkd->gqk"}> : () -> ()
    %cst_43 = arith.constant dense<0.000000e+00> : vector<8x8x8xf32>
    %173 = tpu.matmul %171, %172, %cst_43 {dimension_numbers = #tpu.dot_dimension_numbers<[2], [2], [1], [1], [0, 0, 0, 1, 1, 1], [0], [0]>} : vector<8x8x8xbf16>, vector<8x8x8xbf16>, vector<8x8x8xf32> -> vector<8x8x8xf32>
    "tpu.trace_stop"() : () -> ()
    %174 = arith.addf %173, %25 : vector<8x8x8xf32>
    %cst_44 = arith.constant dense<0xFF800000> : vector<8x8xf32>
    %175 = vector.multi_reduction <maximumf>, %174, %cst_44 [2] : vector<8x8x8xf32> to vector<8x8xf32>
    %176 = vector.shape_cast %175 : vector<8x8xf32> to vector<8x8x1xf32>
    %177 = vector.broadcast %176 : vector<8x8x1xf32> to vector<8x8x8xf32>
    %178 = arith.subf %174, %177 : vector<8x8x8xf32>
    %179 = math.exp %178 : vector<8x8x8xf32>
    %cst_45 = arith.constant dense<0.000000e+00> : vector<8x8xf32>
    %180 = vector.multi_reduction <add>, %179, %cst_45 [2] : vector<8x8x8xf32> to vector<8x8xf32>
    %181 = vector.shape_cast %180 : vector<8x8xf32> to vector<8x8x1xf32>
    %182 = tpu.reciprocal %181 {approx = true} : vector<8x8x1xf32> -> vector<8x8x1xf32>
    %183 = vector.broadcast %182 : vector<8x8x1xf32> to vector<8x8x8xf32>
    %184 = arith.mulf %179, %183 : vector<8x8x8xf32>
    %185 = arith.truncf %184 : vector<8x8x8xf32> to vector<8x8x8xbf16>
    %186 = arith.truncf %170 : vector<8x8x32xf32> to vector<8x8x32xbf16>
    "tpu.trace_start"() <{level = 10 : i32, message = "gqk,gkd->gqd"}> : () -> ()
    %cst_46 = arith.constant dense<0.000000e+00> : vector<8x8x32xf32>
    %187 = tpu.matmul %185, %186, %cst_46 {dimension_numbers = #tpu.dot_dimension_numbers<[2], [1], [1], [2], [0, 0, 0, 1, 1, 2], [0], [0]>} : vector<8x8x8xbf16>, vector<8x8x32xbf16>, vector<8x8x32xf32> -> vector<8x8x32xf32>
    "tpu.trace_stop"() : () -> ()
    %188 = vector.extract_strided_slice %187 {offsets = [0, 0, 0], sizes = [2, 8, 32], strides = [1, 1, 1]} : vector<8x8x32xf32> to vector<2x8x32xf32>
    %189 = vector.extract_strided_slice %187 {offsets = [2, 0, 0], sizes = [2, 8, 32], strides = [1, 1, 1]} : vector<8x8x32xf32> to vector<2x8x32xf32>
    %190 = arith.addf %188, %189 : vector<2x8x32xf32>
    %191 = vector.extract_strided_slice %187 {offsets = [4, 0, 0], sizes = [2, 8, 32], strides = [1, 1, 1]} : vector<8x8x32xf32> to vector<2x8x32xf32>
    %192 = arith.addf %190, %191 : vector<2x8x32xf32>
    %193 = vector.extract_strided_slice %187 {offsets = [6, 0, 0], sizes = [2, 8, 32], strides = [1, 1, 1]} : vector<8x8x32xf32> to vector<2x8x32xf32>
    %194 = arith.addf %192, %193 : vector<2x8x32xf32>
    %195 = vector.shape_cast %194 : vector<2x8x32xf32> to vector<16x32xf32>
    %196 = arith.addf %132, %195 : vector<16x32xf32>
    %197 = vector.extract_strided_slice %1 {offsets = [3, 0], sizes = [1, 32], strides = [1, 1]} : vector<12x32xf32> to vector<1x32xf32>
    %198 = arith.mulf %196, %196 : vector<16x32xf32>
    %cst_47 = arith.constant dense<0.000000e+00> : vector<16xf32>
    %199 = vector.multi_reduction <add>, %198, %cst_47 [1] : vector<16x32xf32> to vector<16xf32>
    %200 = vector.shape_cast %199 : vector<16xf32> to vector<16x1xf32>
    %cst_48 = arith.constant 3.200000e+01 : f32
    %201 = vector.broadcast %cst_48 : f32 to vector<16x1xf32>
    %202 = arith.divf %200, %201 : vector<16x1xf32>
    %cst_49 = arith.constant 9.99999997E-7 : f32
    %203 = vector.broadcast %cst_49 : f32 to vector<16x1xf32>
    %204 = arith.addf %202, %203 : vector<16x1xf32>
    %205 = math.rsqrt %204 : vector<16x1xf32>
    %206 = vector.broadcast %205 : vector<16x1xf32> to vector<16x32xf32>
    %207 = arith.mulf %196, %206 : vector<16x32xf32>
    %208 = vector.broadcast %197 : vector<1x32xf32> to vector<16x32xf32>
    %209 = arith.mulf %207, %208 : vector<16x32xf32>
    %210 = vector.extract_strided_slice %134 {offsets = [0, 192], sizes = [32, 64], strides = [1, 1]} : vector<32x256xf32> to vector<32x64xf32>
    %c1_50 = arith.constant 1 : index
    %c0_51 = arith.constant 0 : index
    %c0_52 = arith.constant 0 : index
    %211 = vector.load %arg7[%c1_50, %c0_51, %c0_52] : memref<4x64x32xf32, #tpu.memory_space<vmem>>, vector<1x64x32xf32>
    %212 = vector.shape_cast %211 : vector<1x64x32xf32> to vector<64x32xf32>
    %213 = arith.truncf %209 : vector<16x32xf32> to vector<16x32xbf16>
    %214 = arith.truncf %210 : vector<32x64xf32> to vector<32x64xbf16>
    %cst_53 = arith.constant dense<0.000000e+00> : vector<16x64xf32>
    %215 = tpu.matmul %213, %214, %cst_53 {dimension_numbers = #tpu.dot_dimension_numbers<[1], [0], [0], [1], [0, 0, 1, 1], [], []>} : vector<16x32xbf16>, vector<32x64xbf16>, vector<16x64xf32> -> vector<16x64xf32>
    %cst_54 = arith.constant 0.000000e+00 : f32
    %216 = vector.broadcast %cst_54 : f32 to vector<16x64xf32>
    %217 = arith.maximumf %215, %216 : vector<16x64xf32>
    %218 = arith.truncf %217 : vector<16x64xf32> to vector<16x64xbf16>
    %219 = arith.truncf %212 : vector<64x32xf32> to vector<64x32xbf16>
    %cst_55 = arith.constant dense<0.000000e+00> : vector<16x32xf32>
    %220 = tpu.matmul %218, %219, %cst_55 {dimension_numbers = #tpu.dot_dimension_numbers<[1], [0], [0], [1], [0, 0, 1, 1], [], []>} : vector<16x64xbf16>, vector<64x32xbf16>, vector<16x32xf32> -> vector<16x32xf32>
    %221 = arith.addf %196, %220 : vector<16x32xf32>
    %222 = vector.extract_strided_slice %1 {offsets = [4, 0], sizes = [1, 32], strides = [1, 1]} : vector<12x32xf32> to vector<1x32xf32>
    %223 = arith.mulf %221, %221 : vector<16x32xf32>
    %cst_56 = arith.constant dense<0.000000e+00> : vector<16xf32>
    %224 = vector.multi_reduction <add>, %223, %cst_56 [1] : vector<16x32xf32> to vector<16xf32>
    %225 = vector.shape_cast %224 : vector<16xf32> to vector<16x1xf32>
    %cst_57 = arith.constant 3.200000e+01 : f32
    %226 = vector.broadcast %cst_57 : f32 to vector<16x1xf32>
    %227 = arith.divf %225, %226 : vector<16x1xf32>
    %cst_58 = arith.constant 9.99999997E-7 : f32
    %228 = vector.broadcast %cst_58 : f32 to vector<16x1xf32>
    %229 = arith.addf %227, %228 : vector<16x1xf32>
    %230 = math.rsqrt %229 : vector<16x1xf32>
    %231 = vector.broadcast %230 : vector<16x1xf32> to vector<16x32xf32>
    %232 = arith.mulf %221, %231 : vector<16x32xf32>
    %233 = vector.broadcast %222 : vector<1x32xf32> to vector<16x32xf32>
    %234 = arith.mulf %232, %233 : vector<16x32xf32>
    %c0_59 = arith.constant 0 : index
    %c0_60 = arith.constant 0 : index
    %c0_61 = arith.constant 0 : index
    %235 = vector.load %arg6[%c0_59, %c0_60, %c0_61] : memref<2x32x448xf32, #tpu.memory_space<vmem>>, vector<1x32x448xf32>
    %236 = vector.shape_cast %235 : vector<1x32x448xf32> to vector<32x448xf32>
    %237 = vector.extract_strided_slice %1 {offsets = [5, 0], sizes = [1, 32], strides = [1, 1]} : vector<12x32xf32> to vector<1x32xf32>
    %238 = arith.mulf %12, %12 : vector<16x32xf32>
    %cst_62 = arith.constant dense<0.000000e+00> : vector<16xf32>
    %239 = vector.multi_reduction <add>, %238, %cst_62 [1] : vector<16x32xf32> to vector<16xf32>
    %240 = vector.shape_cast %239 : vector<16xf32> to vector<16x1xf32>
    %cst_63 = arith.constant 3.200000e+01 : f32
    %241 = vector.broadcast %cst_63 : f32 to vector<16x1xf32>
    %242 = arith.divf %240, %241 : vector<16x1xf32>
    %cst_64 = arith.constant 9.99999997E-7 : f32
    %243 = vector.broadcast %cst_64 : f32 to vector<16x1xf32>
    %244 = arith.addf %242, %243 : vector<16x1xf32>
    %245 = math.rsqrt %244 : vector<16x1xf32>
    %246 = vector.broadcast %245 : vector<16x1xf32> to vector<16x32xf32>
    %247 = arith.mulf %12, %246 : vector<16x32xf32>
    %248 = vector.broadcast %237 : vector<1x32xf32> to vector<16x32xf32>
    %249 = arith.mulf %247, %248 : vector<16x32xf32>
    %250 = vector.extract_strided_slice %236 {offsets = [0, 0], sizes = [32, 192], strides = [1, 1]} : vector<32x448xf32> to vector<32x192xf32>
    %251 = arith.truncf %249 : vector<16x32xf32> to vector<16x32xbf16>
    %252 = arith.truncf %250 : vector<32x192xf32> to vector<32x192xbf16>
    %cst_65 = arith.constant dense<0.000000e+00> : vector<16x192xf32>
    %253 = tpu.matmul %251, %252, %cst_65 {dimension_numbers = #tpu.dot_dimension_numbers<[1], [0], [0], [1], [0, 0, 1, 1], [], []>} : vector<16x32xbf16>, vector<32x192xbf16>, vector<16x192xf32> -> vector<16x192xf32>
    %254 = vector.shape_cast %253 : vector<16x192xf32> to vector<2x8x192xf32>
    %255 = vector.extract_strided_slice %254 {offsets = [0, 0, 0], sizes = [2, 8, 32], strides = [1, 1, 1]} : vector<2x8x192xf32> to vector<2x8x32xf32>
    %256 = vector.extract_strided_slice %254 {offsets = [0, 0, 32], sizes = [2, 8, 32], strides = [1, 1, 1]} : vector<2x8x192xf32> to vector<2x8x32xf32>
    %257 = vector.extract_strided_slice %254 {offsets = [0, 0, 64], sizes = [2, 8, 128], strides = [1, 1, 1]} : vector<2x8x192xf32> to vector<2x8x128xf32>
    %258 = vector.extract_strided_slice %255 {offsets = [0, 0, 0], sizes = [2, 8, 8], strides = [1, 1, 1]} : vector<2x8x32xf32> to vector<2x8x8xf32>
    %259 = vector.extract_strided_slice %255 {offsets = [0, 0, 8], sizes = [2, 8, 8], strides = [1, 1, 1]} : vector<2x8x32xf32> to vector<2x8x8xf32>
    %260 = vector.extract_strided_slice %255 {offsets = [0, 0, 16], sizes = [2, 8, 8], strides = [1, 1, 1]} : vector<2x8x32xf32> to vector<2x8x8xf32>
    %261 = vector.extract_strided_slice %255 {offsets = [0, 0, 24], sizes = [2, 8, 8], strides = [1, 1, 1]} : vector<2x8x32xf32> to vector<2x8x8xf32>
    %262 = tpu.concatenate %258, %259, %260, %261 in 0 : vector<2x8x8xf32>, vector<2x8x8xf32>, vector<2x8x8xf32>, vector<2x8x8xf32> -> vector<8x8x8xf32>
    %263 = vector.extract_strided_slice %256 {offsets = [0, 0, 0], sizes = [2, 8, 8], strides = [1, 1, 1]} : vector<2x8x32xf32> to vector<2x8x8xf32>
    %264 = vector.extract_strided_slice %256 {offsets = [0, 0, 8], sizes = [2, 8, 8], strides = [1, 1, 1]} : vector<2x8x32xf32> to vector<2x8x8xf32>
    %265 = vector.extract_strided_slice %256 {offsets = [0, 0, 16], sizes = [2, 8, 8], strides = [1, 1, 1]} : vector<2x8x32xf32> to vector<2x8x8xf32>
    %266 = vector.extract_strided_slice %256 {offsets = [0, 0, 24], sizes = [2, 8, 8], strides = [1, 1, 1]} : vector<2x8x32xf32> to vector<2x8x8xf32>
    %267 = tpu.concatenate %263, %264, %265, %266 in 0 : vector<2x8x8xf32>, vector<2x8x8xf32>, vector<2x8x8xf32>, vector<2x8x8xf32> -> vector<8x8x8xf32>
    %268 = vector.extract_strided_slice %257 {offsets = [0, 0, 0], sizes = [2, 8, 32], strides = [1, 1, 1]} : vector<2x8x128xf32> to vector<2x8x32xf32>
    %269 = vector.extract_strided_slice %257 {offsets = [0, 0, 32], sizes = [2, 8, 32], strides = [1, 1, 1]} : vector<2x8x128xf32> to vector<2x8x32xf32>
    %270 = vector.extract_strided_slice %257 {offsets = [0, 0, 64], sizes = [2, 8, 32], strides = [1, 1, 1]} : vector<2x8x128xf32> to vector<2x8x32xf32>
    %271 = vector.extract_strided_slice %257 {offsets = [0, 0, 96], sizes = [2, 8, 32], strides = [1, 1, 1]} : vector<2x8x128xf32> to vector<2x8x32xf32>
    %272 = tpu.concatenate %268, %269, %270, %271 in 0 : vector<2x8x32xf32>, vector<2x8x32xf32>, vector<2x8x32xf32>, vector<2x8x32xf32> -> vector<8x8x32xf32>
    %273 = arith.truncf %262 : vector<8x8x8xf32> to vector<8x8x8xbf16>
    %274 = arith.truncf %267 : vector<8x8x8xf32> to vector<8x8x8xbf16>
    "tpu.trace_start"() <{level = 10 : i32, message = "gqd,gkd->gqk"}> : () -> ()
    %cst_66 = arith.constant dense<0.000000e+00> : vector<8x8x8xf32>
    %275 = tpu.matmul %273, %274, %cst_66 {dimension_numbers = #tpu.dot_dimension_numbers<[2], [2], [1], [1], [0, 0, 0, 1, 1, 1], [0], [0]>} : vector<8x8x8xbf16>, vector<8x8x8xbf16>, vector<8x8x8xf32> -> vector<8x8x8xf32>
    "tpu.trace_stop"() : () -> ()
    %276 = arith.addf %275, %39 : vector<8x8x8xf32>
    %cst_67 = arith.constant dense<0xFF800000> : vector<8x8xf32>
    %277 = vector.multi_reduction <maximumf>, %276, %cst_67 [2] : vector<8x8x8xf32> to vector<8x8xf32>
    %278 = vector.shape_cast %277 : vector<8x8xf32> to vector<8x8x1xf32>
    %279 = vector.broadcast %278 : vector<8x8x1xf32> to vector<8x8x8xf32>
    %280 = arith.subf %276, %279 : vector<8x8x8xf32>
    %281 = math.exp %280 : vector<8x8x8xf32>
    %cst_68 = arith.constant dense<0.000000e+00> : vector<8x8xf32>
    %282 = vector.multi_reduction <add>, %281, %cst_68 [2] : vector<8x8x8xf32> to vector<8x8xf32>
    %283 = vector.shape_cast %282 : vector<8x8xf32> to vector<8x8x1xf32>
    %284 = tpu.reciprocal %283 {approx = true} : vector<8x8x1xf32> -> vector<8x8x1xf32>
    %285 = vector.broadcast %284 : vector<8x8x1xf32> to vector<8x8x8xf32>
    %286 = arith.mulf %281, %285 : vector<8x8x8xf32>
    %287 = arith.truncf %286 : vector<8x8x8xf32> to vector<8x8x8xbf16>
    %288 = arith.truncf %272 : vector<8x8x32xf32> to vector<8x8x32xbf16>
    "tpu.trace_start"() <{level = 10 : i32, message = "gqk,gkd->gqd"}> : () -> ()
    %cst_69 = arith.constant dense<0.000000e+00> : vector<8x8x32xf32>
    %289 = tpu.matmul %287, %288, %cst_69 {dimension_numbers = #tpu.dot_dimension_numbers<[2], [1], [1], [2], [0, 0, 0, 1, 1, 2], [0], [0]>} : vector<8x8x8xbf16>, vector<8x8x32xbf16>, vector<8x8x32xf32> -> vector<8x8x32xf32>
    "tpu.trace_stop"() : () -> ()
    %290 = vector.extract_strided_slice %289 {offsets = [0, 0, 0], sizes = [2, 8, 32], strides = [1, 1, 1]} : vector<8x8x32xf32> to vector<2x8x32xf32>
    %291 = vector.extract_strided_slice %289 {offsets = [2, 0, 0], sizes = [2, 8, 32], strides = [1, 1, 1]} : vector<8x8x32xf32> to vector<2x8x32xf32>
    %292 = arith.addf %290, %291 : vector<2x8x32xf32>
    %293 = vector.extract_strided_slice %289 {offsets = [4, 0, 0], sizes = [2, 8, 32], strides = [1, 1, 1]} : vector<8x8x32xf32> to vector<2x8x32xf32>
    %294 = arith.addf %292, %293 : vector<2x8x32xf32>
    %295 = vector.extract_strided_slice %289 {offsets = [6, 0, 0], sizes = [2, 8, 32], strides = [1, 1, 1]} : vector<8x8x32xf32> to vector<2x8x32xf32>
    %296 = arith.addf %294, %295 : vector<2x8x32xf32>
    %297 = vector.shape_cast %296 : vector<2x8x32xf32> to vector<16x32xf32>
    %298 = arith.addf %12, %297 : vector<16x32xf32>
    %299 = vector.extract_strided_slice %1 {offsets = [6, 0], sizes = [1, 32], strides = [1, 1]} : vector<12x32xf32> to vector<1x32xf32>
    %300 = arith.mulf %298, %298 : vector<16x32xf32>
    %cst_70 = arith.constant dense<0.000000e+00> : vector<16xf32>
    %301 = vector.multi_reduction <add>, %300, %cst_70 [1] : vector<16x32xf32> to vector<16xf32>
    %302 = vector.shape_cast %301 : vector<16xf32> to vector<16x1xf32>
    %cst_71 = arith.constant 3.200000e+01 : f32
    %303 = vector.broadcast %cst_71 : f32 to vector<16x1xf32>
    %304 = arith.divf %302, %303 : vector<16x1xf32>
    %cst_72 = arith.constant 9.99999997E-7 : f32
    %305 = vector.broadcast %cst_72 : f32 to vector<16x1xf32>
    %306 = arith.addf %304, %305 : vector<16x1xf32>
    %307 = math.rsqrt %306 : vector<16x1xf32>
    %308 = vector.broadcast %307 : vector<16x1xf32> to vector<16x32xf32>
    %309 = arith.mulf %298, %308 : vector<16x32xf32>
    %310 = vector.broadcast %299 : vector<1x32xf32> to vector<16x32xf32>
    %311 = arith.mulf %309, %310 : vector<16x32xf32>
    %312 = vector.extract_strided_slice %236 {offsets = [0, 192], sizes = [32, 32], strides = [1, 1]} : vector<32x448xf32> to vector<32x32xf32>
    %313 = vector.extract_strided_slice %236 {offsets = [0, 224], sizes = [32, 160], strides = [1, 1]} : vector<32x448xf32> to vector<32x160xf32>
    %314 = arith.truncf %311 : vector<16x32xf32> to vector<16x32xbf16>
    %315 = arith.truncf %312 : vector<32x32xf32> to vector<32x32xbf16>
    %cst_73 = arith.constant dense<0.000000e+00> : vector<16x32xf32>
    %316 = tpu.matmul %314, %315, %cst_73 {dimension_numbers = #tpu.dot_dimension_numbers<[1], [0], [0], [1], [0, 0, 1, 1], [], []>} : vector<16x32xbf16>, vector<32x32xbf16>, vector<16x32xf32> -> vector<16x32xf32>
    %317 = vector.shape_cast %316 : vector<16x32xf32> to vector<2x8x32xf32>
    %318 = arith.truncf %234 : vector<16x32xf32> to vector<16x32xbf16>
    %319 = arith.truncf %313 : vector<32x160xf32> to vector<32x160xbf16>
    %cst_74 = arith.constant dense<0.000000e+00> : vector<16x160xf32>
    %320 = tpu.matmul %318, %319, %cst_74 {dimension_numbers = #tpu.dot_dimension_numbers<[1], [0], [0], [1], [0, 0, 1, 1], [], []>} : vector<16x32xbf16>, vector<32x160xbf16>, vector<16x160xf32> -> vector<16x160xf32>
    %321 = vector.shape_cast %320 : vector<16x160xf32> to vector<2x8x160xf32>
    %322 = vector.extract_strided_slice %321 {offsets = [0, 0, 0], sizes = [2, 8, 32], strides = [1, 1, 1]} : vector<2x8x160xf32> to vector<2x8x32xf32>
    %323 = vector.extract_strided_slice %321 {offsets = [0, 0, 32], sizes = [2, 8, 128], strides = [1, 1, 1]} : vector<2x8x160xf32> to vector<2x8x128xf32>
    %324 = vector.extract_strided_slice %317 {offsets = [0, 0, 0], sizes = [2, 8, 8], strides = [1, 1, 1]} : vector<2x8x32xf32> to vector<2x8x8xf32>
    %325 = vector.extract_strided_slice %317 {offsets = [0, 0, 8], sizes = [2, 8, 8], strides = [1, 1, 1]} : vector<2x8x32xf32> to vector<2x8x8xf32>
    %326 = vector.extract_strided_slice %317 {offsets = [0, 0, 16], sizes = [2, 8, 8], strides = [1, 1, 1]} : vector<2x8x32xf32> to vector<2x8x8xf32>
    %327 = vector.extract_strided_slice %317 {offsets = [0, 0, 24], sizes = [2, 8, 8], strides = [1, 1, 1]} : vector<2x8x32xf32> to vector<2x8x8xf32>
    %328 = tpu.concatenate %324, %325, %326, %327 in 0 : vector<2x8x8xf32>, vector<2x8x8xf32>, vector<2x8x8xf32>, vector<2x8x8xf32> -> vector<8x8x8xf32>
    %329 = vector.extract_strided_slice %322 {offsets = [0, 0, 0], sizes = [2, 8, 8], strides = [1, 1, 1]} : vector<2x8x32xf32> to vector<2x8x8xf32>
    %330 = vector.extract_strided_slice %322 {offsets = [0, 0, 8], sizes = [2, 8, 8], strides = [1, 1, 1]} : vector<2x8x32xf32> to vector<2x8x8xf32>
    %331 = vector.extract_strided_slice %322 {offsets = [0, 0, 16], sizes = [2, 8, 8], strides = [1, 1, 1]} : vector<2x8x32xf32> to vector<2x8x8xf32>
    %332 = vector.extract_strided_slice %322 {offsets = [0, 0, 24], sizes = [2, 8, 8], strides = [1, 1, 1]} : vector<2x8x32xf32> to vector<2x8x8xf32>
    %333 = tpu.concatenate %329, %330, %331, %332 in 0 : vector<2x8x8xf32>, vector<2x8x8xf32>, vector<2x8x8xf32>, vector<2x8x8xf32> -> vector<8x8x8xf32>
    %334 = vector.extract_strided_slice %323 {offsets = [0, 0, 0], sizes = [2, 8, 32], strides = [1, 1, 1]} : vector<2x8x128xf32> to vector<2x8x32xf32>
    %335 = vector.extract_strided_slice %323 {offsets = [0, 0, 32], sizes = [2, 8, 32], strides = [1, 1, 1]} : vector<2x8x128xf32> to vector<2x8x32xf32>
    %336 = vector.extract_strided_slice %323 {offsets = [0, 0, 64], sizes = [2, 8, 32], strides = [1, 1, 1]} : vector<2x8x128xf32> to vector<2x8x32xf32>
    %337 = vector.extract_strided_slice %323 {offsets = [0, 0, 96], sizes = [2, 8, 32], strides = [1, 1, 1]} : vector<2x8x128xf32> to vector<2x8x32xf32>
    %338 = tpu.concatenate %334, %335, %336, %337 in 0 : vector<2x8x32xf32>, vector<2x8x32xf32>, vector<2x8x32xf32>, vector<2x8x32xf32> -> vector<8x8x32xf32>
    %339 = arith.truncf %328 : vector<8x8x8xf32> to vector<8x8x8xbf16>
    %340 = arith.truncf %333 : vector<8x8x8xf32> to vector<8x8x8xbf16>
    "tpu.trace_start"() <{level = 10 : i32, message = "gqd,gkd->gqk"}> : () -> ()
    %cst_75 = arith.constant dense<0.000000e+00> : vector<8x8x8xf32>
    %341 = tpu.matmul %339, %340, %cst_75 {dimension_numbers = #tpu.dot_dimension_numbers<[2], [2], [1], [1], [0, 0, 0, 1, 1, 1], [0], [0]>} : vector<8x8x8xbf16>, vector<8x8x8xbf16>, vector<8x8x8xf32> -> vector<8x8x8xf32>
    "tpu.trace_stop"() : () -> ()
    %342 = arith.addf %341, %43 : vector<8x8x8xf32>
    %cst_76 = arith.constant dense<0xFF800000> : vector<8x8xf32>
    %343 = vector.multi_reduction <maximumf>, %342, %cst_76 [2] : vector<8x8x8xf32> to vector<8x8xf32>
    %344 = vector.shape_cast %343 : vector<8x8xf32> to vector<8x8x1xf32>
    %345 = vector.broadcast %344 : vector<8x8x1xf32> to vector<8x8x8xf32>
    %346 = arith.subf %342, %345 : vector<8x8x8xf32>
    %347 = math.exp %346 : vector<8x8x8xf32>
    %cst_77 = arith.constant dense<0.000000e+00> : vector<8x8xf32>
    %348 = vector.multi_reduction <add>, %347, %cst_77 [2] : vector<8x8x8xf32> to vector<8x8xf32>
    %349 = vector.shape_cast %348 : vector<8x8xf32> to vector<8x8x1xf32>
    %350 = tpu.reciprocal %349 {approx = true} : vector<8x8x1xf32> -> vector<8x8x1xf32>
    %351 = vector.broadcast %350 : vector<8x8x1xf32> to vector<8x8x8xf32>
    %352 = arith.mulf %347, %351 : vector<8x8x8xf32>
    %353 = arith.truncf %352 : vector<8x8x8xf32> to vector<8x8x8xbf16>
    %354 = arith.truncf %338 : vector<8x8x32xf32> to vector<8x8x32xbf16>
    "tpu.trace_start"() <{level = 10 : i32, message = "gqk,gkd->gqd"}> : () -> ()
    %cst_78 = arith.constant dense<0.000000e+00> : vector<8x8x32xf32>
    %355 = tpu.matmul %353, %354, %cst_78 {dimension_numbers = #tpu.dot_dimension_numbers<[2], [1], [1], [2], [0, 0, 0, 1, 1, 2], [0], [0]>} : vector<8x8x8xbf16>, vector<8x8x32xbf16>, vector<8x8x32xf32> -> vector<8x8x32xf32>
    "tpu.trace_stop"() : () -> ()
    %356 = vector.extract_strided_slice %355 {offsets = [0, 0, 0], sizes = [2, 8, 32], strides = [1, 1, 1]} : vector<8x8x32xf32> to vector<2x8x32xf32>
    %357 = vector.extract_strided_slice %355 {offsets = [2, 0, 0], sizes = [2, 8, 32], strides = [1, 1, 1]} : vector<8x8x32xf32> to vector<2x8x32xf32>
    %358 = arith.addf %356, %357 : vector<2x8x32xf32>
    %359 = vector.extract_strided_slice %355 {offsets = [4, 0, 0], sizes = [2, 8, 32], strides = [1, 1, 1]} : vector<8x8x32xf32> to vector<2x8x32xf32>
    %360 = arith.addf %358, %359 : vector<2x8x32xf32>
    %361 = vector.extract_strided_slice %355 {offsets = [6, 0, 0], sizes = [2, 8, 32], strides = [1, 1, 1]} : vector<8x8x32xf32> to vector<2x8x32xf32>
    %362 = arith.addf %360, %361 : vector<2x8x32xf32>
    %363 = vector.shape_cast %362 : vector<2x8x32xf32> to vector<16x32xf32>
    %364 = arith.addf %298, %363 : vector<16x32xf32>
    %365 = vector.extract_strided_slice %1 {offsets = [7, 0], sizes = [1, 32], strides = [1, 1]} : vector<12x32xf32> to vector<1x32xf32>
    %366 = arith.mulf %364, %364 : vector<16x32xf32>
    %cst_79 = arith.constant dense<0.000000e+00> : vector<16xf32>
    %367 = vector.multi_reduction <add>, %366, %cst_79 [1] : vector<16x32xf32> to vector<16xf32>
    %368 = vector.shape_cast %367 : vector<16xf32> to vector<16x1xf32>
    %cst_80 = arith.constant 3.200000e+01 : f32
    %369 = vector.broadcast %cst_80 : f32 to vector<16x1xf32>
    %370 = arith.divf %368, %369 : vector<16x1xf32>
    %cst_81 = arith.constant 9.99999997E-7 : f32
    %371 = vector.broadcast %cst_81 : f32 to vector<16x1xf32>
    %372 = arith.addf %370, %371 : vector<16x1xf32>
    %373 = math.rsqrt %372 : vector<16x1xf32>
    %374 = vector.broadcast %373 : vector<16x1xf32> to vector<16x32xf32>
    %375 = arith.mulf %364, %374 : vector<16x32xf32>
    %376 = vector.broadcast %365 : vector<1x32xf32> to vector<16x32xf32>
    %377 = arith.mulf %375, %376 : vector<16x32xf32>
    %378 = vector.extract_strided_slice %236 {offsets = [0, 384], sizes = [32, 64], strides = [1, 1]} : vector<32x448xf32> to vector<32x64xf32>
    %c2 = arith.constant 2 : index
    %c0_82 = arith.constant 0 : index
    %c0_83 = arith.constant 0 : index
    %379 = vector.load %arg7[%c2, %c0_82, %c0_83] : memref<4x64x32xf32, #tpu.memory_space<vmem>>, vector<1x64x32xf32>
    %380 = vector.shape_cast %379 : vector<1x64x32xf32> to vector<64x32xf32>
    %381 = arith.truncf %377 : vector<16x32xf32> to vector<16x32xbf16>
    %382 = arith.truncf %378 : vector<32x64xf32> to vector<32x64xbf16>
    %cst_84 = arith.constant dense<0.000000e+00> : vector<16x64xf32>
    %383 = tpu.matmul %381, %382, %cst_84 {dimension_numbers = #tpu.dot_dimension_numbers<[1], [0], [0], [1], [0, 0, 1, 1], [], []>} : vector<16x32xbf16>, vector<32x64xbf16>, vector<16x64xf32> -> vector<16x64xf32>
    %cst_85 = arith.constant 0.000000e+00 : f32
    %384 = vector.broadcast %cst_85 : f32 to vector<16x64xf32>
    %385 = arith.maximumf %383, %384 : vector<16x64xf32>
    %386 = arith.truncf %385 : vector<16x64xf32> to vector<16x64xbf16>
    %387 = arith.truncf %380 : vector<64x32xf32> to vector<64x32xbf16>
    %cst_86 = arith.constant dense<0.000000e+00> : vector<16x32xf32>
    %388 = tpu.matmul %386, %387, %cst_86 {dimension_numbers = #tpu.dot_dimension_numbers<[1], [0], [0], [1], [0, 0, 1, 1], [], []>} : vector<16x64xbf16>, vector<64x32xbf16>, vector<16x32xf32> -> vector<16x32xf32>
    %389 = arith.addf %364, %388 : vector<16x32xf32>
    %c1_87 = arith.constant 1 : index
    %c0_88 = arith.constant 0 : index
    %c0_89 = arith.constant 0 : index
    %390 = vector.load %arg6[%c1_87, %c0_88, %c0_89] : memref<2x32x448xf32, #tpu.memory_space<vmem>>, vector<1x32x448xf32>
    %391 = vector.shape_cast %390 : vector<1x32x448xf32> to vector<32x448xf32>
    %392 = vector.extract_strided_slice %1 {offsets = [8, 0], sizes = [1, 32], strides = [1, 1]} : vector<12x32xf32> to vector<1x32xf32>
    %393 = arith.mulf %389, %389 : vector<16x32xf32>
    %cst_90 = arith.constant dense<0.000000e+00> : vector<16xf32>
    %394 = vector.multi_reduction <add>, %393, %cst_90 [1] : vector<16x32xf32> to vector<16xf32>
    %395 = vector.shape_cast %394 : vector<16xf32> to vector<16x1xf32>
    %cst_91 = arith.constant 3.200000e+01 : f32
    %396 = vector.broadcast %cst_91 : f32 to vector<16x1xf32>
    %397 = arith.divf %395, %396 : vector<16x1xf32>
    %cst_92 = arith.constant 9.99999997E-7 : f32
    %398 = vector.broadcast %cst_92 : f32 to vector<16x1xf32>
    %399 = arith.addf %397, %398 : vector<16x1xf32>
    %400 = math.rsqrt %399 : vector<16x1xf32>
    %401 = vector.broadcast %400 : vector<16x1xf32> to vector<16x32xf32>
    %402 = arith.mulf %389, %401 : vector<16x32xf32>
    %403 = vector.broadcast %392 : vector<1x32xf32> to vector<16x32xf32>
    %404 = arith.mulf %402, %403 : vector<16x32xf32>
    %405 = vector.extract_strided_slice %391 {offsets = [0, 0], sizes = [32, 192], strides = [1, 1]} : vector<32x448xf32> to vector<32x192xf32>
    %406 = arith.truncf %404 : vector<16x32xf32> to vector<16x32xbf16>
    %407 = arith.truncf %405 : vector<32x192xf32> to vector<32x192xbf16>
    %cst_93 = arith.constant dense<0.000000e+00> : vector<16x192xf32>
    %408 = tpu.matmul %406, %407, %cst_93 {dimension_numbers = #tpu.dot_dimension_numbers<[1], [0], [0], [1], [0, 0, 1, 1], [], []>} : vector<16x32xbf16>, vector<32x192xbf16>, vector<16x192xf32> -> vector<16x192xf32>
    %409 = vector.shape_cast %408 : vector<16x192xf32> to vector<2x8x192xf32>
    %410 = vector.extract_strided_slice %409 {offsets = [0, 0, 0], sizes = [2, 8, 32], strides = [1, 1, 1]} : vector<2x8x192xf32> to vector<2x8x32xf32>
    %411 = vector.extract_strided_slice %409 {offsets = [0, 0, 32], sizes = [2, 8, 32], strides = [1, 1, 1]} : vector<2x8x192xf32> to vector<2x8x32xf32>
    %412 = vector.extract_strided_slice %409 {offsets = [0, 0, 64], sizes = [2, 8, 128], strides = [1, 1, 1]} : vector<2x8x192xf32> to vector<2x8x128xf32>
    %413 = vector.extract_strided_slice %410 {offsets = [0, 0, 0], sizes = [2, 8, 8], strides = [1, 1, 1]} : vector<2x8x32xf32> to vector<2x8x8xf32>
    %414 = vector.extract_strided_slice %410 {offsets = [0, 0, 8], sizes = [2, 8, 8], strides = [1, 1, 1]} : vector<2x8x32xf32> to vector<2x8x8xf32>
    %415 = vector.extract_strided_slice %410 {offsets = [0, 0, 16], sizes = [2, 8, 8], strides = [1, 1, 1]} : vector<2x8x32xf32> to vector<2x8x8xf32>
    %416 = vector.extract_strided_slice %410 {offsets = [0, 0, 24], sizes = [2, 8, 8], strides = [1, 1, 1]} : vector<2x8x32xf32> to vector<2x8x8xf32>
    %417 = tpu.concatenate %413, %414, %415, %416 in 0 : vector<2x8x8xf32>, vector<2x8x8xf32>, vector<2x8x8xf32>, vector<2x8x8xf32> -> vector<8x8x8xf32>
    %418 = vector.extract_strided_slice %411 {offsets = [0, 0, 0], sizes = [2, 8, 8], strides = [1, 1, 1]} : vector<2x8x32xf32> to vector<2x8x8xf32>
    %419 = vector.extract_strided_slice %411 {offsets = [0, 0, 8], sizes = [2, 8, 8], strides = [1, 1, 1]} : vector<2x8x32xf32> to vector<2x8x8xf32>
    %420 = vector.extract_strided_slice %411 {offsets = [0, 0, 16], sizes = [2, 8, 8], strides = [1, 1, 1]} : vector<2x8x32xf32> to vector<2x8x8xf32>
    %421 = vector.extract_strided_slice %411 {offsets = [0, 0, 24], sizes = [2, 8, 8], strides = [1, 1, 1]} : vector<2x8x32xf32> to vector<2x8x8xf32>
    %422 = tpu.concatenate %418, %419, %420, %421 in 0 : vector<2x8x8xf32>, vector<2x8x8xf32>, vector<2x8x8xf32>, vector<2x8x8xf32> -> vector<8x8x8xf32>
    %423 = vector.extract_strided_slice %412 {offsets = [0, 0, 0], sizes = [2, 8, 32], strides = [1, 1, 1]} : vector<2x8x128xf32> to vector<2x8x32xf32>
    %424 = vector.extract_strided_slice %412 {offsets = [0, 0, 32], sizes = [2, 8, 32], strides = [1, 1, 1]} : vector<2x8x128xf32> to vector<2x8x32xf32>
    %425 = vector.extract_strided_slice %412 {offsets = [0, 0, 64], sizes = [2, 8, 32], strides = [1, 1, 1]} : vector<2x8x128xf32> to vector<2x8x32xf32>
    %426 = vector.extract_strided_slice %412 {offsets = [0, 0, 96], sizes = [2, 8, 32], strides = [1, 1, 1]} : vector<2x8x128xf32> to vector<2x8x32xf32>
    %427 = tpu.concatenate %423, %424, %425, %426 in 0 : vector<2x8x32xf32>, vector<2x8x32xf32>, vector<2x8x32xf32>, vector<2x8x32xf32> -> vector<8x8x32xf32>
    %428 = arith.truncf %417 : vector<8x8x8xf32> to vector<8x8x8xbf16>
    %429 = arith.truncf %422 : vector<8x8x8xf32> to vector<8x8x8xbf16>
    "tpu.trace_start"() <{level = 10 : i32, message = "gqd,gkd->gqk"}> : () -> ()
    %cst_94 = arith.constant dense<0.000000e+00> : vector<8x8x8xf32>
    %430 = tpu.matmul %428, %429, %cst_94 {dimension_numbers = #tpu.dot_dimension_numbers<[2], [2], [1], [1], [0, 0, 0, 1, 1, 1], [0], [0]>} : vector<8x8x8xbf16>, vector<8x8x8xbf16>, vector<8x8x8xf32> -> vector<8x8x8xf32>
    "tpu.trace_stop"() : () -> ()
    %431 = arith.addf %430, %39 : vector<8x8x8xf32>
    %cst_95 = arith.constant dense<0xFF800000> : vector<8x8xf32>
    %432 = vector.multi_reduction <maximumf>, %431, %cst_95 [2] : vector<8x8x8xf32> to vector<8x8xf32>
    %433 = vector.shape_cast %432 : vector<8x8xf32> to vector<8x8x1xf32>
    %434 = vector.broadcast %433 : vector<8x8x1xf32> to vector<8x8x8xf32>
    %435 = arith.subf %431, %434 : vector<8x8x8xf32>
    %436 = math.exp %435 : vector<8x8x8xf32>
    %cst_96 = arith.constant dense<0.000000e+00> : vector<8x8xf32>
    %437 = vector.multi_reduction <add>, %436, %cst_96 [2] : vector<8x8x8xf32> to vector<8x8xf32>
    %438 = vector.shape_cast %437 : vector<8x8xf32> to vector<8x8x1xf32>
    %439 = tpu.reciprocal %438 {approx = true} : vector<8x8x1xf32> -> vector<8x8x1xf32>
    %440 = vector.broadcast %439 : vector<8x8x1xf32> to vector<8x8x8xf32>
    %441 = arith.mulf %436, %440 : vector<8x8x8xf32>
    %442 = arith.truncf %441 : vector<8x8x8xf32> to vector<8x8x8xbf16>
    %443 = arith.truncf %427 : vector<8x8x32xf32> to vector<8x8x32xbf16>
    "tpu.trace_start"() <{level = 10 : i32, message = "gqk,gkd->gqd"}> : () -> ()
    %cst_97 = arith.constant dense<0.000000e+00> : vector<8x8x32xf32>
    %444 = tpu.matmul %442, %443, %cst_97 {dimension_numbers = #tpu.dot_dimension_numbers<[2], [1], [1], [2], [0, 0, 0, 1, 1, 2], [0], [0]>} : vector<8x8x8xbf16>, vector<8x8x32xbf16>, vector<8x8x32xf32> -> vector<8x8x32xf32>
    "tpu.trace_stop"() : () -> ()
    %445 = vector.extract_strided_slice %444 {offsets = [0, 0, 0], sizes = [2, 8, 32], strides = [1, 1, 1]} : vector<8x8x32xf32> to vector<2x8x32xf32>
    %446 = vector.extract_strided_slice %444 {offsets = [2, 0, 0], sizes = [2, 8, 32], strides = [1, 1, 1]} : vector<8x8x32xf32> to vector<2x8x32xf32>
    %447 = arith.addf %445, %446 : vector<2x8x32xf32>
    %448 = vector.extract_strided_slice %444 {offsets = [4, 0, 0], sizes = [2, 8, 32], strides = [1, 1, 1]} : vector<8x8x32xf32> to vector<2x8x32xf32>
    %449 = arith.addf %447, %448 : vector<2x8x32xf32>
    %450 = vector.extract_strided_slice %444 {offsets = [6, 0, 0], sizes = [2, 8, 32], strides = [1, 1, 1]} : vector<8x8x32xf32> to vector<2x8x32xf32>
    %451 = arith.addf %449, %450 : vector<2x8x32xf32>
    %452 = vector.shape_cast %451 : vector<2x8x32xf32> to vector<16x32xf32>
    %453 = arith.addf %389, %452 : vector<16x32xf32>
    %454 = vector.extract_strided_slice %1 {offsets = [9, 0], sizes = [1, 32], strides = [1, 1]} : vector<12x32xf32> to vector<1x32xf32>
    %455 = arith.mulf %453, %453 : vector<16x32xf32>
    %cst_98 = arith.constant dense<0.000000e+00> : vector<16xf32>
    %456 = vector.multi_reduction <add>, %455, %cst_98 [1] : vector<16x32xf32> to vector<16xf32>
    %457 = vector.shape_cast %456 : vector<16xf32> to vector<16x1xf32>
    %cst_99 = arith.constant 3.200000e+01 : f32
    %458 = vector.broadcast %cst_99 : f32 to vector<16x1xf32>
    %459 = arith.divf %457, %458 : vector<16x1xf32>
    %cst_100 = arith.constant 9.99999997E-7 : f32
    %460 = vector.broadcast %cst_100 : f32 to vector<16x1xf32>
    %461 = arith.addf %459, %460 : vector<16x1xf32>
    %462 = math.rsqrt %461 : vector<16x1xf32>
    %463 = vector.broadcast %462 : vector<16x1xf32> to vector<16x32xf32>
    %464 = arith.mulf %453, %463 : vector<16x32xf32>
    %465 = vector.broadcast %454 : vector<1x32xf32> to vector<16x32xf32>
    %466 = arith.mulf %464, %465 : vector<16x32xf32>
    %467 = vector.extract_strided_slice %391 {offsets = [0, 192], sizes = [32, 32], strides = [1, 1]} : vector<32x448xf32> to vector<32x32xf32>
    %468 = vector.extract_strided_slice %391 {offsets = [0, 224], sizes = [32, 160], strides = [1, 1]} : vector<32x448xf32> to vector<32x160xf32>
    %469 = arith.truncf %466 : vector<16x32xf32> to vector<16x32xbf16>
    %470 = arith.truncf %467 : vector<32x32xf32> to vector<32x32xbf16>
    %cst_101 = arith.constant dense<0.000000e+00> : vector<16x32xf32>
    %471 = tpu.matmul %469, %470, %cst_101 {dimension_numbers = #tpu.dot_dimension_numbers<[1], [0], [0], [1], [0, 0, 1, 1], [], []>} : vector<16x32xbf16>, vector<32x32xbf16>, vector<16x32xf32> -> vector<16x32xf32>
    %472 = vector.shape_cast %471 : vector<16x32xf32> to vector<2x8x32xf32>
    %473 = arith.truncf %234 : vector<16x32xf32> to vector<16x32xbf16>
    %474 = arith.truncf %468 : vector<32x160xf32> to vector<32x160xbf16>
    %cst_102 = arith.constant dense<0.000000e+00> : vector<16x160xf32>
    %475 = tpu.matmul %473, %474, %cst_102 {dimension_numbers = #tpu.dot_dimension_numbers<[1], [0], [0], [1], [0, 0, 1, 1], [], []>} : vector<16x32xbf16>, vector<32x160xbf16>, vector<16x160xf32> -> vector<16x160xf32>
    %476 = vector.shape_cast %475 : vector<16x160xf32> to vector<2x8x160xf32>
    %477 = vector.extract_strided_slice %476 {offsets = [0, 0, 0], sizes = [2, 8, 32], strides = [1, 1, 1]} : vector<2x8x160xf32> to vector<2x8x32xf32>
    %478 = vector.extract_strided_slice %476 {offsets = [0, 0, 32], sizes = [2, 8, 128], strides = [1, 1, 1]} : vector<2x8x160xf32> to vector<2x8x128xf32>
    %479 = vector.extract_strided_slice %472 {offsets = [0, 0, 0], sizes = [2, 8, 8], strides = [1, 1, 1]} : vector<2x8x32xf32> to vector<2x8x8xf32>
    %480 = vector.extract_strided_slice %472 {offsets = [0, 0, 8], sizes = [2, 8, 8], strides = [1, 1, 1]} : vector<2x8x32xf32> to vector<2x8x8xf32>
    %481 = vector.extract_strided_slice %472 {offsets = [0, 0, 16], sizes = [2, 8, 8], strides = [1, 1, 1]} : vector<2x8x32xf32> to vector<2x8x8xf32>
    %482 = vector.extract_strided_slice %472 {offsets = [0, 0, 24], sizes = [2, 8, 8], strides = [1, 1, 1]} : vector<2x8x32xf32> to vector<2x8x8xf32>
    %483 = tpu.concatenate %479, %480, %481, %482 in 0 : vector<2x8x8xf32>, vector<2x8x8xf32>, vector<2x8x8xf32>, vector<2x8x8xf32> -> vector<8x8x8xf32>
    %484 = vector.extract_strided_slice %477 {offsets = [0, 0, 0], sizes = [2, 8, 8], strides = [1, 1, 1]} : vector<2x8x32xf32> to vector<2x8x8xf32>
    %485 = vector.extract_strided_slice %477 {offsets = [0, 0, 8], sizes = [2, 8, 8], strides = [1, 1, 1]} : vector<2x8x32xf32> to vector<2x8x8xf32>
    %486 = vector.extract_strided_slice %477 {offsets = [0, 0, 16], sizes = [2, 8, 8], strides = [1, 1, 1]} : vector<2x8x32xf32> to vector<2x8x8xf32>
    %487 = vector.extract_strided_slice %477 {offsets = [0, 0, 24], sizes = [2, 8, 8], strides = [1, 1, 1]} : vector<2x8x32xf32> to vector<2x8x8xf32>
    %488 = tpu.concatenate %484, %485, %486, %487 in 0 : vector<2x8x8xf32>, vector<2x8x8xf32>, vector<2x8x8xf32>, vector<2x8x8xf32> -> vector<8x8x8xf32>
    %489 = vector.extract_strided_slice %478 {offsets = [0, 0, 0], sizes = [2, 8, 32], strides = [1, 1, 1]} : vector<2x8x128xf32> to vector<2x8x32xf32>
    %490 = vector.extract_strided_slice %478 {offsets = [0, 0, 32], sizes = [2, 8, 32], strides = [1, 1, 1]} : vector<2x8x128xf32> to vector<2x8x32xf32>
    %491 = vector.extract_strided_slice %478 {offsets = [0, 0, 64], sizes = [2, 8, 32], strides = [1, 1, 1]} : vector<2x8x128xf32> to vector<2x8x32xf32>
    %492 = vector.extract_strided_slice %478 {offsets = [0, 0, 96], sizes = [2, 8, 32], strides = [1, 1, 1]} : vector<2x8x128xf32> to vector<2x8x32xf32>
    %493 = tpu.concatenate %489, %490, %491, %492 in 0 : vector<2x8x32xf32>, vector<2x8x32xf32>, vector<2x8x32xf32>, vector<2x8x32xf32> -> vector<8x8x32xf32>
    %494 = arith.truncf %483 : vector<8x8x8xf32> to vector<8x8x8xbf16>
    %495 = arith.truncf %488 : vector<8x8x8xf32> to vector<8x8x8xbf16>
    "tpu.trace_start"() <{level = 10 : i32, message = "gqd,gkd->gqk"}> : () -> ()
    %cst_103 = arith.constant dense<0.000000e+00> : vector<8x8x8xf32>
    %496 = tpu.matmul %494, %495, %cst_103 {dimension_numbers = #tpu.dot_dimension_numbers<[2], [2], [1], [1], [0, 0, 0, 1, 1, 1], [0], [0]>} : vector<8x8x8xbf16>, vector<8x8x8xbf16>, vector<8x8x8xf32> -> vector<8x8x8xf32>
    "tpu.trace_stop"() : () -> ()
    %497 = arith.addf %496, %43 : vector<8x8x8xf32>
    %cst_104 = arith.constant dense<0xFF800000> : vector<8x8xf32>
    %498 = vector.multi_reduction <maximumf>, %497, %cst_104 [2] : vector<8x8x8xf32> to vector<8x8xf32>
    %499 = vector.shape_cast %498 : vector<8x8xf32> to vector<8x8x1xf32>
    %500 = vector.broadcast %499 : vector<8x8x1xf32> to vector<8x8x8xf32>
    %501 = arith.subf %497, %500 : vector<8x8x8xf32>
    %502 = math.exp %501 : vector<8x8x8xf32>
    %cst_105 = arith.constant dense<0.000000e+00> : vector<8x8xf32>
    %503 = vector.multi_reduction <add>, %502, %cst_105 [2] : vector<8x8x8xf32> to vector<8x8xf32>
    %504 = vector.shape_cast %503 : vector<8x8xf32> to vector<8x8x1xf32>
    %505 = tpu.reciprocal %504 {approx = true} : vector<8x8x1xf32> -> vector<8x8x1xf32>
    %506 = vector.broadcast %505 : vector<8x8x1xf32> to vector<8x8x8xf32>
    %507 = arith.mulf %502, %506 : vector<8x8x8xf32>
    %508 = arith.truncf %507 : vector<8x8x8xf32> to vector<8x8x8xbf16>
    %509 = arith.truncf %493 : vector<8x8x32xf32> to vector<8x8x32xbf16>
    "tpu.trace_start"() <{level = 10 : i32, message = "gqk,gkd->gqd"}> : () -> ()
    %cst_106 = arith.constant dense<0.000000e+00> : vector<8x8x32xf32>
    %510 = tpu.matmul %508, %509, %cst_106 {dimension_numbers = #tpu.dot_dimension_numbers<[2], [1], [1], [2], [0, 0, 0, 1, 1, 2], [0], [0]>} : vector<8x8x8xbf16>, vector<8x8x32xbf16>, vector<8x8x32xf32> -> vector<8x8x32xf32>
    "tpu.trace_stop"() : () -> ()
    %511 = vector.extract_strided_slice %510 {offsets = [0, 0, 0], sizes = [2, 8, 32], strides = [1, 1, 1]} : vector<8x8x32xf32> to vector<2x8x32xf32>
    %512 = vector.extract_strided_slice %510 {offsets = [2, 0, 0], sizes = [2, 8, 32], strides = [1, 1, 1]} : vector<8x8x32xf32> to vector<2x8x32xf32>
    %513 = arith.addf %511, %512 : vector<2x8x32xf32>
    %514 = vector.extract_strided_slice %510 {offsets = [4, 0, 0], sizes = [2, 8, 32], strides = [1, 1, 1]} : vector<8x8x32xf32> to vector<2x8x32xf32>
    %515 = arith.addf %513, %514 : vector<2x8x32xf32>
    %516 = vector.extract_strided_slice %510 {offsets = [6, 0, 0], sizes = [2, 8, 32], strides = [1, 1, 1]} : vector<8x8x32xf32> to vector<2x8x32xf32>
    %517 = arith.addf %515, %516 : vector<2x8x32xf32>
    %518 = vector.shape_cast %517 : vector<2x8x32xf32> to vector<16x32xf32>
    %519 = arith.addf %453, %518 : vector<16x32xf32>
    %520 = vector.extract_strided_slice %1 {offsets = [10, 0], sizes = [1, 32], strides = [1, 1]} : vector<12x32xf32> to vector<1x32xf32>
    %521 = arith.mulf %519, %519 : vector<16x32xf32>
    %cst_107 = arith.constant dense<0.000000e+00> : vector<16xf32>
    %522 = vector.multi_reduction <add>, %521, %cst_107 [1] : vector<16x32xf32> to vector<16xf32>
    %523 = vector.shape_cast %522 : vector<16xf32> to vector<16x1xf32>
    %cst_108 = arith.constant 3.200000e+01 : f32
    %524 = vector.broadcast %cst_108 : f32 to vector<16x1xf32>
    %525 = arith.divf %523, %524 : vector<16x1xf32>
    %cst_109 = arith.constant 9.99999997E-7 : f32
    %526 = vector.broadcast %cst_109 : f32 to vector<16x1xf32>
    %527 = arith.addf %525, %526 : vector<16x1xf32>
    %528 = math.rsqrt %527 : vector<16x1xf32>
    %529 = vector.broadcast %528 : vector<16x1xf32> to vector<16x32xf32>
    %530 = arith.mulf %519, %529 : vector<16x32xf32>
    %531 = vector.broadcast %520 : vector<1x32xf32> to vector<16x32xf32>
    %532 = arith.mulf %530, %531 : vector<16x32xf32>
    %533 = vector.extract_strided_slice %391 {offsets = [0, 384], sizes = [32, 64], strides = [1, 1]} : vector<32x448xf32> to vector<32x64xf32>
    %c3 = arith.constant 3 : index
    %c0_110 = arith.constant 0 : index
    %c0_111 = arith.constant 0 : index
    %534 = vector.load %arg7[%c3, %c0_110, %c0_111] : memref<4x64x32xf32, #tpu.memory_space<vmem>>, vector<1x64x32xf32>
    %535 = vector.shape_cast %534 : vector<1x64x32xf32> to vector<64x32xf32>
    %536 = arith.truncf %532 : vector<16x32xf32> to vector<16x32xbf16>
    %537 = arith.truncf %533 : vector<32x64xf32> to vector<32x64xbf16>
    %cst_112 = arith.constant dense<0.000000e+00> : vector<16x64xf32>
    %538 = tpu.matmul %536, %537, %cst_112 {dimension_numbers = #tpu.dot_dimension_numbers<[1], [0], [0], [1], [0, 0, 1, 1], [], []>} : vector<16x32xbf16>, vector<32x64xbf16>, vector<16x64xf32> -> vector<16x64xf32>
    %cst_113 = arith.constant 0.000000e+00 : f32
    %539 = vector.broadcast %cst_113 : f32 to vector<16x64xf32>
    %540 = arith.maximumf %538, %539 : vector<16x64xf32>
    %541 = arith.truncf %540 : vector<16x64xf32> to vector<16x64xbf16>
    %542 = arith.truncf %535 : vector<64x32xf32> to vector<64x32xbf16>
    %cst_114 = arith.constant dense<0.000000e+00> : vector<16x32xf32>
    %543 = tpu.matmul %541, %542, %cst_114 {dimension_numbers = #tpu.dot_dimension_numbers<[1], [0], [0], [1], [0, 0, 1, 1], [], []>} : vector<16x64xbf16>, vector<64x32xbf16>, vector<16x32xf32> -> vector<16x32xf32>
    %544 = arith.addf %519, %543 : vector<16x32xf32>
    %545 = vector.extract_strided_slice %1 {offsets = [11, 0], sizes = [1, 32], strides = [1, 1]} : vector<12x32xf32> to vector<1x32xf32>
    %546 = arith.mulf %544, %544 : vector<16x32xf32>
    %cst_115 = arith.constant dense<0.000000e+00> : vector<16xf32>
    %547 = vector.multi_reduction <add>, %546, %cst_115 [1] : vector<16x32xf32> to vector<16xf32>
    %548 = vector.shape_cast %547 : vector<16xf32> to vector<16x1xf32>
    %cst_116 = arith.constant 3.200000e+01 : f32
    %549 = vector.broadcast %cst_116 : f32 to vector<16x1xf32>
    %550 = arith.divf %548, %549 : vector<16x1xf32>
    %cst_117 = arith.constant 9.99999997E-7 : f32
    %551 = vector.broadcast %cst_117 : f32 to vector<16x1xf32>
    %552 = arith.addf %550, %551 : vector<16x1xf32>
    %553 = math.rsqrt %552 : vector<16x1xf32>
    %554 = vector.broadcast %553 : vector<16x1xf32> to vector<16x32xf32>
    %555 = arith.mulf %544, %554 : vector<16x32xf32>
    %556 = vector.broadcast %545 : vector<1x32xf32> to vector<16x32xf32>
    %557 = arith.mulf %555, %556 : vector<16x32xf32>
    %cst_118 = arith.constant 0.176776692 : f32
    %558 = vector.broadcast %cst_118 : f32 to vector<16x32xf32>
    %559 = arith.mulf %557, %558 : vector<16x32xf32>
    %560 = arith.truncf %559 : vector<16x32xf32> to vector<16x32xbf16>
    "tpu.trace_start"() <{level = 10 : i32, message = "nd,vd->nv"}> : () -> ()
    %cst_119 = arith.constant dense<0.000000e+00> : vector<16x32xf32>
    %561 = tpu.matmul %560, %0, %cst_119 {dimension_numbers = #tpu.dot_dimension_numbers<[1], [1], [0], [0], [0, 0, 1, 0], [], []>} : vector<16x32xbf16>, vector<32x32xbf16>, vector<16x32xf32> -> vector<16x32xf32>
    "tpu.trace_stop"() : () -> ()
    %c0_120 = arith.constant 0 : index
    %c0_121 = arith.constant 0 : index
    %562 = vector.load %arg9[%c0_120, %c0_121] : memref<16x32xf32, #tpu.memory_space<vmem>>, vector<16x32xf32>
    tpu.vector_store %arg9[%c0_120, %c0_121], %561 {strides = array<i32>} : memref<16x32xf32, #tpu.memory_space<vmem>>, vector<16x32xf32>,
    %563 = vector.extract_strided_slice %2 {offsets = [0, 1], sizes = [16, 1], strides = [1, 1]} : vector<32x2xi32> to vector<16x1xi32>
    %cst_122 = arith.constant dense<0xFF800000> : vector<16xf32>
    %564 = vector.multi_reduction <maximumf>, %561, %cst_122 [1] : vector<16x32xf32> to vector<16xf32>
    %565 = vector.shape_cast %564 : vector<16xf32> to vector<16x1xf32>
    %566 = vector.broadcast %565 : vector<16x1xf32> to vector<16x32xf32>
    %567 = arith.subf %561, %566 : vector<16x32xf32>
    %568 = math.exp %567 : vector<16x32xf32>
    %cst_123 = arith.constant dense<0.000000e+00> : vector<16xf32>
    %569 = vector.multi_reduction <add>, %568, %cst_123 [1] : vector<16x32xf32> to vector<16xf32>
    %570 = vector.shape_cast %569 : vector<16xf32> to vector<16x1xf32>
    %571 = math.log %570 : vector<16x1xf32>
    %572 = arith.addf %571, %565 : vector<16x1xf32>
    %c0_i32 = arith.constant 0 : i32
    %573 = vector.broadcast %c0_i32 : i32 to vector<16x1xi32>
    %574 = arith.cmpi slt, %563, %573 : vector<16x1xi32>
    %c0_i32_124 = arith.constant 0 : i32
    %575 = vector.broadcast %c0_i32_124 : i32 to vector<16x1xi32>
    %576 = arith.select %574, %575, %563 : vector<16x1xi1>, vector<16x1xi32>
    %577 = tpu.iota {dimensions = array<i32: 1>} : vector<16x32xi32>
    %578 = vector.broadcast %576 : vector<16x1xi32> to vector<16x32xi32>
    %579 = arith.cmpi eq, %577, %578 : vector<16x32xi32>
    %580 = arith.extui %579 : vector<16x32xi1> to vector<16x32xi32>
    %581 = arith.sitofp %580 : vector<16x32xi32> to vector<16x32xf32>
    %582 = arith.mulf %581, %561 : vector<16x32xf32>
    %cst_125 = arith.constant dense<0.000000e+00> : vector<16xf32>
    %583 = vector.multi_reduction <add>, %582, %cst_125 [1] : vector<16x32xf32> to vector<16xf32>
    %584 = vector.shape_cast %583 : vector<16xf32> to vector<16x1xf32>
    %585 = arith.subf %572, %584 : vector<16x1xf32>
    %c-100_i32 = arith.constant -100 : i32
    %586 = vector.broadcast %c-100_i32 : i32 to vector<16x1xi32>
    %587 = arith.cmpi ne, %563, %586 : vector<16x1xi32>
    %588 = arith.extui %587 : vector<16x1xi1> to vector<16x1xi32>
    %589 = arith.sitofp %588 : vector<16x1xi32> to vector<16x1xf32>
    %590 = arith.mulf %585, %589 : vector<16x1xf32>
    %cst_126 = arith.constant dense<0.000000e+00> : vector<1xf32>
    %591 = vector.multi_reduction <add>, %590, %cst_126 [0] : vector<16x1xf32> to vector<1xf32>
    %592 = vector.shape_cast %591 : vector<1xf32> to vector<1x1xf32>
    %cst_127 = arith.constant dense<0.000000e+00> : vector<1xf32>
    %593 = vector.multi_reduction <add>, %589, %cst_127 [0] : vector<16x1xf32> to vector<1xf32>
    %594 = vector.shape_cast %593 : vector<1xf32> to vector<1x1xf32>
    %cst_128 = arith.constant 1.000000e+00 : f32
    %595 = vector.broadcast %cst_128 : f32 to vector<1x1xf32>
    %596 = arith.maximumf %594, %595 : vector<1x1xf32>
    %597 = arith.divf %592, %596 : vector<1x1xf32>
    %c0_129 = arith.constant 0 : index
    %c0_130 = arith.constant 0 : index
    %598 = vector.load %arg10[%c0_129, %c0_130] : memref<1x1xf32, #tpu.memory_space<vmem>>, vector<1x1xf32>
    tpu.vector_store %arg10[%c0_129, %c0_130], %597 {strides = array<i32>} : memref<1x1xf32, #tpu.memory_space<vmem>>, vector<1x1xf32>,
    return
  }
}

</mosaic_0001>

<bundles_post_ra>
// kernel: t5_forward.1
= control target key start
LH: loop header
LB: loop body
LE: loop exit
PB: predicated region body
PF: predicated region fallthrough
CT: control target
= control target key end

     0   :  { %16 = vsyncpa [#allocation3], 0  ;;  %v8864_v2 = vmov 0   ;;  %s10848_s0 = inlined_call_operand.vmem [shape: s32[32,2], index: 0, kind: input, shape index: {}]   ;;  %s10849_s1 = inlined_call_operand.vmem [shape: s32[2,8], index: 1, kind: input, shape index: {}]   ;;  %s10850_s2 = inlined_call_operand.vmem [shape: f32[4,8,8], index: 2, kind: input, shape index: {}]   ;;  %s10851_s3 = inlined_call_operand.vmem [shape: f32[4,8,8], index: 3, kind: input, shape index: {}]   ;;  %s10852_s4 = inlined_call_operand.vmem [shape: bf16[32,32], index: 4, kind: input, shape index: {}]   ;;  %s10853_s5 = inlined_call_operand.vmem [shape: f32[2,32,256], index: 5, kind: input, shape index: {}]   ;;  %s10854_s6 = inlined_call_operand.vmem [shape: f32[2,32,448], index: 6, kind: input, shape index: {}]   ;;  %s10855_s7 = inlined_call_operand.vmem [shape: f32[4,64,32], index: 7, kind: input, shape index: {}]   ;;  %s10856_s8 = inlined_call_operand.vmem [shape: f32[12,32], index: 8, kind: input, shape index: {}]   ;;  %s10857_s9 = inlined_call_operand.hbm [shape: f32[16,32], index: 9, kind: output, shape index: {0}]   ;;  %s10858_s10 = inlined_call_operand.hbm [shape: f32[1,1], index: 10, kind: output, shape index: {1}]  }
   0x1   :  { %v45_v0 = vld [vmem:[%s10848_s0 + $0x10] sm:$0xff]  ;;  %v43_v1 = vld [vmem:[%s10848_s0] sm:$0xff]  ;;  %8344 = vset.pattern.permute.xlu1 %v8864_v2  ;;  %8343 = vset.pattern.permute.xlu0 %v8864_v2  ;;  %v46_v3 = vld [vmem:[%s10848_s0 + $0x18] sm:$0xff] }
   0x2   :  { %56 = vperm.xlu1 %8344, %v45_v0   ;;  %50 = vperm.xlu0 %8343, %v43_v1   ;;  %v8557_v4 = vld [vmem:[%s10852_s4] sm:$0xff]   ;;  %v44_v5 = vld [vmem:[%s10848_s0 + $0x8] sm:$0xff] }
   0x3   :  { %275 = vmatprep.mubr.bf16.mxu1 %v8864_v2 }
   0x4   :  { %17 = vsyncpa [#allocation5], 0  ;;  %7639 = vmatprep.subr.bf16.mxu0 %v8557_v4  ;;  %v8558_v6 = vld [vmem:[%s10852_s4 + $0x8] sm:$0xff]   ;;  %v8865_v7 = vmov 0.0   ;;  %v47_v8 = vlaneseq  ;;  %vm87_vm4 = vcmask 261120   ;;  %v207_v29 = vld [vmem:[%s10853_s5 + $0x18] sm:$0xff] }
   0x5   :  { %7640 = vmatpush3.bf16.msra.mxu0 %v8557_v4  ;;  %v205_v28 = vld [vmem:[%s10853_s5 + $0x8] sm:$0xff]  ;;  %v204_v30 = vld [vmem:[%s10853_s5] sm:$0xff]  ;;  %v206_v32 = vld [vmem:[%s10853_s5 + $0x10] sm:$0xff]  ;;  %vm8866_vm5 = vmmov 0   ;;  %s8867_s23 = smov 112   ;;  %s8868_s24 = smov 120  }
   0x6   :  { %59 = vperm.xlu1 %8344, %v46_v3   ;;  %53 = vperm.xlu0 %8343, %v44_v5   ;;  %v8957_v9 = vand.u32 127, %v47_v8  ;;  %v8992_v31 = vpack.c.bf16 %v207_v29, %v205_v28  ;;  %v209_v33 = vld [vmem:[%s10853_s5 + $0x28] sm:$0xff]  ;;  %v211_v34 = vld [vmem:[%s10853_s5 + $0x38] sm:$0xff]  ;;  %v236_v35 = vpack.c.bf16 %v206_v32, %v204_v30  ;;  %v208_v37 = vld [vmem:[%s10853_s5 + $0x20] sm:$0xff]  ;;  %v9014_v46 = vshrl.u32 %v47_v8, 7  ;;  %s8869_s25 = smov 96  }
   0x7   :  { %7641 = vmatprep.subr.bf16.mxu0 %v8558_v6  ;;  %v9003_v36 = vpack.c.bf16 %v211_v34, %v209_v33  ;;  %v210_v38 = vld [vmem:[%s10853_s5 + $0x30] sm:$0xff]  ;;  %v9022_v48 = vld [vmem:[%s10856_s8] sm:$0xff]  ;;  %s8870_s26 = smov 104   ;;  %vm337_vm6 = vcmask 64512   ;;  %s8871_s27 = smov 64   ;;  %vm834_vm7 = vcmask 1043456  }
   0x8   :  { %243 = vmatprep.subr.bf16.mxu1 %v8992_v31  ;;  %v238_v39 = vpack.c.bf16 %v210_v38, %v208_v37  ;;  %v9017_v47 = vsub.s32 0, %v9014_v46  ;;  %s8872_s28 = smov 32   ;;  %vm1318_vm8 = vcmask 523264   ;;  %vm194_vm9 = vcmp.gt.s32.totalorder %v8957_v9, %v9014_v46 }
   0x9   :  { %7642 = vmatpush3.bf16.msra.mxu0 %v8558_v6  ;;  %244 = vmatpush1.bf16.msra.mxu1 %v236_v35 }
   0xa   :  { %7647 = vmatprep.subr.bf16.mxu0 %v8865_v7  ;;  %245 = vmatprep.subr.bf16.mxu1 %v9003_v36  ;;  %v232_v51 = vrot.slane %v9022_v48, %v9017_v47 }
   0xd   :  { %246 = vmatpush1.bf16.msra.mxu1 %v238_v39 }
   0xe   :  { %7653 = vmatprep.subr.bf16.mxu1 %v8865_v7 }
  0x81   :  { %v57_v10 = vpop.permute.xlu1 %56  ;;  %v51_v11 = vpop.permute.xlu0 %50 }
  0x82   :  { %vm63_vm0 = vcmp.eq.s32.totalorder %v8957_v9, %v57_v10  ;;  %vm61_vm1 = vcmp.eq.s32.totalorder %v8957_v9, %v51_v11 }
  0x83   :  { %v7231_v14 = vsel %vm63_vm0, 1.0, %v8865_v7  ;;  %v7229_v16 = vsel %vm61_vm1, 1.0, %v8865_v7  ;;  %vm7171_vm0 = vcmask 15368  }
  0x85   :  { %v60_v12 = vpop.permute.xlu1 %59  ;;  %v54_v13 = vpop.permute.xlu0 %53 }
  0x86   :  { %vm64_vm2 = vcmp.eq.s32.totalorder %v8957_v9, %v60_v12  ;;  %vm62_vm3 = vcmp.eq.s32.totalorder %v8957_v9, %v54_v13 }
  0x87   :  { %v7232_v15 = vsel %vm64_vm2, 1.0, %v8865_v7  ;;  %v7230_v17 = vsel %vm62_vm3, 1.0, %v8865_v7 }
  0x88   :  { %v74_v18 = vpack.c.bf16 %v7232_v15, %v7231_v14  ;;  %v73_v19 = vpack.c.bf16 %v7230_v17, %v7229_v16 }
  0x8a   :  { %7643 = vmatprep.mubr.msk.bf16.mxu0 %vm87_vm4, %v73_v19 }
  0x8b   :  { %7644 = vmatmul.mubr.msk.bf16.vlgmr.msra.gmra.mrb[0].mxu0 %vm87_vm4, %v74_v18 }
  0x8c   :  { %7649 = vmatprep.mubr.msk.bf16.mxu0 %vm8866_vm5, %v8865_v7 }
 0x15e   :  { %v8969_v20 = vpop.f32.mrb[0].mxu0 }
 0x15f   :  { %v8971_v21 = vpop.f32.mrb[1].mxu0 }
 0x160   :  { %v8973_v22 = vpop.f32.mrb[2].mxu0  ;;  %v212_v23 = vmul.f32 %v8971_v21, %v8971_v21 }
 0x161   :  { %v8977_v24 = vpop.f32.mrb[3].mxu0 }
 0x162   :  { %v214_v25 = vsel %vm87_vm4, %v212_v23, 0.0  ;;  %v213_v26 = vmul.f32 %v8977_v24, %v8977_v24 }
 0x163   :  { %215 = vadd.xlane.f32.xlu0 %v214_v25 }
 0x164   :  { %v217_v27 = vsel %vm87_vm4, %v213_v26, 0.0 }
 0x165   :  { %218 = vadd.xlane.f32.xlu1 %v217_v27 }
 0x1f0   :  { %v216_v40 = vpop.xlane.xlu0 %215 }
 0x1f1   :  { %v221_v41 = vmul.f32 0.03125, %v216_v40 }
 0x1f2   :  { %v219_v42 = vpop.xlane.xlu1 %218 }
 0x1f3   :  { %v223_v43 = vadd.f32 1e-06, %v221_v41  ;;  %v222_v44 = vmul.f32 0.03125, %v219_v42 }
 0x1f5   :  { %8559 = vrsqrt.f32 %v223_v43  ;;  %v224_v45 = vadd.f32 1e-06, %v222_v44 }
 0x1f7   :  { %8561 = vrsqrt.f32 %v224_v45  ;;  %v143_v45 = vld [vmem:[%s10849_s1] sm:$0x3] }
 0x1ff   :  { %v8560_v49 = vpop.eup %8559 }
 0x200   :  { %v227_v50 = vmul.f32 %v8560_v49, %v8971_v21  ;;  %v144_v49 = vcvt.s32.f32 %v143_v45 }
 0x201   :  { %v8562_v52 = vpop.eup %8561 }
 0x202   :  { %v228_v53 = vmul.f32 %v8562_v52, %v8977_v24  ;;  %v233_v54 = vmul.f32 %v232_v51, %v227_v50  ;;  %v8873_v50 = vmov 1966171168   ;;  %v145_v52 = vsub.f32 1.0, %v144_v49 }
 0x204   :  { %v234_v55 = vmul.f32 %v232_v51, %v228_v53  ;;  %v153_v51 = vunpack.c.l.s4 %v8873_v50 }
 0x206   :  { %v235_v56 = vpack.c.bf16 %v234_v55, %v233_v54  ;;  %v154_v53 = vunpack.c.0.s8 %v153_v51  ;;  %v146_v54 = vmul.f32 -1e+09, %v145_v52 }
 0x208   :  { %7237 = vmatmul.mubr.msk.bf16.vlgmr.msra.gmra.mrb[0].mxu1 %vm87_vm4, %v235_v56  ;;  %v157_v55 = vsub.s32 %v154_v53, %v9014_v46 }
 0x209   :  { %7655 = vmatprep.mubr.msk.bf16.mxu1 %vm8866_vm5, %v8865_v7 }
 0x20a   :  { %v158_v56 = vrot.slane %v146_v54, %v157_v55  ;;  %v150_v54 = vld [vmem:[%s10850_s2 + $0x18] sm:$0xff] }
 0x2db   :  { %v277_v57 = vpop.f32.mrb[0].mxu1 }
 0x2dc   :  { %v279_v58 = vpop.f32.mrb[1].mxu1  ;;  %v326_v63 = vpack.c.bf16 %v277_v57, %v277_v57 }
 0x2dd   :  { %v281_v59 = vpop.f32.mrb[2].mxu1 }
 0x2de   :  { %v283_v60 = vpop.f32.mrb[3].mxu1  ;;  %v8350_v61 = vpack.i.bf16 %v281_v59, %v277_v57  ;;  %v9037_v0 = vpack.c.bf16 %v281_v59, %v281_v59  ;;  %v159_v57 = vcombine.high %v158_v56, %v158_v56 }
 0x2df   :  { %v8370_v62 = vpack.i.bf16 %v283_v60, %v279_v58  ;;  %v166_v58 = vrot.slane %v158_v56, %v157_v55 }
 0x2e0   :  { %8351 = vrot.lane.b32.xlu1 %v8350_v61, %s8867_s23  ;;  %8346 = vrot.lane.b32.xlu0 %v8350_v61, %s8868_s24  ;;  %v173_v59 = vrot.slane %v159_v57, %v157_v55 }
 0x2e1   :  { %v9103_v60 = vrot.slane %v166_v58, %v9017_v47 }
 0x2e4   :  { %335 = vrot.lane.b32.xlu1 %v326_v63, %s8869_s25  ;;  %8356 = vrot.lane.b32.xlu0 %v8350_v61, %s8870_s26 }
 0x2e8   :  { %385 = vrot.lane.b32.xlu0 %v9037_v0, %s8869_s25 }
 0x352   :  { %v8352_v1 = vpop.permute.xlu1 %8351  ;;  %v8347_v3 = vpop.permute.xlu0 %8346 }
 0x353   :  { %v8349_v4 = vunpack.i.h.bf16 %v8347_v3  ;;  %v8348_v5 = vunpack.i.l.bf16 %v8347_v3  ;;  %v8354_v6 = vunpack.i.h.bf16 %v8352_v1  ;;  %v8353_v8 = vunpack.i.l.bf16 %v8352_v1 }
 0x355   :  { %v328_v10 = vpack.c.bf16 %v8348_v5, %v8348_v5  ;;  %v329_v11 = vpack.c.bf16 %v8349_v4, %v8349_v4  ;;  %v330_v16 = vpack.c.bf16 %v8353_v8, %v8353_v8  ;;  %v331_v17 = vpack.c.bf16 %v8354_v6, %v8354_v6 }
 0x356   :  { %v336_v12 = vpop.permute.xlu1 %335  ;;  %v8357_v13 = vpop.permute.xlu0 %8356 }
 0x357   :  { %v342_v14 = vsel %vm337_vm6, %v336_v12, 0  ;;  %434 = vrot.lane.b32.xlu1 %v328_v10, %s8869_s25  ;;  %483 = vrot.lane.b32.xlu0 %v329_v11, %s8869_s25  ;;  %v8358_v15 = vunpack.i.l.bf16 %v8357_v13  ;;  %v8359_v18 = vunpack.i.h.bf16 %v8357_v13 }
 0x358   :  { %7648 = vmatpush3.bf16.xpose.msra.mxu0 %v342_v14 }
 0x359   :  { %7659 = vmatprep.subr.bf16.mxu0 %v8865_v7  ;;  %v332_v25 = vpack.c.bf16 %v8358_v15, %v8358_v15  ;;  %v333_v26 = vpack.c.bf16 %v8359_v18, %v8359_v18 }
 0x35a   :  { %v386_v19 = vpop.permute.xlu0 %385 }
 0x35b   :  { %v391_v23 = vsel %vm337_vm6, %v386_v19, 0  ;;  %532 = vrot.lane.b32.xlu1 %v330_v16, %s8869_s25  ;;  %581 = vrot.lane.b32.xlu0 %v331_v17, %s8869_s25 }
 0x35c   :  { %7654 = vmatpush3.bf16.xpose.msra.mxu1 %v391_v23 }
 0x35d   :  { %7665 = vmatprep.subr.bf16.mxu1 %v8865_v7 }
 0x35f   :  { %7650 = vmatmul.mubr.msk.bf16.vlgmr.msra.gmra.mrb[4].mxu0 %vm337_vm6, %v326_v63  ;;  %630 = vrot.lane.b32.xlu1 %v332_v25, %s8869_s25 }
 0x360   :  { %679 = vrot.lane.b32.xlu0 %v333_v26, %s8869_s25  ;;  %7661 = vmatprep.mubr.msk.bf16.mxu0 %vm8866_vm5, %v8865_v7 }
 0x363   :  { %7656 = vmatmul.mubr.msk.bf16.vlgmr.msra.gmra.mrb[4].mxu1 %vm337_vm6, %v9037_v0  ;;  %8366 = vrot.lane.b32.xlu1 %v8370_v62, %s8871_s27 }
 0x364   :  { %8361 = vrot.lane.b32.xlu0 %v8350_v61, %s8869_s25  ;;  %7667 = vmatprep.mubr.msk.bf16.mxu1 %vm8866_vm5, %v8865_v7  ;;  %v147_v61 = vld [vmem:[%s10850_s2] sm:$0xff] }
 0x367   :  { %8371 = vrot.lane.b32.xlu1 %v8370_v62, %s8872_s28  ;;  %v9109_v62 = vrot.slane %v173_v59, %v9017_v47  ;;  %v9169_v59 = vadd.f32 %v9103_v60, %v150_v54 }
 0x369   :  { %v9118_v5 = vadd.f32 %v9109_v62, %v147_v61 }
 0x36b   :  { %829 = vrot.lane.b32.xlu1 %v326_v63, %s8871_s27  ;;  %v9112_v63 = vadd.f32 %v9103_v60, %v147_v61 }
 0x3c9   :  { %v435_v27 = vpop.permute.xlu1 %434  ;;  %v484_v28 = vpop.permute.xlu0 %483 }
 0x3ca   :  { %v440_v29 = vsel %vm337_vm6, %v435_v27, 0  ;;  %v489_v30 = vsel %vm337_vm6, %v484_v28, 0 }
 0x3cb   :  { %7660 = vmatpush3.bf16.xpose.msra.mxu0 %v440_v29  ;;  %7666 = vmatpush3.bf16.xpose.msra.mxu1 %v489_v30 }
 0x3cc   :  { %7671 = vmatprep.subr.bf16.mxu0 %v8865_v7  ;;  %7677 = vmatprep.subr.bf16.mxu1 %v8865_v7 }
 0x3cd   :  { %v533_v32 = vpop.permute.xlu1 %532  ;;  %v582_v33 = vpop.permute.xlu0 %581 }
 0x3ce   :  { %v538_v35 = vsel %vm337_vm6, %v533_v32, 0  ;;  %v587_v37 = vsel %vm337_vm6, %v582_v33, 0  ;;  %v149_v33 = vld [vmem:[%s10850_s2 + $0x10] sm:$0xff] }
 0x3d1   :  { %v631_v34 = vpop.permute.xlu1 %630 }
 0x3d2   :  { %7662 = vmatmul.mubr.msk.bf16.vlgmr.msra.gmra.mrb[8].mxu0 %vm337_vm6, %v328_v10  ;;  %7668 = vmatmul.mubr.msk.bf16.vlgmr.msra.gmra.mrb[8].mxu1 %vm337_vm6, %v329_v11  ;;  %v680_v39 = vpop.permute.xlu0 %679  ;;  %v636_v41 = vsel %vm337_vm6, %v631_v34, 0 }
 0x3d3   :  { %7672 = vmatpush3.bf16.xpose.msra.mxu0 %v538_v35  ;;  %7678 = vmatpush3.bf16.xpose.msra.mxu1 %v587_v37  ;;  %v685_v42 = vsel %vm337_vm6, %v680_v39, 0 }
 0x3d4   :  { %7673 = vmatprep.mubr.msk.bf16.mxu0 %vm8866_vm5, %v8865_v7  ;;  %7679 = vmatprep.mubr.msk.bf16.mxu1 %vm8866_vm5, %v8865_v7 }
 0x3d5   :  { %v9074_v38 = vpop.permute.xlu1 %8366  ;;  %7683 = vmatprep.subr.bf16.mxu0 %v8865_v7  ;;  %7689 = vmatprep.subr.bf16.mxu1 %v8865_v7 }
 0x3d9   :  { %v9078_v40 = vpop.permute.xlu1 %8371 }
 0x3da   :  { %7674 = vmatmul.mubr.msk.bf16.vlgmr.msra.gmra.mrb[12].mxu0 %vm337_vm6, %v330_v16  ;;  %7680 = vmatmul.mubr.msk.bf16.vlgmr.msra.gmra.mrb[12].mxu1 %vm337_vm6, %v331_v17  ;;  %v148_v17 = vld [vmem:[%s10850_s2 + $0x8] sm:$0xff] }
 0x3db   :  { %7684 = vmatpush3.bf16.xpose.msra.mxu0 %v636_v41  ;;  %7690 = vmatpush3.bf16.xpose.msra.mxu1 %v685_v42  ;;  %v9131_v18 = vadd.f32 %v9103_v60, %v148_v17  ;;  %v9134_v19 = vadd.f32 %v9109_v62, %v148_v17  ;;  %v9150_v41 = vadd.f32 %v9103_v60, %v149_v33 }
 0x3dc   :  { %7685 = vmatprep.mubr.msk.bf16.mxu0 %vm8866_vm5, %v8865_v7  ;;  %7691 = vmatprep.mubr.msk.bf16.mxu1 %vm8866_vm5, %v8865_v7  ;;  %v9153_v42 = vadd.f32 %v9109_v62, %v149_v33 }
 0x3dd   :  { %7695 = vmatprep.subr.bf16.mxu0 %v8865_v7  ;;  %7701 = vmatprep.subr.bf16.mxu1 %v8865_v7  ;;  %v830_v43 = vpop.permute.xlu1 %829 }
 0x3de   :  { %v836_v44 = vsel %vm834_vm7, %v830_v43, 0 }
 0x3e2   :  { %7686 = vmatmul.mubr.msk.bf16.vlgmr.msra.gmra.mrb[16].mxu0 %vm337_vm6, %v332_v25  ;;  %7692 = vmatmul.mubr.msk.bf16.vlgmr.msra.gmra.mrb[16].mxu1 %vm337_vm6, %v333_v26 }
 0x3e3   :  { %7696 = vmatpush3.bf16.msra.mxu0 %v836_v44  ;;  %7697 = vmatprep.mubr.msk.bf16.mxu0 %vm8866_vm5, %v8865_v7 }
 0x3e4   :  { %7707 = vmatprep.subr.bf16.mxu0 %v8865_v7  ;;  %7703 = vmatprep.mubr.msk.bf16.mxu1 %vm8866_vm5, %v8865_v7 }
 0x432   :  { %v378_v1 = vpop.f32.mrb[4].mxu0 }
 0x433   :  { %v9115_v3 = vadd.f32 %v378_v1, %v9112_v63  ;;  %v7651_v4 = vpop.f32.mrb[5].mxu0 }
 0x434   :  { %v381_v6 = vpop.f32.mrb[6].mxu0 }
 0x435   :  { %v7652_v8 = vpop.f32.mrb[7].mxu0  ;;  %v727_v10 = vsel %vm337_vm6, %v9115_v3, -inf }
 0x436   :  { %728 = vmax.xlane.f32.xlu1 %v727_v10  ;;  %v427_v11 = vpop.f32.mrb[4].mxu1 }
 0x437   :  { %v9123_v12 = vadd.f32 %v427_v11, %v9118_v5  ;;  %v7657_v13 = vpop.f32.mrb[5].mxu1 }
 0x438   :  { %v430_v14 = vpop.f32.mrb[6].mxu1 }
 0x439   :  { %v7658_v15 = vpop.f32.mrb[7].mxu1  ;;  %v730_v16 = vsel %vm337_vm6, %v9123_v12, -inf }
 0x43a   :  { %731 = vmax.xlane.f32.xlu0 %v730_v16  ;;  %v8362_v16 = vpop.permute.xlu0 %8361 }
 0x43b   :  { %v8363_v17 = vunpack.i.l.bf16 %v8362_v16 }
 0x4a5   :  { %v476_v23 = vpop.f32.mrb[8].mxu0  ;;  %v525_v25 = vpop.f32.mrb[8].mxu1 }
 0x4a6   :  { %v9137_v26 = vadd.f32 %v476_v23, %v9131_v18  ;;  %v9140_v27 = vadd.f32 %v525_v25, %v9134_v19  ;;  %v7663_v28 = vpop.f32.mrb[9].mxu0  ;;  %v7669_v29 = vpop.f32.mrb[9].mxu1  ;;  %v823_v23 = vpack.c.bf16 %v8363_v17, %v8363_v17 }
 0x4a7   :  { %v479_v30 = vpop.f32.mrb[10].mxu0  ;;  %v528_v32 = vpop.f32.mrb[10].mxu1 }
 0x4a8   :  { %v7664_v34 = vpop.f32.mrb[11].mxu0  ;;  %v7670_v35 = vpop.f32.mrb[11].mxu1  ;;  %v733_v37 = vsel %vm337_vm6, %v9137_v26, -inf  ;;  %v736_v39 = vsel %vm337_vm6, %v9140_v27, -inf  ;;  %v9178_v30 = vadd.f32 %v9109_v62, %v150_v54 }
 0x4a9   :  { %734 = vmax.xlane.f32.xlu0 %v733_v37  ;;  %737 = vmax.xlane.f32.xlu1 %v736_v39  ;;  %v8364_v35 = vunpack.i.h.bf16 %v8362_v16 }
 0x4ad   :  { %v574_v43 = vpop.f32.mrb[12].mxu0  ;;  %v623_v44 = vpop.f32.mrb[12].mxu1 }
 0x4ae   :  { %v9156_v45 = vadd.f32 %v574_v43, %v9150_v41  ;;  %v9159_v49 = vadd.f32 %v623_v44, %v9153_v42  ;;  %v7675_v50 = vpop.f32.mrb[13].mxu0  ;;  %v7681_v51 = vpop.f32.mrb[13].mxu1 }
 0x4af   :  { %v577_v52 = vpop.f32.mrb[14].mxu0  ;;  %v626_v53 = vpop.f32.mrb[14].mxu1  ;;  %v8369_v51 = vunpack.i.h.bf16 %v9074_v38 }
 0x4b0   :  { %v7676_v55 = vpop.f32.mrb[15].mxu0  ;;  %v7682_v56 = vpop.f32.mrb[15].mxu1  ;;  %v739_v57 = vsel %vm337_vm6, %v9156_v45, -inf  ;;  %v742_v58 = vsel %vm337_vm6, %v9159_v49, -inf }
 0x4b1   :  { %740 = vmax.xlane.f32.xlu0 %v739_v57  ;;  %743 = vmax.xlane.f32.xlu1 %v742_v58  ;;  %v826_v52 = vpack.c.bf16 %v8369_v51, %v8369_v51 }
 0x4b5   :  { %v672_v61 = vpop.f32.mrb[16].mxu0  ;;  %v721_v1 = vpop.f32.mrb[16].mxu1 }
 0x4b6   :  { %v673_v4 = vadd.f32 %v672_v61, %v9169_v59  ;;  %v7687_v6 = vpop.f32.mrb[17].mxu0  ;;  %v7693_v8 = vpop.f32.mrb[17].mxu1  ;;  %v9181_v32 = vadd.f32 %v721_v1, %v9178_v30 }
 0x4b7   :  { %v675_v10 = vpop.f32.mrb[18].mxu0  ;;  %v724_v11 = vpop.f32.mrb[18].mxu1 }
 0x4b8   :  { %v7688_v13 = vpop.f32.mrb[19].mxu0  ;;  %v7694_v14 = vpop.f32.mrb[19].mxu1  ;;  %v745_v15 = vsel %vm337_vm6, %v673_v4, -inf  ;;  %v748_v33 = vsel %vm337_vm6, %v9181_v32, -inf }
 0x4b9   :  { %746 = vmax.xlane.f32.xlu0 %v745_v15 }
 0x4c2   :  { %927 = vrot.lane.b32.xlu1 %v823_v23, %s8871_s27  ;;  %v8368_v23 = vunpack.i.l.bf16 %v9074_v38 }
 0x4c3   :  { %v729_v25 = vpop.xlane.xlu1 %728 }
 0x4c4   :  { %v751_v28 = vsub.f32 %v9115_v3, %v729_v25  ;;  %v824_v3 = vpack.c.bf16 %v8364_v35, %v8364_v35  ;;  %v825_v25 = vpack.c.bf16 %v8368_v23, %v8368_v23 }
 0x4c6   :  { %v759_v29 = vmul.f32 1.442695, %v751_v28  ;;  %v8374_v28 = vunpack.i.h.bf16 %v9078_v40 }
 0x4c7   :  { %v732_v37 = vpop.xlane.xlu0 %731 }
 0x4c8   :  { %8563 = vpow2.f32 %v759_v29  ;;  %v752_v39 = vsub.f32 %v9123_v12, %v732_v37  ;;  %v828_v29 = vpack.c.bf16 %v8374_v28, %v8374_v28 }
 0x4ca   :  { %v761_v43 = vmul.f32 1.442695, %v752_v39 }
 0x4cc   :  { %8565 = vpow2.f32 %v761_v43 }
 0x4cf   :  { %878 = vrot.lane.b32.xlu0 %v9037_v0, %s8871_s27 }
 0x4d2   :  { %v9185_v34 = vpop.eup %8563 }
 0x4d3   :  { %v775_v0 = vsel %vm337_vm6, %v9185_v34, 0.0 }
 0x4d6   :  { %v9191_v44 = vpop.eup %8565 }
 0x4d7   :  { %v778_v50 = vsel %vm337_vm6, %v9191_v44, 0.0 }
 0x4e6   :  { %749 = vmax.xlane.f32.xlu1 %v748_v33 }
 0x4ee   :  { %776 = vadd.xlane.f32.xlu0 %v775_v0 }
 0x4f7   :  { %976 = vrot.lane.b32.xlu1 %v824_v3, %s8871_s27 }
 0x51b   :  { %779 = vadd.xlane.f32.xlu1 %v778_v50 }
 0x52c   :  { %1074 = vrot.lane.b32.xlu1 %v826_v52, %s8871_s27 }
 0x536   :  { %v735_v53 = vpop.xlane.xlu0 %734  ;;  %v738_v54 = vpop.xlane.xlu1 %737 }
 0x537   :  { %v753_v55 = vsub.f32 %v9137_v26, %v735_v53  ;;  %v754_v56 = vsub.f32 %v9140_v27, %v738_v54 }
 0x539   :  { %v763_v12 = vmul.f32 1.442695, %v753_v55  ;;  %v765_v57 = vmul.f32 1.442695, %v754_v56  ;;  %v8373_v56 = vunpack.i.l.bf16 %v9078_v40 }
 0x53b   :  { %8567 = vpow2.f32 %v763_v12  ;;  %v827_v12 = vpack.c.bf16 %v8373_v56, %v8373_v56 }
 0x53c   :  { %8569 = vpow2.f32 %v765_v57 }
 0x53e   :  { %v741_v58 = vpop.xlane.xlu0 %740  ;;  %v744_v33 = vpop.xlane.xlu1 %743 }
 0x53f   :  { %v755_v61 = vsub.f32 %v9156_v45, %v741_v58  ;;  %v756_v0 = vsub.f32 %v9159_v49, %v744_v33 }
 0x541   :  { %v767_v1 = vmul.f32 1.442695, %v755_v61  ;;  %v769_v35 = vmul.f32 1.442695, %v756_v0 }
 0x542   :  { %v928_v3 = vpop.permute.xlu1 %927 }
 0x543   :  { %8571 = vpow2.f32 %v767_v1  ;;  %v933_v55 = vsel %vm834_vm7, %v928_v3, 0 }
 0x545   :  { %v9200_v6 = vpop.eup %8567 }
 0x546   :  { %v747_v8 = vpop.xlane.xlu0 %746  ;;  %v781_v10 = vsel %vm337_vm6, %v9200_v6, 0.0  ;;  %v9204_v11 = vpop.eup %8569 }
 0x547   :  { %v757_v26 = vsub.f32 %v673_v4, %v747_v8  ;;  %782 = vadd.xlane.f32.xlu0 %v781_v10  ;;  %v784_v14 = vsel %vm337_vm6, %v9204_v11, 0.0 }
 0x549   :  { %v771_v27 = vmul.f32 1.442695, %v757_v26 }
 0x54a   :  { %v879_v13 = vpop.permute.xlu0 %878 }
 0x54b   :  { %8573 = vpow2.f32 %v771_v27  ;;  %v884_v45 = vsel %vm834_vm7, %v879_v13, 0  ;;  %785 = vadd.xlane.f32.xlu0 %v784_v14 }
 0x54c   :  { %7702 = vmatpush3.bf16.msra.mxu1 %v884_v45  ;;  %8575 = vpow2.f32 %v769_v35 }
 0x54d   :  { %v9209_v15 = vpop.eup %8571  ;;  %7713 = vmatprep.subr.bf16.mxu1 %v8865_v7 }
 0x54e   :  { %v787_v16 = vsel %vm337_vm6, %v9209_v15, 0.0 }
 0x550   :  { %788 = vadd.xlane.f32.xlu1 %v787_v16 }
 0x555   :  { %v9214_v4 = vpop.eup %8573 }
 0x556   :  { %v793_v17 = vsel %vm337_vm6, %v9214_v4, 0.0  ;;  %v9224_v50 = vpop.eup %8575 }
 0x557   :  { %794 = vadd.xlane.f32.xlu1 %v793_v17  ;;  %v790_v51 = vsel %vm337_vm6, %v9224_v50, 0.0 }
 0x561   :  { %1025 = vrot.lane.b32.xlu0 %v825_v25, %s8871_s27 }
 0x568   :  { %1172 = vrot.lane.b32.xlu1 %v828_v29, %s8871_s27 }
 0x573   :  { %v750_v37 = vpop.xlane.xlu1 %749 }
 0x574   :  { %v758_v39 = vsub.f32 %v9181_v32, %v750_v37 }
 0x576   :  { %v773_v43 = vmul.f32 1.442695, %v758_v39 }
 0x577   :  { %v977_v57 = vpop.permute.xlu1 %976 }
 0x578   :  { %8577 = vpow2.f32 %v773_v43  ;;  %v982_v8 = vsel %vm834_vm7, %v977_v57, 0 }
 0x57b   :  { %v777_v38 = vpop.xlane.xlu0 %776 }
 0x57c   :  { %8579 = vrcp.f32 %v777_v38 }
 0x580   :  { %791 = vadd.xlane.f32.xlu0 %v790_v51 }
 0x582   :  { %v9228_v52 = vpop.eup %8577 }
 0x583   :  { %v796_v49 = vsel %vm337_vm6, %v9228_v52, 0.0 }
 0x584   :  { %797 = vadd.xlane.f32.xlu0 %v796_v49 }
 0x586   :  { %v8580_v53 = vpop.eup %8579 }
 0x587   :  { %v807_v54 = vmul.f32 %v8580_v53, %v9185_v34 }
 0x589   :  { %v815_v32 = vpack.c.bf16 %v807_v54, %v807_v54 }
 0x58b   :  { %7698 = vmatmul.mubr.msk.bf16.vlgmr.msra.gmra.mrb[20].mxu0 %vm337_vm6, %v815_v32 }
 0x58c   :  { %7708 = vmatpush3.bf16.msra.mxu0 %v933_v55  ;;  %7709 = vmatprep.mubr.msk.bf16.mxu0 %vm8866_vm5, %v8865_v7 }
 0x58d   :  { %7719 = vmatprep.subr.bf16.mxu0 %v8865_v7 }
 0x59a   :  { %1123 = vrot.lane.b32.xlu0 %v827_v12, %s8871_s27 }
 0x5a8   :  { %v780_v58 = vpop.xlane.xlu1 %779 }
 0x5a9   :  { %8581 = vrcp.f32 %v780_v58 }
 0x5ac   :  { %v1075_v26 = vpop.permute.xlu1 %1074 }
 0x5ad   :  { %v1080_v29 = vsel %vm834_vm7, %v1075_v26, 0 }
 0x5b3   :  { %v8582_v34 = vpop.eup %8581 }
 0x5b4   :  { %v808_v61 = vmul.f32 %v8582_v34, %v9191_v44 }
 0x5b6   :  { %v816_v1 = vpack.c.bf16 %v808_v61, %v808_v61 }
 0x5b8   :  { %7704 = vmatmul.mubr.msk.bf16.vlgmr.msra.gmra.mrb[20].mxu1 %vm337_vm6, %v816_v1 }
 0x5b9   :  { %7714 = vmatpush3.bf16.msra.mxu1 %v982_v8  ;;  %7715 = vmatprep.mubr.msk.bf16.mxu1 %vm8866_vm5, %v8865_v7 }
 0x5ba   :  { %7725 = vmatprep.subr.bf16.mxu1 %v8865_v7 }
 0x5d4   :  { %v783_v40 = vpop.xlane.xlu0 %782 }
 0x5d5   :  { %8583 = vrcp.f32 %v783_v40 }
 0x5d8   :  { %v786_v10 = vpop.xlane.xlu0 %785 }
 0x5d9   :  { %8585 = vrcp.f32 %v786_v10 }
 0x5dc   :  { %v1026_v14 = vpop.permute.xlu0 %1025 }
 0x5dd   :  { %v789_v27 = vpop.xlane.xlu1 %788  ;;  %v1031_v17 = vsel %vm834_vm7, %v1026_v14, 0 }
 0x5de   :  { %8587 = vrcp.f32 %v789_v27 }
 0x5df   :  { %v8584_v13 = vpop.eup %8583 }
 0x5e0   :  { %v809_v44 = vmul.f32 %v8584_v13, %v9200_v6 }
 0x5e2   :  { %v817_v45 = vpack.c.bf16 %v809_v44, %v809_v44 }
 0x5e3   :  { %v8586_v16 = vpop.eup %8585 }
 0x5e4   :  { %7710 = vmatmul.mubr.msk.bf16.vlgmr.msra.gmra.mrb[24].mxu0 %vm337_vm6, %v817_v45  ;;  %v810_v23 = vmul.f32 %v8586_v16, %v9204_v11  ;;  %v795_v33 = vpop.xlane.xlu1 %794 }
 0x5e5   :  { %7720 = vmatpush3.bf16.msra.mxu0 %v1031_v17  ;;  %7721 = vmatprep.mubr.msk.bf16.mxu0 %vm8866_vm5, %v8865_v7  ;;  %8589 = vrcp.f32 %v795_v33 }
 0x5e6   :  { %v818_v25 = vpack.c.bf16 %v810_v23, %v810_v23  ;;  %7731 = vmatprep.subr.bf16.mxu0 %v8865_v7 }
 0x5e8   :  { %v8588_v28 = vpop.eup %8587  ;;  %7716 = vmatmul.mubr.msk.bf16.vlgmr.msra.gmra.mrb[24].mxu1 %vm337_vm6, %v818_v25  ;;  %v1173_v49 = vpop.permute.xlu1 %1172 }
 0x5e9   :  { %7726 = vmatpush3.bf16.msra.mxu1 %v1080_v29  ;;  %v811_v6 = vmul.f32 %v8588_v28, %v9209_v15  ;;  %7727 = vmatprep.mubr.msk.bf16.mxu1 %vm8866_vm5, %v8865_v7 }
 0x5ea   :  { %7737 = vmatprep.subr.bf16.mxu1 %v8865_v7 }
 0x5eb   :  { %v819_v11 = vpack.c.bf16 %v811_v6, %v811_v6 }
 0x5ed   :  { %7722 = vmatmul.mubr.msk.bf16.vlgmr.msra.gmra.mrb[28].mxu0 %vm337_vm6, %v819_v11 }
 0x5ee   :  { %7733 = vmatprep.mubr.msk.bf16.mxu0 %vm8866_vm5, %v8865_v7 }
 0x5ef   :  { %v8590_v35 = vpop.eup %8589 }
 0x5f0   :  { %v813_v15 = vmul.f32 %v8590_v35, %v9214_v4  ;;  %v1178_v4 = vsel %vm834_vm7, %v1173_v49, 0 }
 0x5f2   :  { %v821_v38 = vpack.c.bf16 %v813_v15, %v813_v15 }
 0x60d   :  { %v792_v0 = vpop.xlane.xlu0 %791 }
 0x60e   :  { %8591 = vrcp.f32 %v792_v0 }
 0x611   :  { %v798_v3 = vpop.xlane.xlu0 %797 }
 0x612   :  { %8593 = vrcp.f32 %v798_v3 }
 0x615   :  { %v1124_v37 = vpop.permute.xlu0 %1123 }
 0x616   :  { %v1129_v39 = vsel %vm834_vm7, %v1124_v37, 0 }
 0x617   :  { %7732 = vmatpush3.bf16.msra.mxu0 %v1129_v39 }
 0x618   :  { %v8592_v43 = vpop.eup %8591  ;;  %7743 = vmatprep.subr.bf16.mxu0 %v8865_v7 }
 0x619   :  { %v812_v51 = vmul.f32 %v8592_v43, %v9224_v50 }
 0x61a   :  { %7734 = vmatmul.mubr.msk.bf16.vlgmr.msra.gmra.mrb[32].mxu0 %vm337_vm6, %v821_v38 }
 0x61b   :  { %v820_v53 = vpack.c.bf16 %v812_v51, %v812_v51  ;;  %7747 = vmatprep.mubr.msk.bf16.mxu0 %vm8866_vm5, %v8865_v7 }
 0x61c   :  { %v8594_v54 = vpop.eup %8593 }
 0x61d   :  { %7728 = vmatmul.mubr.msk.bf16.vlgmr.msra.gmra.mrb[28].mxu1 %vm337_vm6, %v820_v53  ;;  %v814_v32 = vmul.f32 %v8594_v54, %v9228_v52 }
 0x61e   :  { %7738 = vmatpush3.bf16.msra.mxu1 %v1178_v4  ;;  %7739 = vmatprep.mubr.msk.bf16.mxu1 %vm8866_vm5, %v8865_v7 }
 0x61f   :  { %7751 = vmatprep.subr.bf16.mxu1 %v8865_v7  ;;  %v822_v50 = vpack.c.bf16 %v814_v32, %v814_v32 }
 0x625   :  { %7740 = vmatmul.mubr.msk.bf16.vlgmr.msra.gmra.mrb[32].mxu1 %vm337_vm6, %v822_v50 }
 0x626   :  { %7759 = vmatprep.mubr.msk.bf16.mxu1 %vm8866_vm5, %v8865_v7 }
 0x65e   :  { %v872_v55 = vpop.f32.mrb[20].mxu0 }
 0x65f   :  { %v7699_v56 = vpop.f32.mrb[21].mxu0 }
 0x660   :  { %v875_v12 = vpop.f32.mrb[22].mxu0  ;;  %v1250_v56 = vld [vmem:[%s10855_s7] sm:$0xff] }
 0x661   :  { %v7700_v57 = vpop.f32.mrb[23].mxu0  ;;  %v1252_v12 = vld [vmem:[%s10855_s7 + $0x10] sm:$0xff] }
 0x68b   :  { %v920_v58 = vpop.f32.mrb[20].mxu1 }
 0x68c   :  { %v7705_v34 = vpop.f32.mrb[21].mxu1 }
 0x68d   :  { %v923_v61 = vpop.f32.mrb[22].mxu1 }
 0x68e   :  { %v7706_v1 = vpop.f32.mrb[23].mxu1 }
 0x6b7   :  { %v969_v8 = vpop.f32.mrb[24].mxu0 }
 0x6b8   :  { %v1220_v40 = vadd.f32 %v969_v8, %v872_v55  ;;  %v7711_v10 = vpop.f32.mrb[25].mxu0 }
 0x6b9   :  { %v972_v52 = vpop.f32.mrb[26].mxu0 }
 0x6ba   :  { %v7712_v26 = vpop.f32.mrb[27].mxu0 }
 0x6bb   :  { %v1018_v27 = vpop.f32.mrb[24].mxu1  ;;  %v1246_v26 = vsub.s32 1, %v9014_v46 }
 0x6bc   :  { %v1221_v13 = vadd.f32 %v1018_v27, %v920_v58  ;;  %v7717_v44 = vpop.f32.mrb[25].mxu1 }
 0x6bd   :  { %v1021_v14 = vpop.f32.mrb[26].mxu1  ;;  %v1247_v44 = vrot.slane %v9022_v48, %v1246_v26 }
 0x6be   :  { %v7718_v45 = vpop.f32.mrb[27].mxu1 }
 0x6c0   :  { %v1067_v16 = vpop.f32.mrb[28].mxu0 }
 0x6c1   :  { %v1222_v17 = vadd.f32 %v1220_v40, %v1067_v16  ;;  %v7723_v23 = vpop.f32.mrb[29].mxu0 }
 0x6c2   :  { %v1070_v25 = vpop.f32.mrb[30].mxu0 }
 0x6c3   :  { %v7724_v28 = vpop.f32.mrb[31].mxu0  ;;  %v1254_v25 = vld [vmem:[%s10855_s7 + $0x20] sm:$0xff] }
 0x6c4   :  { %v1255_v28 = vld [vmem:[%s10855_s7 + $0x28] sm:$0xff] }
 0x6ed   :  { %v1165_v29 = vpop.f32.mrb[32].mxu0 }
 0x6ee   :  { %v1224_v6 = vadd.f32 %v1222_v17, %v1165_v29  ;;  %v7735_v11 = vpop.f32.mrb[33].mxu0  ;;  %v1316_v29 = vpack.c.bf16 %v1255_v28, %v1254_v25 }
 0x6ef   :  { %v1168_v33 = vpop.f32.mrb[34].mxu0  ;;  %v1257_v11 = vld [vmem:[%s10855_s7 + $0x38] sm:$0xff] }
 0x6f0   :  { %v9279_v0 = vadd.f32 %v1224_v6, %v8971_v21  ;;  %v1116_v35 = vpop.f32.mrb[28].mxu1  ;;  %v7736_v3 = vpop.f32.mrb[35].mxu0  ;;  %v1256_v6 = vld [vmem:[%s10855_s7 + $0x30] sm:$0xff] }
 0x6f1   :  { %v1223_v15 = vadd.f32 %v1221_v13, %v1116_v35  ;;  %v7729_v37 = vpop.f32.mrb[29].mxu1  ;;  %v1317_v33 = vpack.c.bf16 %v1257_v11, %v1256_v6 }
 0x6f2   :  { %v1119_v39 = vpop.f32.mrb[30].mxu1  ;;  %v1228_v43 = vmul.f32 %v9279_v0, %v9279_v0 }
 0x6f3   :  { %v7730_v38 = vpop.f32.mrb[31].mxu1 }
 0x6f4   :  { %v1230_v51 = vsel %vm87_vm4, %v1228_v43, 0.0 }
 0x6f5   :  { %1231 = vadd.xlane.f32.xlu0 %v1230_v51 }
 0x6f8   :  { %v1214_v49 = vpop.f32.mrb[32].mxu1 }
 0x6f9   :  { %v1225_v53 = vadd.f32 %v1223_v15, %v1214_v49  ;;  %v7741_v54 = vpop.f32.mrb[33].mxu1 }
 0x6fa   :  { %v1217_v4 = vpop.f32.mrb[34].mxu1 }
 0x6fb   :  { %v9285_v32 = vadd.f32 %v1225_v53, %v8977_v24  ;;  %v7742_v21 = vpop.f32.mrb[35].mxu1  ;;  %v1251_v24 = vld [vmem:[%s10855_s7 + $0x8] sm:$0xff] }
 0x6fc   :  { %v1314_v57 = vpack.c.bf16 %v1251_v24, %v1250_v56 }
 0x6fd   :  { %v1229_v50 = vmul.f32 %v9285_v32, %v9285_v32 }
 0x6fe   :  { %7752 = vmatpush3.bf16.msra.mxu1 %v1314_v57  ;;  %v7256_v57 = vld [vmem:[%s10853_s5 + $0x40] sm:$0xff] }
 0x6ff   :  { %v1233_v55 = vsel %vm87_vm4, %v1229_v50, 0.0  ;;  %7753 = vmatprep.subr.bf16.mxu1 %v8865_v7 }
 0x700   :  { %1234 = vadd.xlane.f32.xlu1 %v1233_v55 }
 0x70b   :  { %1261 = vrot.lane.b32.xlu0 %v8992_v31, %s8871_s27  ;;  %v1253_v31 = vld [vmem:[%s10855_s7 + $0x18] sm:$0xff] }
 0x70c   :  { %v1315_v58 = vpack.c.bf16 %v1253_v31, %v1252_v12  ;;  %v7258_v31 = vld [vmem:[%s10853_s5 + $0x50] sm:$0xff] }
 0x70e   :  { %7754 = vmatpush3.bf16.msra.mxu1 %v1315_v58  ;;  %v1397_v58 = vpack.c.bf16 %v7258_v31, %v7256_v57 }
 0x70f   :  { %7755 = vmatprep.subr.bf16.mxu1 %v8865_v7 }
 0x711   :  { %1263 = vrot.lane.b32.xlu1 %v9003_v36, %s8871_s27 }
 0x712   :  { %7756 = vmatpush3.bf16.msra.mxu1 %v1316_v29 }
 0x713   :  { %7757 = vmatprep.subr.bf16.mxu1 %v8865_v7 }
 0x716   :  { %7758 = vmatpush3.bf16.msra.mxu1 %v1317_v33 }
 0x717   :  { %7769 = vmatprep.subr.bf16.mxu1 %v8865_v7 }
 0x782   :  { %v1232_v36 = vpop.xlane.xlu0 %1231 }
 0x783   :  { %v1236_v34 = vmul.f32 0.03125, %v1232_v36  ;;  %v7261_v36 = vld [vmem:[%s10853_s5 + $0x68] sm:$0xff] }
 0x785   :  { %v1238_v1 = vadd.f32 1e-06, %v1236_v34  ;;  %v7263_v34 = vld [vmem:[%s10853_s5 + $0x78] sm:$0xff] }
 0x786   :  { %v1262_v61 = vpop.permute.xlu0 %1261 }
 0x787   :  { %7744 = vmatpush3.bf16.msra.mxu0 %v1262_v61  ;;  %8595 = vrsqrt.f32 %v1238_v1  ;;  %v7260_v61 = vld [vmem:[%s10853_s5 + $0x60] sm:$0xff]  ;;  %v9370_v1 = vpack.c.bf16 %v7263_v34, %v7261_v36 }
 0x788   :  { %7745 = vmatprep.subr.bf16.mxu0 %v8865_v7 }
 0x78d   :  { %v1235_v8 = vpop.xlane.xlu1 %1234 }
 0x78e   :  { %v1237_v40 = vmul.f32 0.03125, %v1235_v8  ;;  %v7262_v8 = vld [vmem:[%s10853_s5 + $0x70] sm:$0xff] }
 0x790   :  { %v1239_v10 = vadd.f32 1e-06, %v1237_v40  ;;  %v1399_v40 = vpack.c.bf16 %v7262_v8, %v7260_v61 }
 0x791   :  { %v1264_v52 = vpop.permute.xlu1 %1263  ;;  %v8596_v27 = vpop.eup %8595 }
 0x792   :  { %8597 = vrsqrt.f32 %v1239_v10  ;;  %7746 = vmatpush3.bf16.msra.mxu0 %v1264_v52  ;;  %v1242_v13 = vmul.f32 %v8596_v27, %v9279_v0 }
 0x794   :  { %v1248_v16 = vmul.f32 %v1247_v44, %v1242_v13 }
 0x79c   :  { %v8598_v14 = vpop.eup %8597 }
 0x79d   :  { %v1243_v45 = vmul.f32 %v8598_v14, %v9285_v32 }
 0x79f   :  { %v1249_v17 = vmul.f32 %v1247_v44, %v1243_v45  ;;  %v1392_v45 = vsub.s32 2, %v9014_v46 }
 0x7a1   :  { %v1258_v23 = vpack.c.bf16 %v1249_v17, %v1248_v16 }
 0x7a3   :  { %7748 = vmatmul.mubr.msk.bf16.vlgmr.msra.gmra.mrb[36].mxu0 %vm87_vm4, %v1258_v23  ;;  %v1393_v23 = vrot.slane %v9022_v48, %v1392_v45 }
 0x7a4   :  { %1436 = vmatprep.mubr.bf16.mxu0 %v8864_v2 }
 0x876   :  { %v1304_v35 = vpop.f32.mrb[36].mxu0 }
 0x877   :  { %v7749_v3 = vpop.f32.mrb[37].mxu0  ;;  %v1311_v37 = vmax.f32 %v1304_v35, 0.0 }
 0x878   :  { %v1307_v15 = vpop.f32.mrb[38].mxu0 }
 0x879   :  { %v1312_v39 = vmax.f32 %v1307_v15, 0.0  ;;  %v7750_v43 = vpop.f32.mrb[39].mxu0 }
 0x87b   :  { %v1313_v38 = vpack.c.bf16 %v1312_v39, %v1311_v37 }
 0x87d   :  { %7760 = vmatmul.mubr.msk.bf16.vlgmr.msra.gmra.mrb[36].mxu1 %vm1318_vm8, %v1313_v38 }
 0x87e   :  { %7771 = vmatprep.mubr.msk.bf16.mxu1 %vm8866_vm5, %v8865_v7 }
 0x950   :  { %v1356_v51 = vpop.f32.mrb[36].mxu1 }
 0x951   :  { %v9335_v49 = vadd.f32 %v1356_v51, %v9279_v0  ;;  %v7761_v53 = vpop.f32.mrb[37].mxu1  ;;  %v7257_v0 = vld [vmem:[%s10853_s5 + $0x48] sm:$0xff] }
 0x952   :  { %v1359_v54 = vpop.f32.mrb[38].mxu1 }
 0x953   :  { %v9338_v4 = vadd.f32 %v1359_v54, %v9285_v32  ;;  %v7762_v21 = vpop.f32.mrb[39].mxu1  ;;  %v1374_v50 = vmul.f32 %v9335_v49, %v9335_v49  ;;  %v7259_v32 = vld [vmem:[%s10853_s5 + $0x58] sm:$0xff] }
 0x954   :  { %v9352_v12 = vpack.c.bf16 %v7259_v32, %v7257_v0 }
 0x955   :  { %v1376_v55 = vsel %vm87_vm4, %v1374_v50, 0.0  ;;  %v1375_v56 = vmul.f32 %v9338_v4, %v9338_v4 }
 0x956   :  { %1377 = vadd.xlane.f32.xlu0 %v1376_v55  ;;  %1404 = vmatprep.subr.bf16.mxu0 %v9352_v12 }
 0x957   :  { %v1379_v24 = vsel %vm87_vm4, %v1375_v56, 0.0  ;;  %1405 = vmatpush1.bf16.msra.mxu0 %v1397_v58 }
 0x958   :  { %1380 = vadd.xlane.f32.xlu1 %v1379_v24  ;;  %1406 = vmatprep.subr.bf16.mxu0 %v9370_v1 }
 0x95b   :  { %1407 = vmatpush1.bf16.msra.mxu0 %v1399_v40 }
 0x95c   :  { %7763 = vmatprep.subr.bf16.mxu0 %v8865_v7 }
 0x9e3   :  { %v1378_v10 = vpop.xlane.xlu0 %1377 }
 0x9e4   :  { %v1382_v52 = vmul.f32 0.03125, %v1378_v10 }
 0x9e5   :  { %v1381_v27 = vpop.xlane.xlu1 %1380 }
 0x9e6   :  { %v1384_v13 = vadd.f32 1e-06, %v1382_v52  ;;  %v1383_v44 = vmul.f32 0.03125, %v1381_v27 }
 0x9e8   :  { %8599 = vrsqrt.f32 %v1384_v13  ;;  %v1385_v14 = vadd.f32 1e-06, %v1383_v44 }
 0x9ea   :  { %8601 = vrsqrt.f32 %v1385_v14 }
 0x9f2   :  { %v8600_v16 = vpop.eup %8599 }
 0x9f3   :  { %v1388_v17 = vmul.f32 %v8600_v16, %v9335_v49 }
 0x9f4   :  { %v8602_v25 = vpop.eup %8601 }
 0x9f5   :  { %v1389_v28 = vmul.f32 %v8602_v25, %v9338_v4  ;;  %v1394_v29 = vmul.f32 %v1393_v23, %v1388_v17 }
 0x9f7   :  { %v1395_v6 = vmul.f32 %v1393_v23, %v1389_v28 }
 0x9f9   :  { %v1396_v11 = vpack.c.bf16 %v1395_v6, %v1394_v29 }
 0x9fb   :  { %7264 = vmatmul.mubr.msk.bf16.vlgmr.msra.gmra.mrb[40].mxu0 %vm87_vm4, %v1396_v11 }
 0x9fc   :  { %7765 = vmatprep.mubr.msk.bf16.mxu0 %vm8866_vm5, %v8865_v7 }
 0xace   :  { %v1438_v33 = vpop.f32.mrb[40].mxu0 }
 0xacf   :  { %v1440_v35 = vpop.f32.mrb[41].mxu0  ;;  %v1487_v48 = vpack.c.bf16 %v1438_v33, %v1438_v33 }
 0xad0   :  { %v1442_v3 = vpop.f32.mrb[42].mxu0 }
 0xad1   :  { %v1444_v15 = vpop.f32.mrb[43].mxu0  ;;  %v8380_v37 = vpack.i.bf16 %v1442_v3, %v1438_v33  ;;  %v9390_v43 = vpack.c.bf16 %v1442_v3, %v1442_v3 }
 0xad2   :  { %v8400_v39 = vpack.i.bf16 %v1444_v15, %v1440_v35 }
 0xad3   :  { %8381 = vrot.lane.b32.xlu1 %v8380_v37, %s8867_s23  ;;  %8376 = vrot.lane.b32.xlu0 %v8380_v37, %s8868_s24 }
 0xad7   :  { %1496 = vrot.lane.b32.xlu1 %v1487_v48, %s8869_s25  ;;  %8386 = vrot.lane.b32.xlu0 %v8380_v37, %s8870_s26 }
 0xadb   :  { %1545 = vrot.lane.b32.xlu0 %v9390_v43, %s8869_s25 }
 0xb45   :  { %v8382_v38 = vpop.permute.xlu1 %8381  ;;  %v8377_v51 = vpop.permute.xlu0 %8376 }
 0xb46   :  { %v8379_v53 = vunpack.i.h.bf16 %v8377_v51  ;;  %v8378_v54 = vunpack.i.l.bf16 %v8377_v51  ;;  %v8384_v21 = vunpack.i.h.bf16 %v8382_v38  ;;  %v8383_v50 = vunpack.i.l.bf16 %v8382_v38 }
 0xb48   :  { %v1489_v55 = vpack.c.bf16 %v8378_v54, %v8378_v54  ;;  %v1490_v56 = vpack.c.bf16 %v8379_v53, %v8379_v53  ;;  %v1491_v31 = vpack.c.bf16 %v8383_v50, %v8383_v50  ;;  %v1492_v58 = vpack.c.bf16 %v8384_v21, %v8384_v21 }
 0xb49   :  { %v1497_v24 = vpop.permute.xlu1 %1496  ;;  %v8387_v0 = vpop.permute.xlu0 %8386 }
 0xb4a   :  { %v1502_v32 = vsel %vm337_vm6, %v1497_v24, 0  ;;  %1594 = vrot.lane.b32.xlu1 %v1489_v55, %s8869_s25  ;;  %1643 = vrot.lane.b32.xlu0 %v1490_v56, %s8869_s25  ;;  %v8388_v57 = vunpack.i.l.bf16 %v8387_v0  ;;  %v8389_v36 = vunpack.i.h.bf16 %v8387_v0 }
 0xb4b   :  { %7764 = vmatpush3.bf16.xpose.msra.mxu0 %v1502_v32 }
 0xb4c   :  { %7775 = vmatprep.subr.bf16.mxu0 %v8865_v7  ;;  %v1493_v8 = vpack.c.bf16 %v8388_v57, %v8388_v57  ;;  %v1494_v40 = vpack.c.bf16 %v8389_v36, %v8389_v36 }
 0xb4d   :  { %v1546_v34 = vpop.permute.xlu0 %1545 }
 0xb4e   :  { %v1551_v61 = vsel %vm337_vm6, %v1546_v34, 0  ;;  %1692 = vrot.lane.b32.xlu1 %v1491_v31, %s8869_s25  ;;  %1741 = vrot.lane.b32.xlu0 %v1492_v58, %s8869_s25 }
 0xb4f   :  { %7770 = vmatpush3.bf16.xpose.msra.mxu1 %v1551_v61 }
 0xb50   :  { %7781 = vmatprep.subr.bf16.mxu1 %v8865_v7 }
 0xb52   :  { %7766 = vmatmul.mubr.msk.bf16.vlgmr.msra.gmra.mrb[44].mxu0 %vm337_vm6, %v1487_v48  ;;  %1790 = vrot.lane.b32.xlu1 %v1493_v8, %s8869_s25 }
 0xb53   :  { %1839 = vrot.lane.b32.xlu0 %v1494_v40, %s8869_s25  ;;  %7777 = vmatprep.mubr.msk.bf16.mxu0 %vm8866_vm5, %v8865_v7 }
 0xb56   :  { %7772 = vmatmul.mubr.msk.bf16.vlgmr.msra.gmra.mrb[40].mxu1 %vm337_vm6, %v9390_v43  ;;  %8396 = vrot.lane.b32.xlu1 %v8400_v39, %s8871_s27 }
 0xb57   :  { %8391 = vrot.lane.b32.xlu0 %v8380_v37, %s8869_s25  ;;  %7783 = vmatprep.mubr.msk.bf16.mxu1 %vm8866_vm5, %v8865_v7 }
 0xb5a   :  { %8401 = vrot.lane.b32.xlu1 %v8400_v39, %s8872_s28 }
 0xb5e   :  { %1989 = vrot.lane.b32.xlu1 %v1487_v48, %s8871_s27 }
 0xbbc   :  { %v1595_v10 = vpop.permute.xlu1 %1594  ;;  %v1644_v52 = vpop.permute.xlu0 %1643 }
 0xbbd   :  { %v1600_v27 = vsel %vm337_vm6, %v1595_v10, 0  ;;  %v1649_v13 = vsel %vm337_vm6, %v1644_v52, 0 }
 0xbbe   :  { %7776 = vmatpush3.bf16.xpose.msra.mxu0 %v1600_v27  ;;  %7782 = vmatpush3.bf16.xpose.msra.mxu1 %v1649_v13 }
 0xbbf   :  { %7787 = vmatprep.subr.bf16.mxu0 %v8865_v7  ;;  %7793 = vmatprep.subr.bf16.mxu1 %v8865_v7 }
 0xbc0   :  { %v1693_v44 = vpop.permute.xlu1 %1692  ;;  %v1742_v14 = vpop.permute.xlu0 %1741 }
 0xbc1   :  { %v1698_v17 = vsel %vm337_vm6, %v1693_v44, 0  ;;  %v1747_v23 = vsel %vm337_vm6, %v1742_v14, 0 }
 0xbc4   :  { %v1791_v16 = vpop.permute.xlu1 %1790 }
 0xbc5   :  { %7778 = vmatmul.mubr.msk.bf16.vlgmr.msra.gmra.mrb[48].mxu0 %vm337_vm6, %v1489_v55  ;;  %7784 = vmatmul.mubr.msk.bf16.vlgmr.msra.gmra.mrb[44].mxu1 %vm337_vm6, %v1490_v56  ;;  %v1840_v28 = vpop.permute.xlu0 %1839  ;;  %v1796_v6 = vsel %vm337_vm6, %v1791_v16, 0 }
 0xbc6   :  { %7788 = vmatpush3.bf16.xpose.msra.mxu0 %v1698_v17  ;;  %7794 = vmatpush3.bf16.xpose.msra.mxu1 %v1747_v23  ;;  %v1845_v11 = vsel %vm337_vm6, %v1840_v28, 0 }
 0xbc7   :  { %7789 = vmatprep.mubr.msk.bf16.mxu0 %vm8866_vm5, %v8865_v7  ;;  %7795 = vmatprep.mubr.msk.bf16.mxu1 %vm8866_vm5, %v8865_v7 }
 0xbc8   :  { %v9427_v25 = vpop.permute.xlu1 %8396  ;;  %7799 = vmatprep.subr.bf16.mxu0 %v8865_v7  ;;  %7805 = vmatprep.subr.bf16.mxu1 %v8865_v7 }
 0xbcc   :  { %v9431_v29 = vpop.permute.xlu1 %8401 }
 0xbcd   :  { %7790 = vmatmul.mubr.msk.bf16.vlgmr.msra.gmra.mrb[52].mxu0 %vm337_vm6, %v1491_v31  ;;  %7796 = vmatmul.mubr.msk.bf16.vlgmr.msra.gmra.mrb[48].mxu1 %vm337_vm6, %v1492_v58 }
 0xbce   :  { %7800 = vmatpush3.bf16.xpose.msra.mxu0 %v1796_v6  ;;  %7806 = vmatpush3.bf16.xpose.msra.mxu1 %v1845_v11 }
 0xbcf   :  { %7801 = vmatprep.mubr.msk.bf16.mxu0 %vm8866_vm5, %v8865_v7  ;;  %7807 = vmatprep.mubr.msk.bf16.mxu1 %vm8866_vm5, %v8865_v7 }
 0xbd0   :  { %7811 = vmatprep.subr.bf16.mxu0 %v8865_v7  ;;  %7817 = vmatprep.subr.bf16.mxu1 %v8865_v7  ;;  %v1990_v33 = vpop.permute.xlu1 %1989 }
 0xbd1   :  { %v1995_v35 = vsel %vm834_vm7, %v1990_v33, 0 }
 0xbd5   :  { %7802 = vmatmul.mubr.msk.bf16.vlgmr.msra.gmra.mrb[56].mxu0 %vm337_vm6, %v1493_v8  ;;  %7808 = vmatmul.mubr.msk.bf16.vlgmr.msra.gmra.mrb[52].mxu1 %vm337_vm6, %v1494_v40 }
 0xbd6   :  { %7812 = vmatpush3.bf16.msra.mxu0 %v1995_v35  ;;  %7813 = vmatprep.mubr.msk.bf16.mxu0 %vm8866_vm5, %v8865_v7 }
 0xbd7   :  { %7823 = vmatprep.subr.bf16.mxu0 %v8865_v7  ;;  %7819 = vmatprep.mubr.msk.bf16.mxu1 %vm8866_vm5, %v8865_v7 }
 0xc25   :  { %v1538_v3 = vpop.f32.mrb[44].mxu0 }
 0xc26   :  { %v1539_v15 = vadd.f32 %v1538_v3, %v9112_v63  ;;  %v7767_v37 = vpop.f32.mrb[45].mxu0 }
 0xc27   :  { %v1541_v39 = vpop.f32.mrb[46].mxu0 }
 0xc28   :  { %v7768_v48 = vpop.f32.mrb[47].mxu0  ;;  %v1887_v38 = vsel %vm337_vm6, %v1539_v15, -inf  ;;  %v8392_v39 = vpop.permute.xlu0 %8391 }
 0xc29   :  { %1888 = vmax.xlane.f32.xlu1 %v1887_v38  ;;  %v1587_v51 = vpop.f32.mrb[40].mxu1  ;;  %v8393_v48 = vunpack.i.l.bf16 %v8392_v39 }
 0xc2a   :  { %v9454_v53 = vadd.f32 %v1587_v51, %v9118_v5  ;;  %v7773_v54 = vpop.f32.mrb[41].mxu1 }
 0xc2b   :  { %v1590_v21 = vpop.f32.mrb[42].mxu1  ;;  %v1983_v38 = vpack.c.bf16 %v8393_v48, %v8393_v48 }
 0xc2c   :  { %v7774_v50 = vpop.f32.mrb[43].mxu1  ;;  %v1890_v55 = vsel %vm337_vm6, %v9454_v53, -inf }
 0xc2d   :  { %1891 = vmax.xlane.f32.xlu0 %v1890_v55 }
 0xc98   :  { %v1636_v56 = vpop.f32.mrb[48].mxu0  ;;  %v1685_v24 = vpop.f32.mrb[44].mxu1 }
 0xc99   :  { %v9459_v63 = vadd.f32 %v1636_v56, %v9131_v18  ;;  %v9462_v0 = vadd.f32 %v1685_v24, %v9134_v19  ;;  %v7779_v32 = vpop.f32.mrb[49].mxu0  ;;  %v7785_v57 = vpop.f32.mrb[45].mxu1  ;;  %v8394_v24 = vunpack.i.h.bf16 %v8392_v39 }
 0xc9a   :  { %v1639_v31 = vpop.f32.mrb[50].mxu0  ;;  %v1688_v5 = vpop.f32.mrb[46].mxu1 }
 0xc9b   :  { %v7780_v58 = vpop.f32.mrb[51].mxu0  ;;  %v7786_v36 = vpop.f32.mrb[47].mxu1  ;;  %v1893_v34 = vsel %vm337_vm6, %v9459_v63, -inf  ;;  %v1896_v61 = vsel %vm337_vm6, %v9462_v0, -inf  ;;  %v1984_v32 = vpack.c.bf16 %v8394_v24, %v8394_v24  ;;  %v8399_v5 = vunpack.i.h.bf16 %v9427_v25 }
 0xc9c   :  { %1894 = vmax.xlane.f32.xlu0 %v1893_v34  ;;  %1897 = vmax.xlane.f32.xlu1 %v1896_v61 }
 0xc9d   :  { %v1986_v58 = vpack.c.bf16 %v8399_v5, %v8399_v5 }
 0xca0   :  { %v1734_v8 = vpop.f32.mrb[52].mxu0  ;;  %v1783_v18 = vpop.f32.mrb[48].mxu1 }
 0xca1   :  { %v1735_v40 = vadd.f32 %v1734_v8, %v9150_v41  ;;  %v9470_v19 = vadd.f32 %v1783_v18, %v9153_v42  ;;  %v7791_v10 = vpop.f32.mrb[53].mxu0  ;;  %v7797_v52 = vpop.f32.mrb[49].mxu1 }
 0xca2   :  { %v1737_v27 = vpop.f32.mrb[54].mxu0  ;;  %v1786_v13 = vpop.f32.mrb[50].mxu1 }
 0xca3   :  { %v7792_v44 = vpop.f32.mrb[55].mxu0  ;;  %v7798_v14 = vpop.f32.mrb[51].mxu1  ;;  %v1899_v16 = vsel %vm337_vm6, %v1735_v40, -inf  ;;  %v1902_v17 = vsel %vm337_vm6, %v9470_v19, -inf }
 0xca4   :  { %1900 = vmax.xlane.f32.xlu0 %v1899_v16  ;;  %1903 = vmax.xlane.f32.xlu1 %v1902_v17 }
 0xca8   :  { %v1832_v23 = vpop.f32.mrb[56].mxu0  ;;  %v1881_v28 = vpop.f32.mrb[52].mxu1 }
 0xca9   :  { %v1833_v41 = vadd.f32 %v1832_v23, %v9169_v59  ;;  %v7803_v6 = vpop.f32.mrb[57].mxu0  ;;  %v7809_v42 = vpop.f32.mrb[53].mxu1  ;;  %v9481_v21 = vadd.f32 %v1881_v28, %v9178_v30 }
 0xcaa   :  { %v1835_v11 = vpop.f32.mrb[58].mxu0  ;;  %v1884_v33 = vpop.f32.mrb[54].mxu1 }
 0xcab   :  { %v7804_v35 = vpop.f32.mrb[59].mxu0  ;;  %v7810_v3 = vpop.f32.mrb[55].mxu1  ;;  %v1905_v37 = vsel %vm337_vm6, %v1833_v41, -inf  ;;  %v1908_v50 = vsel %vm337_vm6, %v9481_v21, -inf  ;;  %v8398_v11 = vunpack.i.l.bf16 %v9427_v25 }
 0xcac   :  { %1906 = vmax.xlane.f32.xlu0 %v1905_v37  ;;  %v8404_v35 = vunpack.i.h.bf16 %v9431_v29 }
 0xcad   :  { %v1985_v33 = vpack.c.bf16 %v8398_v11, %v8398_v11 }
 0xcae   :  { %v1988_v3 = vpack.c.bf16 %v8404_v35, %v8404_v35 }
 0xcb5   :  { %2086 = vrot.lane.b32.xlu1 %v1983_v38, %s8871_s27 }
 0xcb6   :  { %v1889_v51 = vpop.xlane.xlu1 %1888 }
 0xcb7   :  { %v1911_v54 = vsub.f32 %v1539_v15, %v1889_v51 }
 0xcb9   :  { %v1919_v59 = vmul.f32 1.442695, %v1911_v54 }
 0xcbb   :  { %8603 = vpow2.f32 %v1919_v59 }
 0xcc2   :  { %2037 = vrot.lane.b32.xlu0 %v9390_v43, %s8871_s27  ;;  %v1892_v43 = vpop.xlane.xlu0 %1891 }
 0xcc3   :  { %v1912_v15 = vsub.f32 %v9454_v53, %v1892_v43 }
 0xcc5   :  { %v9485_v55 = vpop.eup %8603  ;;  %v1921_v57 = vmul.f32 1.442695, %v1912_v15 }
 0xcc6   :  { %v1935_v56 = vsel %vm337_vm6, %v9485_v55, 0.0 }
 0xcc7   :  { %8605 = vpow2.f32 %v1921_v57  ;;  %v8403_v57 = vunpack.i.l.bf16 %v9431_v29 }
 0xcd1   :  { %v9491_v30 = vpop.eup %8605 }
 0xcd2   :  { %v1938_v31 = vsel %vm337_vm6, %v9491_v30, 0.0 }
 0xcd9   :  { %1909 = vmax.xlane.f32.xlu1 %v1908_v50 }
 0xce1   :  { %1936 = vadd.xlane.f32.xlu0 %v1935_v56 }
 0xcea   :  { %2135 = vrot.lane.b32.xlu1 %v1984_v32, %s8871_s27 }
 0xd0e   :  { %1939 = vadd.xlane.f32.xlu1 %v1938_v31  ;;  %v1987_v31 = vpack.c.bf16 %v8403_v57, %v8403_v57 }
 0xd1f   :  { %2233 = vrot.lane.b32.xlu1 %v1986_v58, %s8871_s27 }
 0xd29   :  { %v1895_v36 = vpop.xlane.xlu0 %1894  ;;  %v1898_v34 = vpop.xlane.xlu1 %1897 }
 0xd2a   :  { %v1913_v61 = vsub.f32 %v9459_v63, %v1895_v36  ;;  %v1914_v8 = vsub.f32 %v9462_v0, %v1898_v34  ;;  %v2562_v34 = vmul.f32 %v8969_v20, %v8969_v20 }
 0xd2c   :  { %v1923_v53 = vmul.f32 1.442695, %v1913_v61  ;;  %v1925_v18 = vmul.f32 1.442695, %v1914_v8 }
 0xd2e   :  { %8607 = vpow2.f32 %v1923_v53  ;;  %v2564_v53 = vsel %vm87_vm4, %v2562_v34, 0.0 }
 0xd2f   :  { %8609 = vpow2.f32 %v1925_v18 }
 0xd31   :  { %v1901_v10 = vpop.xlane.xlu0 %1900  ;;  %v1904_v37 = vpop.xlane.xlu1 %1903 }
 0xd32   :  { %v1915_v52 = vsub.f32 %v1735_v40, %v1901_v10  ;;  %v1916_v39 = vsub.f32 %v9470_v19, %v1904_v37 }
 0xd34   :  { %v1927_v27 = vmul.f32 1.442695, %v1915_v52  ;;  %v1929_v48 = vmul.f32 1.442695, %v1916_v39 }
 0xd35   :  { %v2087_v38 = vpop.permute.xlu1 %2086 }
 0xd36   :  { %8611 = vpow2.f32 %v1927_v27  ;;  %v2092_v15 = vsel %vm834_vm7, %v2087_v38, 0 }
 0xd38   :  { %v9499_v13 = vpop.eup %8607 }
 0xd39   :  { %v1907_v44 = vpop.xlane.xlu0 %1906  ;;  %v1941_v14 = vsel %vm337_vm6, %v9499_v13, 0.0  ;;  %v9503_v16 = vpop.eup %8609 }
 0xd3a   :  { %v1917_v17 = vsub.f32 %v1833_v41, %v1907_v44  ;;  %1942 = vadd.xlane.f32.xlu0 %v1941_v14  ;;  %v1944_v23 = vsel %vm337_vm6, %v9503_v16, 0.0 }
 0xd3c   :  { %v1931_v63 = vmul.f32 1.442695, %v1917_v17 }
 0xd3d   :  { %v2038_v0 = vpop.permute.xlu0 %2037 }
 0xd3e   :  { %8613 = vpow2.f32 %v1931_v63  ;;  %v2043_v40 = vsel %vm834_vm7, %v2038_v0, 0  ;;  %1945 = vadd.xlane.f32.xlu0 %v1944_v23 }
 0xd3f   :  { %7818 = vmatpush3.bf16.msra.mxu1 %v2043_v40  ;;  %8615 = vpow2.f32 %v1929_v48 }
 0xd40   :  { %v9508_v28 = vpop.eup %8611  ;;  %7829 = vmatprep.subr.bf16.mxu1 %v8865_v7 }
 0xd41   :  { %v1947_v6 = vsel %vm337_vm6, %v9508_v28, 0.0 }
 0xd43   :  { %1948 = vadd.xlane.f32.xlu1 %v1947_v6 }
 0xd48   :  { %v9513_v41 = vpop.eup %8613 }
 0xd49   :  { %v1953_v42 = vsel %vm337_vm6, %v9513_v41, 0.0  ;;  %v9523_v50 = vpop.eup %8615 }
 0xd4a   :  { %1954 = vadd.xlane.f32.xlu1 %v1953_v42  ;;  %v1950_v56 = vsel %vm337_vm6, %v9523_v50, 0.0 }
 0xd54   :  { %2184 = vrot.lane.b32.xlu0 %v1985_v33, %s8871_s27 }
 0xd5b   :  { %2331 = vrot.lane.b32.xlu1 %v1988_v3, %s8871_s27 }
 0xd66   :  { %v1910_v51 = vpop.xlane.xlu1 %1909 }
 0xd67   :  { %v1918_v54 = vsub.f32 %v9481_v21, %v1910_v51 }
 0xd69   :  { %v1933_v59 = vmul.f32 1.442695, %v1918_v54 }
 0xd6a   :  { %v2136_v5 = vpop.permute.xlu1 %2135 }
 0xd6b   :  { %8617 = vpow2.f32 %v1933_v59  ;;  %v2141_v8 = vsel %vm834_vm7, %v2136_v5, 0 }
 0xd6e   :  { %v1937_v25 = vpop.xlane.xlu0 %1936 }
 0xd6f   :  { %8619 = vrcp.f32 %v1937_v25 }
 0xd73   :  { %1951 = vadd.xlane.f32.xlu0 %v1950_v56 }
 0xd75   :  { %v9527_v24 = vpop.eup %8617 }
 0xd76   :  { %v1956_v19 = vsel %vm337_vm6, %v9527_v24, 0.0 }
 0xd77   :  { %1957 = vadd.xlane.f32.xlu0 %v1956_v19 }
 0xd79   :  { %v8620_v32 = vpop.eup %8619 }
 0xd7a   :  { %v1967_v43 = vmul.f32 %v8620_v32, %v9485_v55 }
 0xd7c   :  { %v1975_v21 = vpack.c.bf16 %v1967_v43, %v1967_v43 }
 0xd7e   :  { %7814 = vmatmul.mubr.msk.bf16.vlgmr.msra.gmra.mrb[60].mxu0 %vm337_vm6, %v1975_v21 }
 0xd7f   :  { %7824 = vmatpush3.bf16.msra.mxu0 %v2092_v15  ;;  %7825 = vmatprep.mubr.msk.bf16.mxu0 %vm8866_vm5, %v8865_v7 }
 0xd80   :  { %7835 = vmatprep.subr.bf16.mxu0 %v8865_v7 }
 0xd8d   :  { %2282 = vrot.lane.b32.xlu0 %v1987_v31, %s8871_s27 }
 0xd9b   :  { %v1940_v58 = vpop.xlane.xlu1 %1939 }
 0xd9c   :  { %8621 = vrcp.f32 %v1940_v58 }
 0xd9f   :  { %v2234_v18 = vpop.permute.xlu1 %2233 }
 0xda0   :  { %v2239_v6 = vsel %vm834_vm7, %v2234_v18, 0 }
 0xda6   :  { %v8622_v55 = vpop.eup %8621 }
 0xda7   :  { %v1968_v36 = vmul.f32 %v8622_v55, %v9491_v30 }
 0xda9   :  { %v1976_v61 = vpack.c.bf16 %v1968_v36, %v1968_v36 }
 0xdab   :  { %7820 = vmatmul.mubr.msk.bf16.vlgmr.msra.gmra.mrb[56].mxu1 %vm337_vm6, %v1976_v61 }
 0xdac   :  { %7830 = vmatpush3.bf16.msra.mxu1 %v2141_v8  ;;  %2565 = vadd.xlane.f32.xlu0 %v2564_v53 }
 0xdad   :  { %7831 = vmatprep.mubr.msk.bf16.mxu1 %vm8866_vm5, %v8865_v7  ;;  %7841 = vmatprep.subr.bf16.mxu1 %v8865_v7 }
 0xdc7   :  { %v1943_v29 = vpop.xlane.xlu0 %1942 }
 0xdc8   :  { %8623 = vrcp.f32 %v1943_v29 }
 0xdcb   :  { %v1946_v30 = vpop.xlane.xlu0 %1945 }
 0xdcc   :  { %8625 = vrcp.f32 %v1946_v30 }
 0xdcf   :  { %v2185_v44 = vpop.permute.xlu0 %2184 }
 0xdd0   :  { %v1949_v10 = vpop.xlane.xlu1 %1948  ;;  %v2190_v63 = vsel %vm834_vm7, %v2185_v44, 0 }
 0xdd1   :  { %8627 = vrcp.f32 %v1949_v10 }
 0xdd2   :  { %v8624_v52 = vpop.eup %8623 }
 0xdd3   :  { %v1969_v27 = vmul.f32 %v8624_v52, %v9499_v13 }
 0xdd5   :  { %v1977_v14 = vpack.c.bf16 %v1969_v27, %v1969_v27 }
 0xdd6   :  { %v8626_v17 = vpop.eup %8625 }
 0xdd7   :  { %7826 = vmatmul.mubr.msk.bf16.vlgmr.msra.gmra.mrb[64].mxu0 %vm337_vm6, %v1977_v14  ;;  %v1970_v0 = vmul.f32 %v8626_v17, %v9503_v16  ;;  %v1955_v42 = vpop.xlane.xlu1 %1954 }
 0xdd8   :  { %7836 = vmatpush3.bf16.msra.mxu0 %v2190_v63  ;;  %7837 = vmatprep.mubr.msk.bf16.mxu0 %vm8866_vm5, %v8865_v7  ;;  %8629 = vrcp.f32 %v1955_v42 }
 0xdd9   :  { %v1978_v23 = vpack.c.bf16 %v1970_v0, %v1970_v0  ;;  %7847 = vmatprep.subr.bf16.mxu0 %v8865_v7 }
 0xddb   :  { %v8628_v40 = vpop.eup %8627  ;;  %7832 = vmatmul.mubr.msk.bf16.vlgmr.msra.gmra.mrb[60].mxu1 %vm337_vm6, %v1978_v23  ;;  %v2332_v51 = vpop.permute.xlu1 %2331 }
 0xddc   :  { %7842 = vmatpush3.bf16.msra.mxu1 %v2239_v6  ;;  %v1971_v13 = vmul.f32 %v8628_v40, %v9508_v28  ;;  %7843 = vmatprep.mubr.msk.bf16.mxu1 %vm8866_vm5, %v8865_v7 }
 0xddd   :  { %7853 = vmatprep.subr.bf16.mxu1 %v8865_v7 }
 0xdde   :  { %v1979_v16 = vpack.c.bf16 %v1971_v13, %v1971_v13 }
 0xde0   :  { %7838 = vmatmul.mubr.msk.bf16.vlgmr.msra.gmra.mrb[68].mxu0 %vm337_vm6, %v1979_v16 }
 0xde1   :  { %7849 = vmatprep.mubr.msk.bf16.mxu0 %vm8866_vm5, %v8865_v7 }
 0xde2   :  { %v8630_v33 = vpop.eup %8629 }
 0xde3   :  { %v1973_v28 = vmul.f32 %v8630_v33, %v9513_v41  ;;  %v2337_v41 = vsel %vm834_vm7, %v2332_v51, 0 }
 0xde5   :  { %v1981_v48 = vpack.c.bf16 %v1973_v28, %v1973_v28 }
 0xe00   :  { %v1952_v11 = vpop.xlane.xlu0 %1951 }
 0xe01   :  { %8631 = vrcp.f32 %v1952_v11 }
 0xe04   :  { %v1958_v35 = vpop.xlane.xlu0 %1957 }
 0xe05   :  { %8633 = vrcp.f32 %v1958_v35  ;;  %v2563_v35 = vmul.f32 %v8973_v22, %v8973_v22 }
 0xe08   :  { %v2283_v3 = vpop.permute.xlu0 %2282 }
 0xe09   :  { %v2288_v37 = vsel %vm834_vm7, %v2283_v3, 0  ;;  %v2567_v3 = vsel %vm87_vm4, %v2563_v35, 0.0  ;;  %v2559_v35 = vld [vmem:[%s10854_s6 + $0x68] sm:$0xff] }
 0xe0a   :  { %7848 = vmatpush3.bf16.msra.mxu0 %v2288_v37 }
 0xe0b   :  { %v8632_v39 = vpop.eup %8631  ;;  %7859 = vmatprep.subr.bf16.mxu0 %v8865_v7 }
 0xe0c   :  { %v1972_v38 = vmul.f32 %v8632_v39, %v9523_v50 }
 0xe0d   :  { %7850 = vmatmul.mubr.msk.bf16.vlgmr.msra.gmra.mrb[72].mxu0 %vm337_vm6, %v1981_v48 }
 0xe0e   :  { %v1980_v54 = vpack.c.bf16 %v1972_v38, %v1972_v38  ;;  %7863 = vmatprep.mubr.msk.bf16.mxu0 %vm8866_vm5, %v8865_v7 }
 0xe0f   :  { %v8634_v59 = vpop.eup %8633 }
 0xe10   :  { %7844 = vmatmul.mubr.msk.bf16.vlgmr.msra.gmra.mrb[64].mxu1 %vm337_vm6, %v1980_v54  ;;  %v1974_v25 = vmul.f32 %v8634_v59, %v9527_v24  ;;  %v7281_v59 = vld [vmem:[%s10855_s7 + $0x40] sm:$0xff] }
 0xe11   :  { %7854 = vmatpush3.bf16.msra.mxu1 %v2337_v41  ;;  %7855 = vmatprep.mubr.msk.bf16.mxu1 %vm8866_vm5, %v8865_v7  ;;  %v7283_v41 = vld [vmem:[%s10855_s7 + $0x50] sm:$0xff] }
 0xe12   :  { %7867 = vmatprep.subr.bf16.mxu1 %v8865_v7  ;;  %v1982_v50 = vpack.c.bf16 %v1974_v25, %v1974_v25 }
 0xe18   :  { %7856 = vmatmul.mubr.msk.bf16.vlgmr.msra.gmra.mrb[68].mxu1 %vm337_vm6, %v1982_v50 }
 0xe19   :  { %7875 = vmatprep.mubr.msk.bf16.mxu1 %vm8866_vm5, %v8865_v7 }
 0xe51   :  { %v2031_v56 = vpop.f32.mrb[60].mxu0 }
 0xe52   :  { %v7815_v19 = vpop.f32.mrb[61].mxu0 }
 0xe53   :  { %v2034_v32 = vpop.f32.mrb[62].mxu0 }
 0xe54   :  { %v7816_v43 = vpop.f32.mrb[63].mxu0 }
 0xe7e   :  { %v2079_v21 = vpop.f32.mrb[56].mxu1 }
 0xe7f   :  { %v7821_v15 = vpop.f32.mrb[57].mxu1 }
 0xe80   :  { %v2082_v57 = vpop.f32.mrb[58].mxu1 }
 0xe81   :  { %v7822_v31 = vpop.f32.mrb[59].mxu1 }
 0xeaa   :  { %v2128_v5 = vpop.f32.mrb[64].mxu0 }
 0xeab   :  { %v2379_v58 = vadd.f32 %v2128_v5, %v2031_v56  ;;  %v7827_v55 = vpop.f32.mrb[65].mxu0 }
 0xeac   :  { %v2131_v24 = vpop.f32.mrb[66].mxu0 }
 0xead   :  { %v7828_v36 = vpop.f32.mrb[67].mxu0  ;;  %v2547_v24 = vld [vmem:[%s10854_s6 + $0x8] sm:$0xff] }
 0xeae   :  { %v2177_v34 = vpop.f32.mrb[60].mxu1  ;;  %v2551_v36 = vld [vmem:[%s10854_s6 + $0x28] sm:$0xff] }
 0xeaf   :  { %v2380_v61 = vadd.f32 %v2177_v34, %v2079_v21  ;;  %v7833_v8 = vpop.f32.mrb[61].mxu1  ;;  %v2580_v34 = vsub.s32 5, %v9014_v46 }
 0xeb0   :  { %v2180_v53 = vpop.f32.mrb[62].mxu1 }
 0xeb1   :  { %v7834_v29 = vpop.f32.mrb[63].mxu1 }
 0xeb2   :  { %v9621_v29 = vpack.c.bf16 %v2551_v36, %v2547_v24 }
 0xeb3   :  { %v2226_v30 = vpop.f32.mrb[68].mxu0 }
 0xeb4   :  { %v2381_v18 = vadd.f32 %v2379_v58, %v2226_v30  ;;  %v7839_v10 = vpop.f32.mrb[69].mxu0 }
 0xeb5   :  { %v2229_v52 = vpop.f32.mrb[70].mxu0 }
 0xeb6   :  { %v7840_v27 = vpop.f32.mrb[71].mxu0 }
 0xee0   :  { %v2324_v44 = vpop.f32.mrb[72].mxu0 }
 0xee1   :  { %v2383_v14 = vadd.f32 %v2381_v18, %v2324_v44  ;;  %v7851_v17 = vpop.f32.mrb[73].mxu0  ;;  %v9627_v18 = vld [vmem:[%s10856_s8] sm:$0xff]  ;;  %v2405_v44 = vsub.s32 3, %v9014_v46 }
 0xee2   :  { %v2327_v63 = vpop.f32.mrb[74].mxu0  ;;  %v2581_v10 = vrot.slane %v9627_v18, %v2580_v34 }
 0xee3   :  { %v9581_v0 = vadd.f32 %v2383_v14, %v9335_v49  ;;  %v2275_v23 = vpop.f32.mrb[64].mxu1  ;;  %v7852_v40 = vpop.f32.mrb[75].mxu0 }
 0xee4   :  { %v2382_v6 = vadd.f32 %v2380_v61, %v2275_v23  ;;  %v7845_v13 = vpop.f32.mrb[65].mxu1 }
 0xee5   :  { %v2278_v16 = vpop.f32.mrb[66].mxu1  ;;  %v2387_v42 = vmul.f32 %v9581_v0, %v9581_v0 }
 0xee6   :  { %v7846_v11 = vpop.f32.mrb[67].mxu1 }
 0xee7   :  { %v2389_v33 = vsel %vm87_vm4, %v2387_v42, 0.0  ;;  %v2546_v42 = vld [vmem:[%s10854_s6] sm:$0xff] }
 0xee8   :  { %2390 = vadd.xlane.f32.xlu0 %v2389_v33  ;;  %v2550_v11 = vld [vmem:[%s10854_s6 + $0x20] sm:$0xff]  ;;  %v2555_v33 = vld [vmem:[%s10854_s6 + $0x48] sm:$0xff] }
 0xeeb   :  { %v2373_v28 = vpop.f32.mrb[68].mxu1 }
 0xeec   :  { %v2384_v49 = vadd.f32 %v2382_v6, %v2373_v28  ;;  %2568 = vadd.xlane.f32.xlu0 %v2567_v3  ;;  %v7857_v37 = vpop.f32.mrb[69].mxu1  ;;  %v2406_v6 = vrot.slane %v9627_v18, %v2405_v44 }
 0xeed   :  { %v2376_v39 = vpop.f32.mrb[70].mxu1 }
 0xeee   :  { %v9590_v48 = vadd.f32 %v2384_v49, %v9338_v4  ;;  %v7858_v38 = vpop.f32.mrb[71].mxu1  ;;  %v7282_v4 = vld [vmem:[%s10855_s7 + $0x48] sm:$0xff]  ;;  %v2585_v49 = vpack.c.bf16 %v2550_v11, %v2546_v42  ;;  %v9650_v39 = vpack.c.bf16 %v2559_v35, %v2555_v33 }
 0xeef   :  { %v2474_v25 = vpack.c.bf16 %v7282_v4, %v7281_v59  ;;  %v2554_v38 = vld [vmem:[%s10854_s6 + $0x40] sm:$0xff]  ;;  %v7286_v4 = vld [vmem:[%s10855_s7 + $0x68] sm:$0xff] }
 0xef0   :  { %v2388_v51 = vmul.f32 %v9590_v48, %v9590_v48  ;;  %v7285_v59 = vld [vmem:[%s10855_s7 + $0x60] sm:$0xff] }
 0xef1   :  { %7868 = vmatpush3.bf16.msra.mxu1 %v2474_v25  ;;  %v7287_v25 = vld [vmem:[%s10855_s7 + $0x70] sm:$0xff] }
 0xef2   :  { %v2392_v54 = vsel %vm87_vm4, %v2388_v51, 0.0  ;;  %7869 = vmatprep.subr.bf16.mxu1 %v8865_v7  ;;  %v2558_v51 = vld [vmem:[%s10854_s6 + $0x60] sm:$0xff] }
 0xef3   :  { %2393 = vadd.xlane.f32.xlu1 %v2392_v54  ;;  %v2587_v54 = vpack.c.bf16 %v2558_v51, %v2554_v38 }
 0xf02   :  { %2423 = vrot.lane.b32.xlu0 %v9370_v1, %s8871_s27  ;;  %v7284_v1 = vld [vmem:[%s10855_s7 + $0x58] sm:$0xff] }
 0xf03   :  { %v2475_v50 = vpack.c.bf16 %v7284_v1, %v7283_v41  ;;  %v2476_v41 = vpack.c.bf16 %v7286_v4, %v7285_v59  ;;  %v7288_v1 = vld [vmem:[%s10855_s7 + $0x78] sm:$0xff] }
 0xf04   :  { %2421 = vrot.lane.b32.xlu1 %v9352_v12, %s8871_s27  ;;  %v2566_v12 = vpop.xlane.xlu0 %2565 }
 0xf05   :  { %7870 = vmatpush3.bf16.msra.mxu1 %v2475_v50  ;;  %v2570_v56 = vmul.f32 0.03125, %v2566_v12  ;;  %v2477_v50 = vpack.c.bf16 %v7288_v1, %v7287_v25 }
 0xf06   :  { %7871 = vmatprep.subr.bf16.mxu1 %v8865_v7 }
 0xf07   :  { %v2572_v32 = vadd.f32 1e-06, %v2570_v56 }
 0xf09   :  { %8635 = vrsqrt.f32 %v2572_v32  ;;  %7872 = vmatpush3.bf16.msra.mxu1 %v2476_v41 }
 0xf0a   :  { %7873 = vmatprep.subr.bf16.mxu1 %v8865_v7 }
 0xf0d   :  { %7874 = vmatpush3.bf16.msra.mxu1 %v2477_v50 }
 0xf0e   :  { %7885 = vmatprep.subr.bf16.mxu1 %v8865_v7 }
 0xf13   :  { %v8636_v61 = vpop.eup %8635 }
 0xf14   :  { %v2576_v30 = vmul.f32 %v8636_v61, %v8969_v20 }
 0xf16   :  { %v2582_v17 = vmul.f32 %v2581_v10, %v2576_v30 }
 0xf75   :  { %v2391_v19 = vpop.xlane.xlu0 %2390 }
 0xf76   :  { %v2395_v43 = vmul.f32 0.03125, %v2391_v19 }
 0xf78   :  { %v2397_v31 = vadd.f32 1e-06, %v2395_v43 }
 0xf79   :  { %v2569_v21 = vpop.xlane.xlu0 %2568 }
 0xf7a   :  { %v2571_v15 = vmul.f32 0.03125, %v2569_v21 }
 0xf7c   :  { %v2573_v57 = vadd.f32 1e-06, %v2571_v15 }
 0xf7d   :  { %v2424_v53 = vpop.permute.xlu0 %2423 }
 0xf7e   :  { %8637 = vrsqrt.f32 %v2573_v57 }
 0xf7f   :  { %8639 = vrsqrt.f32 %v2397_v31 }
 0xf80   :  { %v2394_v5 = vpop.xlane.xlu1 %2393 }
 0xf81   :  { %v2396_v58 = vmul.f32 0.03125, %v2394_v5 }
 0xf83   :  { %v2398_v55 = vadd.f32 1e-06, %v2396_v58 }
 0xf84   :  { %v2422_v8 = vpop.permute.xlu1 %2421 }
 0xf85   :  { %8641 = vrsqrt.f32 %v2398_v55  ;;  %7860 = vmatpush3.bf16.msra.mxu0 %v2422_v8 }
 0xf86   :  { %7861 = vmatprep.subr.bf16.mxu0 %v8865_v7 }
 0xf88   :  { %v8638_v52 = vpop.eup %8637 }
 0xf89   :  { %v2577_v27 = vmul.f32 %v8638_v52, %v8973_v22  ;;  %7862 = vmatpush3.bf16.msra.mxu0 %v2424_v53  ;;  %v8640_v14 = vpop.eup %8639 }
 0xf8a   :  { %2592 = vmatprep.subr.bf16.mxu0 %v9621_v29  ;;  %v2401_v40 = vmul.f32 %v8640_v14, %v9581_v0 }
 0xf8b   :  { %v2583_v63 = vmul.f32 %v2581_v10, %v2577_v27 }
 0xf8c   :  { %v2407_v28 = vmul.f32 %v2406_v6, %v2401_v40 }
 0xf8d   :  { %v2584_v23 = vpack.c.bf16 %v2583_v63, %v2582_v17 }
 0xf8f   :  { %v8642_v13 = vpop.eup %8641 }
 0xf90   :  { %v2402_v16 = vmul.f32 %v8642_v13, %v9590_v48 }
 0xf92   :  { %v2408_v3 = vmul.f32 %v2406_v6, %v2402_v16 }
 0xf94   :  { %v2418_v37 = vpack.c.bf16 %v2408_v3, %v2407_v28 }
 0xf96   :  { %7864 = vmatmul.mubr.msk.bf16.vlgmr.msra.gmra.mrb[76].mxu0 %vm87_vm4, %v2418_v37 }
 0xf97   :  { %2593 = vmatpush1.bf16.msra.mxu0 %v2585_v49  ;;  %2624 = vmatprep.mubr.bf16.mxu0 %v8864_v2 }
 0xf98   :  { %2594 = vmatprep.subr.bf16.mxu0 %v9650_v39 }
 0xf9b   :  { %2595 = vmatpush1.bf16.msra.mxu0 %v2587_v54 }
 0xf9c   :  { %7879 = vmatprep.subr.bf16.mxu0 %v8865_v7 }
 0xf9e   :  { %7291 = vmatmul.mubr.msk.bf16.vlgmr.msra.gmra.mrb[80].mxu0 %vm87_vm4, %v2584_v23 }
 0xf9f   :  { %7881 = vmatprep.mubr.msk.bf16.mxu0 %vm8866_vm5, %v8865_v7 }
0x1069   :  { %v2464_v12 = vpop.f32.mrb[76].mxu0 }
0x106a   :  { %v7865_v56 = vpop.f32.mrb[77].mxu0  ;;  %v2471_v32 = vmax.f32 %v2464_v12, 0.0 }
0x106b   :  { %v2467_v19 = vpop.f32.mrb[78].mxu0 }
0x106c   :  { %v2472_v43 = vmax.f32 %v2467_v19, 0.0  ;;  %v7866_v21 = vpop.f32.mrb[79].mxu0 }
0x106e   :  { %v2473_v15 = vpack.c.bf16 %v2472_v43, %v2471_v32 }
0x1070   :  { %7876 = vmatmul.mubr.msk.bf16.vlgmr.msra.gmra.mrb[72].mxu1 %vm1318_vm8, %v2473_v15 }
0x1071   :  { %v2626_v57 = vpop.f32.mrb[80].mxu0  ;;  %7887 = vmatprep.mubr.msk.bf16.mxu1 %vm8866_vm5, %v8865_v7 }
0x1072   :  { %v2628_v31 = vpop.f32.mrb[81].mxu0  ;;  %v2675_v34 = vpack.c.bf16 %v2626_v57, %v2626_v57 }
0x1073   :  { %v2630_v5 = vpop.f32.mrb[82].mxu0 }
0x1074   :  { %v2632_v58 = vpop.f32.mrb[83].mxu0  ;;  %v8415_v55 = vpack.i.bf16 %v2630_v5, %v2626_v57  ;;  %v9684_v36 = vpack.c.bf16 %v2630_v5, %v2630_v5  ;;  %v195_v57 = vsel %vm194_vm9, -1e+09, %v8865_v7 }
0x1075   :  { %v8430_v24 = vpack.i.bf16 %v2632_v58, %v2628_v31  ;;  %v196_v31 = vld [vmem:[%s10851_s3] sm:$0xff] }
0x1076   :  { %8416 = vrot.lane.b32.xlu0 %v8415_v55, %s8870_s26  ;;  %8406 = vrot.lane.b32.xlu1 %v8415_v55, %s8868_s24  ;;  %v9757_v5 = vadd.f32 %v196_v31, %v195_v57 }
0x107a   :  { %8411 = vrot.lane.b32.xlu1 %v8415_v55, %s8867_s23  ;;  %2733 = vrot.lane.b32.xlu0 %v9684_v36, %s8869_s25 }
0x107e   :  { %2684 = vrot.lane.b32.xlu1 %v2675_v34, %s8869_s25 }
0x10e8   :  { %v8417_v61 = vpop.permute.xlu0 %8416  ;;  %v8407_v8 = vpop.permute.xlu1 %8406 }
0x10e9   :  { %v8409_v53 = vunpack.i.h.bf16 %v8407_v8  ;;  %v8408_v30 = vunpack.i.l.bf16 %v8407_v8  ;;  %v8419_v40 = vunpack.i.h.bf16 %v8417_v61  ;;  %v8418_v6 = vunpack.i.l.bf16 %v8417_v61 }
0x10eb   :  { %v2678_v10 = vpack.c.bf16 %v8409_v53, %v8409_v53  ;;  %v2677_v52 = vpack.c.bf16 %v8408_v30, %v8408_v30  ;;  %v2682_v33 = vpack.c.bf16 %v8419_v40, %v8419_v40  ;;  %v2681_v35 = vpack.c.bf16 %v8418_v6, %v8418_v6 }
0x10ec   :  { %v8412_v27 = vpop.permute.xlu1 %8411  ;;  %v2734_v14 = vpop.permute.xlu0 %2733 }
0x10ed   :  { %v8414_v17 = vunpack.i.h.bf16 %v8412_v27  ;;  %v8413_v63 = vunpack.i.l.bf16 %v8412_v27  ;;  %v2739_v23 = vsel %vm337_vm6, %v2734_v14, 0  ;;  %2782 = vrot.lane.b32.xlu1 %v2677_v52, %s8869_s25  ;;  %2831 = vrot.lane.b32.xlu0 %v2678_v10, %s8869_s25 }
0x10ee   :  { %7886 = vmatpush3.bf16.xpose.msra.mxu1 %v2739_v23 }
0x10ef   :  { %v2680_v13 = vpack.c.bf16 %v8414_v17, %v8414_v17  ;;  %v2679_v16 = vpack.c.bf16 %v8413_v63, %v8413_v63  ;;  %7897 = vmatprep.subr.bf16.mxu1 %v8865_v7  ;;  %v197_v17 = vld [vmem:[%s10851_s3 + $0x8] sm:$0xff] }
0x10f0   :  { %v2685_v42 = vpop.permute.xlu1 %2684  ;;  %v9769_v63 = vadd.f32 %v197_v17, %v195_v57 }
0x10f1   :  { %v2690_v11 = vsel %vm337_vm6, %v2685_v42, 0  ;;  %2880 = vrot.lane.b32.xlu1 %v2679_v16, %s8869_s25  ;;  %2929 = vrot.lane.b32.xlu0 %v2680_v13, %s8869_s25 }
0x10f2   :  { %7880 = vmatpush3.bf16.xpose.msra.mxu0 %v2690_v11 }
0x10f3   :  { %7891 = vmatprep.subr.bf16.mxu0 %v8865_v7 }
0x10f5   :  { %2978 = vrot.lane.b32.xlu1 %v2681_v35, %s8869_s25  ;;  %3027 = vrot.lane.b32.xlu0 %v2682_v33, %s8869_s25 }
0x10f6   :  { %7888 = vmatmul.mubr.msk.bf16.vlgmr.msra.gmra.mrb[76].mxu1 %vm337_vm6, %v9684_v36 }
0x10f7   :  { %7899 = vmatprep.mubr.msk.bf16.mxu1 %vm8866_vm5, %v8865_v7 }
0x10f9   :  { %7882 = vmatmul.mubr.msk.bf16.vlgmr.msra.gmra.mrb[84].mxu0 %vm337_vm6, %v2675_v34  ;;  %8421 = vrot.lane.b32.xlu0 %v8415_v55, %s8869_s25 }
0x10fa   :  { %8426 = vrot.lane.b32.xlu1 %v8430_v24, %s8871_s27  ;;  %7893 = vmatprep.mubr.msk.bf16.mxu0 %vm8866_vm5, %v8865_v7 }
0x10fe   :  { %8431 = vrot.lane.b32.xlu1 %v8430_v24, %s8872_s28 }
0x1102   :  { %3177 = vrot.lane.b32.xlu1 %v2675_v34, %s8871_s27 }
0x1143   :  { %v9711_v28 = vpop.f32.mrb[72].mxu1 }
0x1144   :  { %v7877_v3 = vpop.f32.mrb[73].mxu1 }
0x1145   :  { %v9713_v49 = vpop.f32.mrb[74].mxu1 }
0x1146   :  { %v7878_v37 = vpop.f32.mrb[75].mxu1 }
0x115f   :  { %v2783_v38 = vpop.permute.xlu1 %2782  ;;  %v2832_v51 = vpop.permute.xlu0 %2831 }
0x1160   :  { %v2788_v54 = vsel %vm337_vm6, %v2783_v38, 0  ;;  %v2837_v59 = vsel %vm337_vm6, %v2832_v51, 0 }
0x1161   :  { %7892 = vmatpush3.bf16.xpose.msra.mxu0 %v2788_v54  ;;  %7898 = vmatpush3.bf16.xpose.msra.mxu1 %v2837_v59 }
0x1162   :  { %7903 = vmatprep.subr.bf16.mxu0 %v8865_v7  ;;  %7909 = vmatprep.subr.bf16.mxu1 %v8865_v7 }
0x1163   :  { %v2881_v4 = vpop.permute.xlu1 %2880  ;;  %v2930_v41 = vpop.permute.xlu0 %2929 }
0x1164   :  { %v2886_v1 = vsel %vm337_vm6, %v2881_v4, 0  ;;  %v2935_v50 = vsel %vm337_vm6, %v2930_v41, 0 }
0x1167   :  { %v2979_v25 = vpop.permute.xlu1 %2978  ;;  %v3028_v56 = vpop.permute.xlu0 %3027 }
0x1168   :  { %7894 = vmatmul.mubr.msk.bf16.vlgmr.msra.gmra.mrb[88].mxu0 %vm337_vm6, %v2677_v52  ;;  %7900 = vmatmul.mubr.msk.bf16.vlgmr.msra.gmra.mrb[80].mxu1 %vm337_vm6, %v2678_v10  ;;  %v2984_v19 = vsel %vm337_vm6, %v2979_v25, 0  ;;  %v3033_v32 = vsel %vm337_vm6, %v3028_v56, 0 }
0x1169   :  { %7904 = vmatpush3.bf16.xpose.msra.mxu0 %v2886_v1  ;;  %7910 = vmatpush3.bf16.xpose.msra.mxu1 %v2935_v50 }
0x116a   :  { %7905 = vmatprep.mubr.msk.bf16.mxu0 %vm8866_vm5, %v8865_v7  ;;  %7911 = vmatprep.mubr.msk.bf16.mxu1 %vm8866_vm5, %v8865_v7 }
0x116b   :  { %7915 = vmatprep.subr.bf16.mxu0 %v8865_v7  ;;  %7921 = vmatprep.subr.bf16.mxu1 %v8865_v7 }
0x116c   :  { %v9729_v12 = vpop.permute.xlu1 %8426 }
0x1170   :  { %v9733_v43 = vpop.permute.xlu1 %8431  ;;  %7906 = vmatmul.mubr.msk.bf16.vlgmr.msra.gmra.mrb[92].mxu0 %vm337_vm6, %v2679_v16  ;;  %7912 = vmatmul.mubr.msk.bf16.vlgmr.msra.gmra.mrb[84].mxu1 %vm337_vm6, %v2680_v13 }
0x1171   :  { %7916 = vmatpush3.bf16.xpose.msra.mxu0 %v2984_v19  ;;  %7922 = vmatpush3.bf16.xpose.msra.mxu1 %v3033_v32  ;;  %v199_v32 = vld [vmem:[%s10851_s3 + $0x18] sm:$0xff] }
0x1172   :  { %7917 = vmatprep.mubr.msk.bf16.mxu0 %vm8866_vm5, %v8865_v7  ;;  %7923 = vmatprep.mubr.msk.bf16.mxu1 %vm8866_vm5, %v8865_v7 }
0x1173   :  { %7927 = vmatprep.subr.bf16.mxu0 %v8865_v7  ;;  %7933 = vmatprep.subr.bf16.mxu1 %v8865_v7 }
0x1174   :  { %v3178_v21 = vpop.permute.xlu1 %3177 }
0x1175   :  { %v3183_v15 = vsel %vm834_vm7, %v3178_v21, 0 }
0x1178   :  { %7918 = vmatmul.mubr.msk.bf16.vlgmr.msra.gmra.mrb[96].mxu0 %vm337_vm6, %v2681_v35  ;;  %7924 = vmatmul.mubr.msk.bf16.vlgmr.msra.gmra.mrb[88].mxu1 %vm337_vm6, %v2682_v33  ;;  %v198_v35 = vld [vmem:[%s10851_s3 + $0x10] sm:$0xff] }
0x1179   :  { %7928 = vmatpush3.bf16.msra.mxu0 %v3183_v15  ;;  %7929 = vmatprep.mubr.msk.bf16.mxu0 %vm8866_vm5, %v8865_v7  ;;  %v9784_v54 = vadd.f32 %v198_v35, %v195_v57 }
0x117a   :  { %7939 = vmatprep.subr.bf16.mxu0 %v8865_v7  ;;  %7935 = vmatprep.mubr.msk.bf16.mxu1 %vm8866_vm5, %v8865_v7 }
0x11c9   :  { %v2775_v58 = vpop.f32.mrb[76].mxu1 }
0x11ca   :  { %v9760_v55 = vadd.f32 %v2775_v58, %v9757_v5  ;;  %v7889_v24 = vpop.f32.mrb[77].mxu1 }
0x11cb   :  { %v2778_v34 = vpop.f32.mrb[78].mxu1  ;;  %v9799_v24 = vadd.f32 %v199_v32, %v195_v57 }
0x11cc   :  { %v7890_v61 = vpop.f32.mrb[79].mxu1  ;;  %v2726_v8 = vpop.f32.mrb[84].mxu0  ;;  %v3078_v53 = vsel %vm337_vm6, %v9760_v55, -inf }
0x11cd   :  { %v2727_v30 = vadd.f32 %v2726_v8, %v9757_v5  ;;  %3079 = vmax.xlane.f32.xlu0 %v3078_v53  ;;  %v7883_v10 = vpop.f32.mrb[85].mxu0 }
0x11ce   :  { %v2729_v52 = vpop.f32.mrb[86].mxu0 }
0x11cf   :  { %v7884_v27 = vpop.f32.mrb[87].mxu0  ;;  %v3075_v14 = vsel %vm337_vm6, %v2727_v30, -inf }
0x11d0   :  { %3076 = vmax.xlane.f32.xlu1 %v3075_v14 }
0x123b   :  { %v2824_v23 = vpop.f32.mrb[88].mxu0  ;;  %v2873_v40 = vpop.f32.mrb[80].mxu1 }
0x123c   :  { %v9772_v6 = vadd.f32 %v2824_v23, %v9769_v63  ;;  %v9775_v13 = vadd.f32 %v2873_v40, %v9769_v63  ;;  %v7895_v16 = vpop.f32.mrb[89].mxu0  ;;  %v7901_v42 = vpop.f32.mrb[81].mxu1 }
0x123d   :  { %v2827_v11 = vpop.f32.mrb[90].mxu0  ;;  %v2876_v33 = vpop.f32.mrb[82].mxu1 }
0x123e   :  { %v7896_v3 = vpop.f32.mrb[91].mxu0  ;;  %v7902_v37 = vpop.f32.mrb[83].mxu1  ;;  %v3081_v38 = vsel %vm337_vm6, %v9772_v6, -inf  ;;  %v3084_v51 = vsel %vm337_vm6, %v9775_v13, -inf }
0x123f   :  { %3082 = vmax.xlane.f32.xlu0 %v3081_v38  ;;  %3085 = vmax.xlane.f32.xlu1 %v3084_v51  ;;  %v8422_v40 = vpop.permute.xlu0 %8421 }
0x1240   :  { %v8423_v16 = vunpack.i.l.bf16 %v8422_v40  ;;  %v8424_v51 = vunpack.i.h.bf16 %v8422_v40 }
0x1242   :  { %v3171_v42 = vpack.c.bf16 %v8423_v16, %v8423_v16 }
0x1243   :  { %v2922_v59 = vpop.f32.mrb[92].mxu0  ;;  %v2971_v4 = vpop.f32.mrb[84].mxu1 }
0x1244   :  { %v9787_v41 = vadd.f32 %v2922_v59, %v9784_v54  ;;  %v9790_v25 = vadd.f32 %v2971_v4, %v9784_v54  ;;  %v7907_v1 = vpop.f32.mrb[93].mxu0  ;;  %v7913_v50 = vpop.f32.mrb[85].mxu1  ;;  %v3172_v59 = vpack.c.bf16 %v8424_v51, %v8424_v51 }
0x1245   :  { %v2925_v56 = vpop.f32.mrb[94].mxu0  ;;  %v2974_v19 = vpop.f32.mrb[86].mxu1 }
0x1246   :  { %v7908_v21 = vpop.f32.mrb[95].mxu0  ;;  %v7914_v15 = vpop.f32.mrb[87].mxu1  ;;  %v3087_v31 = vsel %vm337_vm6, %v9787_v41, -inf  ;;  %v3090_v58 = vsel %vm337_vm6, %v9790_v25, -inf  ;;  %v8429_v56 = vunpack.i.h.bf16 %v9729_v12 }
0x1247   :  { %3088 = vmax.xlane.f32.xlu0 %v3087_v31  ;;  %3091 = vmax.xlane.f32.xlu1 %v3090_v58 }
0x1248   :  { %v3174_v19 = vpack.c.bf16 %v8429_v56, %v8429_v56 }
0x124b   :  { %v3020_v34 = vpop.f32.mrb[96].mxu0  ;;  %v3069_v61 = vpop.f32.mrb[88].mxu1 }
0x124c   :  { %v3021_v8 = vadd.f32 %v3020_v34, %v9799_v24  ;;  %v7919_v53 = vpop.f32.mrb[97].mxu0  ;;  %v7925_v10 = vpop.f32.mrb[89].mxu1  ;;  %v9807_v35 = vadd.f32 %v3069_v61, %v9799_v24 }
0x124d   :  { %v3023_v52 = vpop.f32.mrb[98].mxu0  ;;  %v3072_v27 = vpop.f32.mrb[90].mxu1 }
0x124e   :  { %v7920_v14 = vpop.f32.mrb[99].mxu0  ;;  %v7926_v17 = vpop.f32.mrb[91].mxu1  ;;  %v3093_v23 = vsel %vm337_vm6, %v3021_v8, -inf  ;;  %v3096_v3 = vsel %vm337_vm6, %v9807_v35, -inf }
0x124f   :  { %3094 = vmax.xlane.f32.xlu0 %v3093_v23 }
0x1258   :  { %3274 = vrot.lane.b32.xlu1 %v3171_v42, %s8871_s27 }
0x125d   :  { %v3077_v57 = vpop.xlane.xlu1 %3076 }
0x125e   :  { %v3099_v11 = vsub.f32 %v2727_v30, %v3077_v57  ;;  %v8428_v57 = vunpack.i.l.bf16 %v9729_v12 }
0x1260   :  { %v3107_v33 = vmul.f32 1.442695, %v3099_v11  ;;  %v3173_v11 = vpack.c.bf16 %v8428_v57, %v8428_v57 }
0x1262   :  { %8643 = vpow2.f32 %v3107_v33  ;;  %v8434_v33 = vunpack.i.h.bf16 %v9733_v43 }
0x1265   :  { %3225 = vrot.lane.b32.xlu0 %v9684_v36, %s8871_s27  ;;  %v3080_v36 = vpop.xlane.xlu0 %3079 }
0x1266   :  { %v3100_v30 = vsub.f32 %v9760_v55, %v3080_v36 }
0x1268   :  { %v3109_v4 = vmul.f32 1.442695, %v3100_v30 }
0x126a   :  { %8645 = vpow2.f32 %v3109_v4 }
0x126c   :  { %v9811_v37 = vpop.eup %8643 }
0x126d   :  { %v3123_v38 = vsel %vm337_vm6, %v9811_v37, 0.0 }
0x1274   :  { %v9817_v1 = vpop.eup %8645 }
0x1275   :  { %v3126_v50 = vsel %vm337_vm6, %v9817_v1, 0.0 }
0x127c   :  { %3097 = vmax.xlane.f32.xlu1 %v3096_v3  ;;  %v3176_v3 = vpack.c.bf16 %v8434_v33, %v8434_v33 }
0x1284   :  { %3124 = vadd.xlane.f32.xlu0 %v3123_v38 }
0x128d   :  { %3323 = vrot.lane.b32.xlu1 %v3172_v59, %s8871_s27 }
0x12b1   :  { %3127 = vadd.xlane.f32.xlu1 %v3126_v50 }
0x12c2   :  { %3421 = vrot.lane.b32.xlu1 %v3174_v19, %s8871_s27 }
0x12cc   :  { %v3083_v32 = vpop.xlane.xlu0 %3082  ;;  %v3086_v21 = vpop.xlane.xlu1 %3085 }
0x12cd   :  { %v3101_v15 = vsub.f32 %v9772_v6, %v3083_v32  ;;  %v3102_v31 = vsub.f32 %v9775_v13, %v3086_v21 }
0x12cf   :  { %v3111_v55 = vmul.f32 1.442695, %v3101_v15  ;;  %v3113_v58 = vmul.f32 1.442695, %v3102_v31 }
0x12d1   :  { %8647 = vpow2.f32 %v3111_v55 }
0x12d2   :  { %8649 = vpow2.f32 %v3113_v58 }
0x12d4   :  { %v3089_v34 = vpop.xlane.xlu0 %3088  ;;  %v3092_v38 = vpop.xlane.xlu1 %3091 }
0x12d5   :  { %v3103_v61 = vsub.f32 %v9787_v41, %v3089_v34  ;;  %v3104_v51 = vsub.f32 %v9790_v25, %v3092_v38  ;;  %v9858_v25 = vadd.f32 %v9713_v49, %v9590_v48  ;;  %v8433_v48 = vunpack.i.l.bf16 %v9733_v43 }
0x12d7   :  { %v3115_v53 = vmul.f32 1.442695, %v3103_v61  ;;  %v3117_v59 = vmul.f32 1.442695, %v3104_v51  ;;  %v2525_v15 = vmul.f32 %v9858_v25, %v9858_v25  ;;  %v3175_v49 = vpack.c.bf16 %v8433_v48, %v8433_v48  ;;  %v2560_v61 = vld [vmem:[%s10854_s6 + $0x70] sm:$0xff] }
0x12d8   :  { %v3275_v36 = vpop.permute.xlu1 %3274 }
0x12d9   :  { %8651 = vpow2.f32 %v3115_v53  ;;  %v3280_v58 = vsel %vm834_vm7, %v3275_v36, 0  ;;  %v2529_v34 = vsel %vm87_vm4, %v2525_v15, 0.0 }
0x12db   :  { %v9826_v10 = vpop.eup %8647 }
0x12dc   :  { %v3095_v52 = vpop.xlane.xlu0 %3094  ;;  %v3129_v27 = vsel %vm337_vm6, %v9826_v10, 0.0  ;;  %v9830_v14 = vpop.eup %8649 }
0x12dd   :  { %v3105_v6 = vsub.f32 %v3021_v8, %v3095_v52  ;;  %3130 = vadd.xlane.f32.xlu0 %v3129_v27  ;;  %v3132_v23 = vsel %vm337_vm6, %v9830_v14, 0.0  ;;  %v9888_v27 = vadd.f32 %v9711_v28, %v9581_v0  ;;  %v2548_v0 = vld [vmem:[%s10854_s6 + $0x10] sm:$0xff] }
0x12df   :  { %v3119_v13 = vmul.f32 1.442695, %v3105_v6 }
0x12e0   :  { %v3226_v17 = vpop.permute.xlu0 %3225 }
0x12e1   :  { %8653 = vpow2.f32 %v3119_v13  ;;  %v3231_v41 = vsel %vm834_vm7, %v3226_v17, 0  ;;  %3133 = vadd.xlane.f32.xlu0 %v3132_v23  ;;  %v2524_v13 = vmul.f32 %v9888_v27, %v9888_v27 }
0x12e2   :  { %7934 = vmatpush3.bf16.msra.mxu1 %v3231_v41  ;;  %8655 = vpow2.f32 %v3117_v59 }
0x12e3   :  { %v9835_v40 = vpop.eup %8651  ;;  %7945 = vmatprep.subr.bf16.mxu1 %v8865_v7 }
0x12e4   :  { %v3135_v16 = vsel %vm337_vm6, %v9835_v40, 0.0 }
0x12e6   :  { %3136 = vadd.xlane.f32.xlu1 %v3135_v16  ;;  %v2526_v16 = vsel %vm87_vm4, %v2524_v13, 0.0 }
0x12eb   :  { %v9840_v8 = vpop.eup %8653 }
0x12ec   :  { %v3141_v42 = vsel %vm337_vm6, %v9840_v8, 0.0  ;;  %v9850_v56 = vpop.eup %8655 }
0x12ed   :  { %3142 = vadd.xlane.f32.xlu1 %v3141_v42  ;;  %v3138_v19 = vsel %vm337_vm6, %v9850_v56, 0.0 }
0x12f7   :  { %3372 = vrot.lane.b32.xlu0 %v3173_v11, %s8871_s27 }
0x12fe   :  { %3519 = vrot.lane.b32.xlu1 %v3176_v3, %s8871_s27 }
0x1309   :  { %v3098_v30 = vpop.xlane.xlu1 %3097 }
0x130a   :  { %v3106_v4 = vsub.f32 %v9807_v35, %v3098_v30 }
0x130c   :  { %v3121_v50 = vmul.f32 1.442695, %v3106_v4 }
0x130d   :  { %v3324_v52 = vpop.permute.xlu1 %3323 }
0x130e   :  { %8657 = vpow2.f32 %v3121_v50  ;;  %v3329_v41 = vsel %vm834_vm7, %v3324_v52, 0 }
0x1311   :  { %v3125_v12 = vpop.xlane.xlu0 %3124 }
0x1312   :  { %8659 = vrcp.f32 %v3125_v12 }
0x1316   :  { %3139 = vadd.xlane.f32.xlu0 %v3138_v19 }
0x1318   :  { %v9854_v32 = vpop.eup %8657 }
0x1319   :  { %v3144_v21 = vsel %vm337_vm6, %v9854_v32, 0.0 }
0x131a   :  { %3145 = vadd.xlane.f32.xlu0 %v3144_v21 }
0x131c   :  { %v8660_v35 = vpop.eup %8659 }
0x131d   :  { %v3155_v31 = vmul.f32 %v8660_v35, %v9811_v37  ;;  %v2556_v37 = vld [vmem:[%s10854_s6 + $0x50] sm:$0xff] }
0x131e   :  { %v3652_v53 = vpack.c.bf16 %v2560_v61, %v2556_v37 }
0x131f   :  { %v3163_v55 = vpack.c.bf16 %v3155_v31, %v3155_v31 }
0x1321   :  { %7930 = vmatmul.mubr.msk.bf16.vlgmr.msra.gmra.mrb[100].mxu0 %vm337_vm6, %v3163_v55 }
0x1322   :  { %7940 = vmatpush3.bf16.msra.mxu0 %v3280_v58  ;;  %2530 = vadd.xlane.f32.xlu1 %v2529_v34 }
0x1323   :  { %7941 = vmatprep.mubr.msk.bf16.mxu0 %vm8866_vm5, %v8865_v7  ;;  %7951 = vmatprep.subr.bf16.mxu0 %v8865_v7 }
0x1330   :  { %3470 = vrot.lane.b32.xlu0 %v3175_v49, %s8871_s27 }
0x1333   :  { %3655 = vrot.lane.b32.xlu1 %v9621_v29, %s8872_s28 }
0x1337   :  { %3659 = vrot.lane.b32.xlu1 %v9650_v39, %s8872_s28 }
0x133b   :  { %3661 = vrot.lane.b32.xlu1 %v3652_v53, %s8872_s28 }
0x133e   :  { %v3128_v43 = vpop.xlane.xlu1 %3127 }
0x133f   :  { %8661 = vrcp.f32 %v3128_v43  ;;  %3602 = vrot.lane.b32.xlu1 %v9650_v39, %s8871_s27  ;;  %v2552_v39 = vld [vmem:[%s10854_s6 + $0x30] sm:$0xff] }
0x1340   :  { %v3651_v28 = vpack.c.bf16 %v2552_v39, %v2548_v0 }
0x1342   :  { %v3422_v57 = vpop.permute.xlu1 %3421 }
0x1343   :  { %v3427_v12 = vsel %vm834_vm7, %v3422_v57, 0 }
0x1349   :  { %v8662_v6 = vpop.eup %8661 }
0x134a   :  { %v3156_v17 = vmul.f32 %v8662_v6, %v9817_v1 }
0x134c   :  { %v3164_v23 = vpack.c.bf16 %v3156_v17, %v3156_v17 }
0x134e   :  { %7936 = vmatmul.mubr.msk.bf16.vlgmr.msra.gmra.mrb[92].mxu1 %vm337_vm6, %v3164_v23 }
0x134f   :  { %7946 = vmatpush3.bf16.msra.mxu1 %v3329_v41  ;;  %2527 = vadd.xlane.f32.xlu0 %v2526_v16 }
0x1350   :  { %7947 = vmatprep.mubr.msk.bf16.mxu1 %vm8866_vm5, %v8865_v7  ;;  %7957 = vmatprep.subr.bf16.mxu1 %v8865_v7 }
0x1365   :  { %3657 = vrot.lane.b32.xlu0 %v3651_v28, %s8872_s28 }
0x136a   :  { %v3131_v1 = vpop.xlane.xlu0 %3130 }
0x136b   :  { %8663 = vrcp.f32 %v3131_v1  ;;  %v2542_v1 = vsub.s32 4, %v9014_v46 }
0x136e   :  { %v3134_v42 = vpop.xlane.xlu0 %3133 }
0x136f   :  { %8665 = vrcp.f32 %v3134_v42 }
0x1372   :  { %v3373_v38 = vpop.permute.xlu0 %3372 }
0x1373   :  { %v3137_v11 = vpop.xlane.xlu1 %3136  ;;  %v3378_v36 = vsel %vm834_vm7, %v3373_v38, 0 }
0x1374   :  { %8667 = vrcp.f32 %v3137_v11  ;;  %v2543_v11 = vrot.slane %v9627_v18, %v2542_v1 }
0x1375   :  { %v8664_v33 = vpop.eup %8663 }
0x1376   :  { %v3157_v3 = vmul.f32 %v8664_v33, %v9826_v10 }
0x1378   :  { %v3165_v51 = vpack.c.bf16 %v3157_v3, %v3157_v3 }
0x1379   :  { %v8666_v59 = vpop.eup %8665 }
0x137a   :  { %7942 = vmatmul.mubr.msk.bf16.vlgmr.msra.gmra.mrb[104].mxu0 %vm337_vm6, %v3165_v51  ;;  %v3158_v30 = vmul.f32 %v8666_v59, %v9830_v14  ;;  %v3143_v19 = vpop.xlane.xlu1 %3142 }
0x137b   :  { %7952 = vmatpush3.bf16.msra.mxu0 %v3378_v36  ;;  %7953 = vmatprep.mubr.msk.bf16.mxu0 %vm8866_vm5, %v8865_v7  ;;  %8669 = vrcp.f32 %v3143_v19 }
0x137c   :  { %v3166_v4 = vpack.c.bf16 %v3158_v30, %v3158_v30  ;;  %7963 = vmatprep.subr.bf16.mxu0 %v8865_v7 }
0x137e   :  { %v8668_v50 = vpop.eup %8667  ;;  %7948 = vmatmul.mubr.msk.bf16.vlgmr.msra.gmra.mrb[96].mxu1 %vm337_vm6, %v3166_v4  ;;  %v3520_v49 = vpop.permute.xlu1 %3519 }
0x137f   :  { %7958 = vmatpush3.bf16.msra.mxu1 %v3427_v12  ;;  %v3159_v10 = vmul.f32 %v8668_v50, %v9835_v40  ;;  %7959 = vmatprep.mubr.msk.bf16.mxu1 %vm8866_vm5, %v8865_v7 }
0x1380   :  { %7969 = vmatprep.subr.bf16.mxu1 %v8865_v7 }
0x1381   :  { %v3167_v14 = vpack.c.bf16 %v3159_v10, %v3159_v10 }
0x1383   :  { %7954 = vmatmul.mubr.msk.bf16.vlgmr.msra.gmra.mrb[108].mxu0 %vm337_vm6, %v3167_v14 }
0x1384   :  { %7965 = vmatprep.mubr.msk.bf16.mxu0 %vm8866_vm5, %v8865_v7 }
0x1385   :  { %v8670_v35 = vpop.eup %8669 }
0x1386   :  { %v3161_v40 = vmul.f32 %v8670_v35, %v9840_v8  ;;  %v3525_v8 = vsel %vm834_vm7, %v3520_v49, 0 }
0x1388   :  { %v3169_v34 = vpack.c.bf16 %v3161_v40, %v3161_v40 }
0x13a3   :  { %v3140_v21 = vpop.xlane.xlu0 %3139 }
0x13a4   :  { %8671 = vrcp.f32 %v3140_v21 }
0x13a7   :  { %v3146_v15 = vpop.xlane.xlu0 %3145 }
0x13a8   :  { %8673 = vrcp.f32 %v3146_v15 }
0x13ab   :  { %v3471_v31 = vpop.permute.xlu0 %3470 }
0x13ac   :  { %v3476_v55 = vsel %vm834_vm7, %v3471_v31, 0 }
0x13ad   :  { %7964 = vmatpush3.bf16.msra.mxu0 %v3476_v55 }
0x13ae   :  { %v8672_v58 = vpop.eup %8671  ;;  %7975 = vmatprep.subr.bf16.mxu0 %v8865_v7 }
0x13af   :  { %v3160_v48 = vmul.f32 %v8672_v58, %v9850_v56  ;;  %v2531_v56 = vpop.xlane.xlu1 %2530 }
0x13b0   :  { %7966 = vmatmul.mubr.msk.bf16.vlgmr.msra.gmra.mrb[112].mxu0 %vm337_vm6, %v3169_v34  ;;  %v2533_v6 = vmul.f32 0.03125, %v2531_v56 }
0x13b1   :  { %v3168_v37 = vpack.c.bf16 %v3160_v48, %v3160_v48  ;;  %7979 = vmatprep.mubr.msk.bf16.mxu0 %vm8866_vm5, %v8865_v7 }
0x13b2   :  { %v8674_v61 = vpop.eup %8673  ;;  %v2535_v13 = vadd.f32 1e-06, %v2533_v6 }
0x13b3   :  { %7960 = vmatmul.mubr.msk.bf16.vlgmr.msra.gmra.mrb[100].mxu1 %vm337_vm6, %v3168_v37  ;;  %v3162_v53 = vmul.f32 %v8674_v61, %v9854_v32  ;;  %v3656_v43 = vpop.permute.xlu1 %3655 }
0x13b4   :  { %7970 = vmatpush3.bf16.msra.mxu1 %v3525_v8  ;;  %7971 = vmatprep.mubr.msk.bf16.mxu1 %vm8866_vm5, %v8865_v7  ;;  %8675 = vrsqrt.f32 %v2535_v13 }
0x13b5   :  { %v3170_v52 = vpack.c.bf16 %v3162_v53, %v3162_v53 }
0x13b7   :  { %v3660_v17 = vpop.permute.xlu1 %3659 }
0x13bb   :  { %7972 = vmatmul.mubr.msk.bf16.vlgmr.msra.gmra.mrb[104].mxu1 %vm337_vm6, %v3170_v52  ;;  %v3662_v39 = vpop.permute.xlu1 %3661 }
0x13bc   :  { %3705 = vmatprep.mubr.bf16.mxu1 %v8864_v2  ;;  %v3665_v28 = vsel %vm87_vm4, %v3660_v17, %v3662_v39 }
0x13be   :  { %v8676_v42 = vpop.eup %8675 }
0x13bf   :  { %v2539_v57 = vmul.f32 %v8676_v42, %v9858_v25 }
0x13c1   :  { %v2545_v51 = vmul.f32 %v2543_v11, %v2539_v57 }
0x13dc   :  { %v2528_v23 = vpop.xlane.xlu0 %2527 }
0x13dd   :  { %v2532_v41 = vmul.f32 0.03125, %v2528_v23 }
0x13df   :  { %v2534_v16 = vadd.f32 1e-06, %v2532_v41 }
0x13e0   :  { %v3658_v0 = vpop.permute.xlu0 %3657 }
0x13e1   :  { %8677 = vrsqrt.f32 %v2534_v16  ;;  %3673 = vmatprep.subr.bf16.mxu1 %v3658_v0  ;;  %v3664_v32 = vsel %vm87_vm4, %v3656_v43, %v3658_v0 }
0x13e2   :  { %3674 = vmatpush1.bf16.msra.mxu1 %v3664_v32 }
0x13e3   :  { %3675 = vmatprep.subr.bf16.mxu1 %v3662_v39 }
0x13e6   :  { %3676 = vmatpush1.bf16.msra.mxu1 %v3665_v28 }
0x13e7   :  { %7989 = vmatprep.subr.bf16.mxu1 %v8865_v7 }
0x13eb   :  { %v8678_v33 = vpop.eup %8677 }
0x13ec   :  { %v2538_v3 = vmul.f32 %v8678_v33, %v9888_v27 }
0x13ee   :  { %v2544_v38 = vmul.f32 %v2543_v11, %v2538_v3 }
0x13f0   :  { %v9943_v59 = vpack.c.bf16 %v2545_v51, %v2544_v38 }
0x13f2   :  { %7309 = vmatmul.mubr.msk.bf16.vlgmr.msra.gmra.mrb[108].mxu1 %vm87_vm4, %v9943_v59 }
0x13f3   :  { %7991 = vmatprep.mubr.msk.bf16.mxu1 %vm8866_vm5, %v8865_v7 }
0x13f4   :  { %v3219_v36 = vpop.f32.mrb[100].mxu0 }
0x13f5   :  { %v7931_v30 = vpop.f32.mrb[101].mxu0 }
0x13f6   :  { %v3222_v4 = vpop.f32.mrb[102].mxu0 }
0x13f7   :  { %v7932_v50 = vpop.f32.mrb[103].mxu0 }
0x1421   :  { %v3267_v25 = vpop.f32.mrb[92].mxu1 }
0x1422   :  { %v7937_v12 = vpop.f32.mrb[93].mxu1 }
0x1423   :  { %v3270_v10 = vpop.f32.mrb[94].mxu1 }
0x1424   :  { %v7938_v14 = vpop.f32.mrb[95].mxu1 }
0x144d   :  { %v3316_v19 = vpop.f32.mrb[104].mxu0 }
0x144e   :  { %v3567_v27 = vadd.f32 %v3316_v19, %v3219_v36  ;;  %v7943_v21 = vpop.f32.mrb[105].mxu0 }
0x144f   :  { %v3319_v35 = vpop.f32.mrb[106].mxu0 }
0x1450   :  { %v7944_v15 = vpop.f32.mrb[107].mxu0 }
0x1451   :  { %v3365_v40 = vpop.f32.mrb[96].mxu1  ;;  %v3603_v15 = vpop.permute.xlu1 %3602 }
0x1452   :  { %v3568_v31 = vadd.f32 %v3365_v40, %v3267_v25  ;;  %v7949_v55 = vpop.f32.mrb[97].mxu1  ;;  %v3593_v40 = vsub.s32 6, %v9014_v46 }
0x1453   :  { %v3368_v58 = vpop.f32.mrb[98].mxu1 }
0x1454   :  { %v7950_v34 = vpop.f32.mrb[99].mxu1  ;;  %v3594_v58 = vrot.slane %v9627_v18, %v3593_v40 }
0x1456   :  { %v3414_v48 = vpop.f32.mrb[108].mxu0 }
0x1457   :  { %v3569_v49 = vadd.f32 %v3567_v27, %v3414_v48  ;;  %v7955_v37 = vpop.f32.mrb[109].mxu0 }
0x1458   :  { %v3417_v61 = vpop.f32.mrb[110].mxu0 }
0x1459   :  { %v7956_v8 = vpop.f32.mrb[111].mxu0 }
0x1483   :  { %v3512_v53 = vpop.f32.mrb[112].mxu0 }
0x1484   :  { %v3571_v52 = vadd.f32 %v3569_v49, %v3512_v53  ;;  %v7967_v56 = vpop.f32.mrb[113].mxu0 }
0x1485   :  { %v3515_v43 = vpop.f32.mrb[114].mxu0 }
0x1486   :  { %v9950_v6 = vadd.f32 %v8969_v20, %v3571_v52  ;;  %v3463_v13 = vpop.f32.mrb[100].mxu1  ;;  %v7968_v17 = vpop.f32.mrb[115].mxu0 }
0x1487   :  { %v3570_v23 = vadd.f32 %v3568_v31, %v3463_v13  ;;  %v7961_v41 = vpop.f32.mrb[101].mxu1 }
0x1488   :  { %v3466_v16 = vpop.f32.mrb[102].mxu1  ;;  %v3575_v0 = vmul.f32 %v9950_v6, %v9950_v6 }
0x1489   :  { %v7962_v39 = vpop.f32.mrb[103].mxu1 }
0x148a   :  { %v3577_v32 = vsel %vm87_vm4, %v3575_v0, 0.0 }
0x148b   :  { %3578 = vadd.xlane.f32.xlu0 %v3577_v32 }
0x148e   :  { %v3561_v28 = vpop.f32.mrb[104].mxu1 }
0x148f   :  { %v3572_v1 = vadd.f32 %v3570_v23, %v3561_v28  ;;  %v7973_v42 = vpop.f32.mrb[105].mxu1 }
0x1490   :  { %v3564_v57 = vpop.f32.mrb[106].mxu1 }
0x1491   :  { %v9956_v11 = vadd.f32 %v8973_v22, %v3572_v1  ;;  %v7974_v20 = vpop.f32.mrb[107].mxu1 }
0x1493   :  { %v3576_v33 = vmul.f32 %v9956_v11, %v9956_v11 }
0x1495   :  { %v3580_v3 = vsel %vm87_vm4, %v3576_v33, 0.0 }
0x1496   :  { %3581 = vadd.xlane.f32.xlu0 %v3580_v3 }
0x14ac   :  { %3600 = vrot.lane.b32.xlu0 %v9621_v29, %s8871_s27 }
0x14c5   :  { %v3707_v38 = vpop.f32.mrb[108].mxu1 }
0x14c6   :  { %v9963_v51 = vpop.f32.mrb[109].mxu1  ;;  %v3784_v29 = vpack.c.bf16 %v3707_v38, %v3707_v38 }
0x14c7   :  { %v3711_v36 = vpop.f32.mrb[110].mxu1 }
0x14c8   :  { %v9965_v30 = vpop.f32.mrb[111].mxu1  ;;  %v9967_v4 = vpack.i.bf16 %v3711_v36, %v3707_v38  ;;  %v9969_v22 = vpack.c.bf16 %v3711_v36, %v3711_v36  ;;  %v3796_v8 = vsel %vm337_vm6, %v3784_v29, 0 }
0x14c9   :  { %v8475_v50 = vpack.i.bf16 %v9965_v30, %v9963_v51 }
0x14ca   :  { %8436 = vrot.lane.b32.xlu0 %v9967_v4, %s8868_s24  ;;  %v3842_v25 = vsel %vm337_vm6, %v9969_v22, 0 }
0x14cb   :  { %7990 = vmatpush3.bf16.xpose.msra.mxu1 %v3842_v25 }
0x14cc   :  { %8001 = vmatprep.subr.bf16.mxu1 %v8865_v7 }
0x14ce   :  { %8446 = vrot.lane.b32.xlu0 %v9967_v4, %s8867_s23 }
0x14d2   :  { %8456 = vrot.lane.b32.xlu0 %v9967_v4, %s8870_s26 }
0x14d6   :  { %8471 = vrot.lane.b32.xlu0 %v9967_v4, %s8871_s27 }
0x14da   :  { %4263 = vrot.lane.b32.xlu0 %v3784_v29, %s8869_s25 }
0x1518   :  { %v3579_v12 = vpop.xlane.xlu0 %3578 }
0x1519   :  { %v3583_v10 = vmul.f32 0.03125, %v3579_v12 }
0x151b   :  { %v3585_v14 = vadd.f32 1e-06, %v3583_v10 }
0x151d   :  { %8679 = vrsqrt.f32 %v3585_v14 }
0x1523   :  { %v3582_v19 = vpop.xlane.xlu0 %3581 }
0x1524   :  { %v3584_v27 = vmul.f32 0.03125, %v3582_v19 }
0x1526   :  { %v3586_v21 = vadd.f32 1e-06, %v3584_v27 }
0x1527   :  { %v3601_v35 = vpop.permute.xlu0 %3600  ;;  %v8680_v31 = vpop.eup %8679 }
0x1528   :  { %8681 = vrsqrt.f32 %v3586_v21  ;;  %7976 = vmatpush3.bf16.msra.mxu0 %v3601_v35  ;;  %v3589_v55 = vmul.f32 %v8680_v31, %v9950_v6 }
0x1529   :  { %7977 = vmatprep.subr.bf16.mxu0 %v8865_v7 }
0x152a   :  { %v3595_v49 = vmul.f32 %v3594_v58, %v3589_v55 }
0x152c   :  { %7978 = vmatpush3.bf16.msra.mxu0 %v3603_v15 }
0x152d   :  { %7983 = vmatprep.subr.bf16.mxu0 %v8865_v7 }
0x1532   :  { %v8682_v34 = vpop.eup %8681 }
0x1533   :  { %v3590_v48 = vmul.f32 %v8682_v34, %v9956_v11 }
0x1535   :  { %v3596_v37 = vmul.f32 %v3594_v58, %v3590_v48 }
0x1537   :  { %v3597_v61 = vpack.c.bf16 %v3596_v37, %v3595_v49 }
0x1539   :  { %7980 = vmatmul.mubr.msk.bf16.vlgmr.msra.gmra.mrb[116].mxu0 %vm87_vm4, %v3597_v61 }
0x153a   :  { %7984 = vmatpush3.bf16.xpose.msra.mxu0 %v3796_v8  ;;  %7985 = vmatprep.mubr.msk.bf16.mxu0 %vm8866_vm5, %v8865_v7 }
0x153b   :  { %7995 = vmatprep.subr.bf16.mxu0 %v8865_v7 }
0x153c   :  { %v8437_v53 = vpop.permute.xlu0 %8436 }
0x153d   :  { %v8438_v52 = vunpack.i.l.bf16 %v8437_v53  ;;  %v8439_v56 = vunpack.i.h.bf16 %v8437_v53 }
0x153f   :  { %v3786_v18 = vpack.c.bf16 %v8438_v52, %v8438_v52  ;;  %v3787_v13 = vpack.c.bf16 %v8439_v56, %v8439_v56 }
0x1540   :  { %v8447_v1 = vpop.permute.xlu0 %8446 }
0x1541   :  { %v3888_v16 = vsel %vm337_vm6, %v3786_v18, 0  ;;  %v3934_v28 = vsel %vm337_vm6, %v3787_v13, 0  ;;  %v8449_v42 = vunpack.i.h.bf16 %v8447_v1  ;;  %v8448_v57 = vunpack.i.l.bf16 %v8447_v1 }
0x1543   :  { %v3789_v33 = vpack.c.bf16 %v8449_v42, %v8449_v42  ;;  %v3788_v3 = vpack.c.bf16 %v8448_v57, %v8448_v57 }
0x1544   :  { %v8457_v25 = vpop.permute.xlu0 %8456 }
0x1545   :  { %v8459_v10 = vunpack.i.h.bf16 %v8457_v25  ;;  %v8458_v14 = vunpack.i.l.bf16 %v8457_v25  ;;  %v3980_v51 = vsel %vm337_vm6, %v3788_v3, 0  ;;  %v4026_v30 = vsel %vm337_vm6, %v3789_v33, 0 }
0x1547   :  { %v3791_v27 = vpack.c.bf16 %v8459_v10, %v8459_v10  ;;  %v3790_v21 = vpack.c.bf16 %v8458_v14, %v8458_v14 }
0x1548   :  { %v10027_v40 = vpop.permute.xlu0 %8471 }
0x1549   :  { %v4072_v55 = vsel %vm337_vm6, %v3790_v21, 0  ;;  %v4118_v58 = vsel %vm337_vm6, %v3791_v27, 0 }
0x154c   :  { %v4264_v37 = vpop.permute.xlu0 %4263 }
0x154d   :  { %v4269_v52 = vsel %vm834_vm7, %v4264_v37, 0 }
0x160c   :  { %v3643_v43 = vpop.f32.mrb[116].mxu0 }
0x160d   :  { %v3776_v17 = vpack.c.bf16 %v3643_v43, %v3643_v43  ;;  %v7981_v23 = vpop.f32.mrb[117].mxu0 }
0x160e   :  { %v3646_v41 = vpop.f32.mrb[118].mxu0 }
0x160f   :  { %v8460_v0 = vpack.i.bf16 %v3646_v41, %v3643_v43  ;;  %v3777_v39 = vpack.c.bf16 %v3646_v41, %v3646_v41  ;;  %v7982_v32 = vpop.f32.mrb[119].mxu0  ;;  %7986 = vmatmul.mubr.msk.bf16.vlgmr.msra.gmra.mrb[120].mxu0 %vm337_vm6, %v3776_v17 }
0x1610   :  { %7996 = vmatpush3.bf16.xpose.msra.mxu0 %v3888_v16  ;;  %7997 = vmatprep.mubr.msk.bf16.mxu0 %vm8866_vm5, %v8865_v7 }
0x1611   :  { %8441 = vrot.lane.b32.xlu1 %v8460_v0, %s8868_s24  ;;  %7992 = vmatmul.mubr.msk.bf16.vlgmr.msra.gmra.mrb[112].mxu1 %vm337_vm6, %v3777_v39 }
0x1612   :  { %8002 = vmatpush3.bf16.xpose.msra.mxu1 %v3934_v28  ;;  %8003 = vmatprep.mubr.msk.bf16.mxu1 %vm8866_vm5, %v8865_v7 }
0x1613   :  { %8007 = vmatprep.subr.bf16.mxu0 %v8865_v7  ;;  %8013 = vmatprep.subr.bf16.mxu1 %v8865_v7 }
0x1615   :  { %8451 = vrot.lane.b32.xlu1 %v8460_v0, %s8867_s23 }
0x1619   :  { %8461 = vrot.lane.b32.xlu1 %v8460_v0, %s8870_s26 }
0x161d   :  { %8466 = vrot.lane.b32.xlu1 %v9967_v4, %s8869_s25 }
0x1621   :  { %8476 = vrot.lane.b32.xlu1 %v8475_v50, %s8872_s28 }
0x1625   :  { %4312 = vrot.lane.b32.xlu1 %v9969_v22, %s8869_s25 }
0x1683   :  { %v8442_v20 = vpop.permute.xlu1 %8441 }
0x1684   :  { %v8444_v38 = vunpack.i.h.bf16 %v8442_v20  ;;  %v8443_v36 = vunpack.i.l.bf16 %v8442_v20 }
0x1686   :  { %v3779_v29 = vpack.c.bf16 %v8444_v38, %v8444_v38  ;;  %v3778_v12 = vpack.c.bf16 %v8443_v36, %v8443_v36 }
0x1687   :  { %v8452_v4 = vpop.permute.xlu1 %8451 }
0x1688   :  { %7998 = vmatmul.mubr.msk.bf16.vlgmr.msra.gmra.mrb[124].mxu0 %vm337_vm6, %v3778_v12  ;;  %8004 = vmatmul.mubr.msk.bf16.vlgmr.msra.gmra.mrb[116].mxu1 %vm337_vm6, %v3779_v29  ;;  %v8454_v22 = vunpack.i.h.bf16 %v8452_v4  ;;  %v8453_v50 = vunpack.i.l.bf16 %v8452_v4 }
0x1689   :  { %8008 = vmatpush3.bf16.xpose.msra.mxu0 %v3980_v51  ;;  %8014 = vmatpush3.bf16.xpose.msra.mxu1 %v4026_v30 }
0x168a   :  { %8009 = vmatprep.mubr.msk.bf16.mxu0 %vm8866_vm5, %v8865_v7  ;;  %8015 = vmatprep.mubr.msk.bf16.mxu1 %vm8866_vm5, %v8865_v7  ;;  %v3781_v35 = vpack.c.bf16 %v8454_v22, %v8454_v22  ;;  %v3780_v15 = vpack.c.bf16 %v8453_v50, %v8453_v50 }
0x168b   :  { %v8462_v19 = vpop.permute.xlu1 %8461  ;;  %8019 = vmatprep.subr.bf16.mxu0 %v8865_v7  ;;  %8025 = vmatprep.subr.bf16.mxu1 %v8865_v7 }
0x168c   :  { %v8464_v34 = vunpack.i.h.bf16 %v8462_v19  ;;  %v8463_v48 = vunpack.i.l.bf16 %v8462_v19 }
0x168e   :  { %v3783_v61 = vpack.c.bf16 %v8464_v34, %v8464_v34  ;;  %v3782_v8 = vpack.c.bf16 %v8463_v48, %v8463_v48 }
0x168f   :  { %v10029_v31 = vpop.permute.xlu1 %8466 }
0x1690   :  { %8010 = vmatmul.mubr.msk.bf16.vlgmr.msra.gmra.mrb[128].mxu0 %vm337_vm6, %v3780_v15  ;;  %8016 = vmatmul.mubr.msk.bf16.vlgmr.msra.gmra.mrb[120].mxu1 %vm337_vm6, %v3781_v35 }
0x1691   :  { %8020 = vmatpush3.bf16.xpose.msra.mxu0 %v4072_v55  ;;  %8026 = vmatpush3.bf16.xpose.msra.mxu1 %v4118_v58 }
0x1692   :  { %8021 = vmatprep.mubr.msk.bf16.mxu0 %vm8866_vm5, %v8865_v7  ;;  %8027 = vmatprep.mubr.msk.bf16.mxu1 %vm8866_vm5, %v8865_v7 }
0x1693   :  { %v10039_v49 = vpop.permute.xlu1 %8476  ;;  %8031 = vmatprep.subr.bf16.mxu0 %v8865_v7  ;;  %8037 = vmatprep.subr.bf16.mxu1 %v8865_v7 }
0x1697   :  { %v4313_v53 = vpop.permute.xlu1 %4312 }
0x1698   :  { %v4318_v56 = vsel %vm834_vm7, %v4313_v53, 0  ;;  %8022 = vmatmul.mubr.msk.bf16.vlgmr.msra.gmra.mrb[132].mxu0 %vm337_vm6, %v3782_v8  ;;  %8028 = vmatmul.mubr.msk.bf16.vlgmr.msra.gmra.mrb[124].mxu1 %vm337_vm6, %v3783_v61 }
0x1699   :  { %8032 = vmatpush3.bf16.msra.mxu0 %v4269_v52  ;;  %8038 = vmatpush3.bf16.msra.mxu1 %v4318_v56 }
0x169a   :  { %8033 = vmatprep.mubr.msk.bf16.mxu0 %vm8866_vm5, %v8865_v7  ;;  %8039 = vmatprep.mubr.msk.bf16.mxu1 %vm8866_vm5, %v8865_v7 }
0x169b   :  { %8043 = vmatprep.subr.bf16.mxu0 %v8865_v7  ;;  %8049 = vmatprep.subr.bf16.mxu1 %v8865_v7 }
0x16e2   :  { %v3832_v18 = vpop.f32.mrb[120].mxu0 }
0x16e3   :  { %v10054_v43 = vadd.f32 %v3832_v18, %v9103_v60  ;;  %v7987_v13 = vpop.f32.mrb[121].mxu0 }
0x16e4   :  { %v3835_v17 = vpop.f32.mrb[122].mxu0  ;;  %v3878_v23 = vpop.f32.mrb[112].mxu1 }
0x16e5   :  { %v3879_v41 = vadd.f32 %v3878_v23, %v9109_v62  ;;  %v7988_v16 = vpop.f32.mrb[123].mxu0  ;;  %v7993_v0 = vpop.f32.mrb[113].mxu1  ;;  %v4160_v39 = vsel %vm337_vm6, %v10054_v43, -inf }
0x16e6   :  { %4161 = vmax.xlane.f32.xlu0 %v4160_v39  ;;  %v3881_v32 = vpop.f32.mrb[114].mxu1  ;;  %v8468_v16 = vunpack.i.l.bf16 %v10029_v31  ;;  %v8469_v39 = vunpack.i.h.bf16 %v10029_v31 }
0x16e7   :  { %v7994_v28 = vpop.f32.mrb[115].mxu1  ;;  %v4163_v1 = vsel %vm337_vm6, %v3879_v41, -inf }
0x16e8   :  { %4164 = vmax.xlane.f32.xlu1 %v4163_v1  ;;  %v4256_v0 = vpack.c.bf16 %v8468_v16, %v8468_v16  ;;  %v4257_v32 = vpack.c.bf16 %v8469_v39, %v8469_v39 }
0x175b   :  { %v3924_v42 = vpop.f32.mrb[124].mxu0  ;;  %v3970_v57 = vpop.f32.mrb[116].mxu1 }
0x175c   :  { %v10061_v20 = vadd.f32 %v3924_v42, %v9103_v60  ;;  %v7999_v33 = vpop.f32.mrb[125].mxu0  ;;  %v8005_v3 = vpop.f32.mrb[117].mxu1  ;;  %v10064_v25 = vadd.f32 %v3970_v57, %v9109_v62 }
0x175d   :  { %v3927_v38 = vpop.f32.mrb[126].mxu0  ;;  %v3973_v36 = vpop.f32.mrb[118].mxu1 }
0x175e   :  { %v8000_v29 = vpop.f32.mrb[127].mxu0  ;;  %v8006_v12 = vpop.f32.mrb[119].mxu1  ;;  %v4166_v4 = vsel %vm337_vm6, %v10061_v20, -inf  ;;  %v4169_v10 = vsel %vm337_vm6, %v10064_v25, -inf }
0x175f   :  { %4167 = vmax.xlane.f32.xlu0 %v4166_v4  ;;  %v8473_v12 = vunpack.i.l.bf16 %v10027_v40 }
0x1763   :  { %v4016_v14 = vpop.f32.mrb[128].mxu0  ;;  %4170 = vmax.xlane.f32.xlu0 %v4169_v10  ;;  %v4062_v51 = vpop.f32.mrb[120].mxu1 }
0x1764   :  { %v10071_v30 = vadd.f32 %v4016_v14, %v9103_v60  ;;  %v4063_v22 = vadd.f32 %v4062_v51, %v9109_v62  ;;  %v8011_v50 = vpop.f32.mrb[129].mxu0  ;;  %v8017_v19 = vpop.f32.mrb[121].mxu1 }
0x1765   :  { %v4019_v27 = vpop.f32.mrb[130].mxu0  ;;  %v4065_v21 = vpop.f32.mrb[122].mxu1 }
0x1766   :  { %v8012_v35 = vpop.f32.mrb[131].mxu0  ;;  %v8018_v15 = vpop.f32.mrb[123].mxu1  ;;  %v4172_v55 = vsel %vm337_vm6, %v10071_v30, -inf  ;;  %v4175_v58 = vsel %vm337_vm6, %v4063_v22, -inf }
0x1767   :  { %4173 = vmax.xlane.f32.xlu1 %v4172_v55  ;;  %4176 = vmax.xlane.f32.xlu0 %v4175_v58 }
0x176b   :  { %v4108_v34 = vpop.f32.mrb[132].mxu0  ;;  %v4154_v48 = vpop.f32.mrb[124].mxu1 }
0x176c   :  { %v10078_v37 = vadd.f32 %v4108_v34, %v9103_v60  ;;  %v4155_v61 = vadd.f32 %v4154_v48, %v9109_v62  ;;  %v8023_v8 = vpop.f32.mrb[133].mxu0  ;;  %v8029_v53 = vpop.f32.mrb[125].mxu1 }
0x176d   :  { %v4111_v52 = vpop.f32.mrb[134].mxu0  ;;  %v4157_v56 = vpop.f32.mrb[126].mxu1  ;;  %v8474_v53 = vunpack.i.h.bf16 %v10027_v40 }
0x176e   :  { %v8024_v18 = vpop.f32.mrb[135].mxu0  ;;  %v8030_v13 = vpop.f32.mrb[127].mxu1  ;;  %v4178_v17 = vsel %vm337_vm6, %v10078_v37, -inf  ;;  %v4181_v23 = vsel %vm337_vm6, %v4155_v61, -inf  ;;  %v8478_v56 = vunpack.i.l.bf16 %v10039_v49 }
0x176f   :  { %4179 = vmax.xlane.f32.xlu1 %v4178_v17  ;;  %4182 = vmax.xlane.f32.xlu0 %v4181_v23  ;;  %v4259_v52 = vpack.c.bf16 %v8474_v53, %v8474_v53 }
0x1770   :  { %v4260_v17 = vpack.c.bf16 %v8478_v56, %v8478_v56 }
0x1773   :  { %v4162_v28 = vpop.xlane.xlu0 %4161 }
0x1774   :  { %v4184_v42 = vsub.f32 %v10054_v43, %v4162_v28  ;;  %v4258_v43 = vpack.c.bf16 %v8473_v12, %v8473_v12 }
0x1775   :  { %v4165_v1 = vpop.xlane.xlu1 %4164 }
0x1776   :  { %v4185_v57 = vsub.f32 %v3879_v41, %v4165_v1  ;;  %v4192_v33 = vmul.f32 1.442695, %v4184_v42 }
0x1778   :  { %v4194_v3 = vmul.f32 1.442695, %v4185_v57  ;;  %8683 = vpow2.f32 %v4192_v33 }
0x177a   :  { %8685 = vpow2.f32 %v4194_v3 }
0x1780   :  { %4361 = vrot.lane.b32.xlu1 %v4256_v0, %s8869_s25 }
0x1782   :  { %v10089_v38 = vpop.eup %8683 }
0x1783   :  { %v4208_v31 = vsel %vm337_vm6, %v10089_v38, 0.0 }
0x1784   :  { %v10091_v36 = vpop.eup %8685 }
0x1785   :  { %4410 = vrot.lane.b32.xlu0 %v4257_v32, %s8869_s25  ;;  %v4211_v29 = vsel %vm337_vm6, %v10091_v36, 0.0 }
0x17a4   :  { %4209 = vadd.xlane.f32.xlu1 %v4208_v31  ;;  %4212 = vadd.xlane.f32.xlu0 %v4211_v29 }
0x17b5   :  { %4459 = vrot.lane.b32.xlu1 %v4258_v43, %s8869_s25 }
0x17ec   :  { %v4168_v41 = vpop.xlane.xlu0 %4167 }
0x17ed   :  { %v4186_v4 = vsub.f32 %v10061_v20, %v4168_v41 }
0x17ef   :  { %v4196_v10 = vmul.f32 1.442695, %v4186_v4 }
0x17f0   :  { %v4171_v14 = vpop.xlane.xlu0 %4170 }
0x17f1   :  { %8687 = vpow2.f32 %v4196_v10  ;;  %v4187_v51 = vsub.f32 %v10064_v25, %v4171_v14 }
0x17f3   :  { %v4198_v50 = vmul.f32 1.442695, %v4187_v51 }
0x17f4   :  { %v4177_v19 = vpop.xlane.xlu0 %4176  ;;  %v4174_v18 = vpop.xlane.xlu1 %4173 }
0x17f5   :  { %8689 = vpow2.f32 %v4198_v50  ;;  %v4189_v27 = vsub.f32 %v4063_v22, %v4177_v19  ;;  %v4188_v13 = vsub.f32 %v10071_v30, %v4174_v18 }
0x17f7   :  { %v4202_v21 = vmul.f32 1.442695, %v4189_v27  ;;  %v4200_v16 = vmul.f32 1.442695, %v4188_v13 }
0x17f9   :  { %8691 = vpow2.f32 %v4202_v21 }
0x17fb   :  { %v10101_v35 = vpop.eup %8687 }
0x17fc   :  { %v4183_v15 = vpop.xlane.xlu0 %4182  ;;  %v4214_v55 = vsel %vm337_vm6, %v10101_v35, 0.0  ;;  %v4180_v23 = vpop.xlane.xlu1 %4179 }
0x17fd   :  { %v4191_v58 = vsub.f32 %v4155_v61, %v4183_v15  ;;  %4215 = vadd.xlane.f32.xlu0 %v4214_v55  ;;  %v4190_v0 = vsub.f32 %v10078_v37, %v4180_v23 }
0x17ff   :  { %v10105_v20 = vpop.eup %8689  ;;  %v4206_v34 = vmul.f32 1.442695, %v4191_v58  ;;  %v4204_v40 = vmul.f32 1.442695, %v4190_v0 }
0x1800   :  { %v4217_v25 = vsel %vm337_vm6, %v10105_v20, 0.0  ;;  %v4362_v39 = vpop.permute.xlu1 %4361  ;;  %v4411_v32 = vpop.permute.xlu0 %4410 }
0x1801   :  { %4218 = vadd.xlane.f32.xlu1 %v4217_v25  ;;  %8693 = vpow2.f32 %v4206_v34  ;;  %v4367_v41 = vsel %vm834_vm7, %v4362_v39, 0  ;;  %v4416_v4 = vsel %vm834_vm7, %v4411_v32, 0 }
0x1802   :  { %8695 = vpow2.f32 %v4200_v16 }
0x1803   :  { %v10109_v48 = vpop.eup %8691  ;;  %8697 = vpow2.f32 %v4204_v40 }
0x1804   :  { %v4223_v22 = vsel %vm337_vm6, %v10109_v48, 0.0 }
0x1805   :  { %4224 = vadd.xlane.f32.xlu1 %v4223_v22 }
0x180b   :  { %v10113_v8 = vpop.eup %8693 }
0x180c   :  { %v4229_v61 = vsel %vm337_vm6, %v10113_v8, 0.0  ;;  %v10123_v28 = vpop.eup %8695 }
0x180d   :  { %4230 = vadd.xlane.f32.xlu1 %v4229_v61  ;;  %v4220_v57 = vsel %vm337_vm6, %v10123_v28, 0.0  ;;  %v10127_v30 = vpop.eup %8697 }
0x180e   :  { %v4226_v37 = vsel %vm337_vm6, %v10127_v30, 0.0 }
0x1813   :  { %4508 = vrot.lane.b32.xlu0 %v4259_v52, %s8869_s25 }
0x181e   :  { %4557 = vrot.lane.b32.xlu1 %v4260_v17, %s8869_s25 }
0x1831   :  { %v4210_v1 = vpop.xlane.xlu1 %4209  ;;  %v4213_v42 = vpop.xlane.xlu0 %4212 }
0x1832   :  { %8699 = vrcp.f32 %v4210_v1  ;;  %4221 = vadd.xlane.f32.xlu0 %v4220_v57 }
0x1833   :  { %8701 = vrcp.f32 %v4213_v42 }
0x1835   :  { %v4460_v10 = vpop.permute.xlu1 %4459 }
0x1836   :  { %4227 = vadd.xlane.f32.xlu0 %v4226_v37  ;;  %v4465_v55 = vsel %vm834_vm7, %v4460_v10, 0 }
0x183c   :  { %v8700_v33 = vpop.eup %8699 }
0x183d   :  { %v8702_v3 = vpop.eup %8701  ;;  %v4240_v31 = vmul.f32 %v8700_v33, %v10089_v38  ;;  %v8479_v38 = vunpack.i.h.bf16 %v10039_v49 }
0x183e   :  { %v4241_v29 = vmul.f32 %v8702_v3, %v10091_v36 }
0x183f   :  { %v4248_v12 = vpack.c.bf16 %v4240_v31, %v4240_v31  ;;  %v4261_v36 = vpack.c.bf16 %v8479_v38, %v8479_v38 }
0x1840   :  { %v4249_v43 = vpack.c.bf16 %v4241_v29, %v4241_v29 }
0x1841   :  { %8034 = vmatmul.mubr.msk.bf16.vlgmr.msra.gmra.mrb[136].mxu0 %vm337_vm6, %v4248_v12 }
0x1842   :  { %8040 = vmatmul.mubr.msk.bf16.vlgmr.msra.gmra.mrb[128].mxu1 %vm337_vm6, %v4249_v43  ;;  %8044 = vmatpush3.bf16.msra.mxu0 %v4367_v41 }
0x1843   :  { %8050 = vmatpush3.bf16.msra.mxu1 %v4416_v4  ;;  %8045 = vmatprep.mubr.msk.bf16.mxu0 %vm8866_vm5, %v8865_v7 }
0x1844   :  { %8055 = vmatprep.subr.bf16.mxu0 %v8865_v7  ;;  %8051 = vmatprep.mubr.msk.bf16.mxu1 %vm8866_vm5, %v8865_v7 }
0x1845   :  { %8061 = vmatprep.subr.bf16.mxu1 %v8865_v7 }
0x184c   :  { %4606 = vrot.lane.b32.xlu0 %v4261_v36, %s8869_s25 }
0x188a   :  { %v4216_v14 = vpop.xlane.xlu0 %4215 }
0x188b   :  { %8703 = vrcp.f32 %v4216_v14 }
0x188e   :  { %v4219_v51 = vpop.xlane.xlu1 %4218  ;;  %v4509_v58 = vpop.permute.xlu0 %4508 }
0x188f   :  { %8705 = vrcp.f32 %v4219_v51  ;;  %v4514_v22 = vsel %vm834_vm7, %v4509_v58, 0 }
0x1892   :  { %v4225_v50 = vpop.xlane.xlu1 %4224 }
0x1893   :  { %8707 = vrcp.f32 %v4225_v50 }
0x1895   :  { %v8704_v19 = vpop.eup %8703 }
0x1896   :  { %v4242_v27 = vmul.f32 %v8704_v19, %v10101_v35 }
0x1898   :  { %v4250_v21 = vpack.c.bf16 %v4242_v27, %v4242_v27 }
0x1899   :  { %v8706_v15 = vpop.eup %8705 }
0x189a   :  { %8046 = vmatmul.mubr.msk.bf16.vlgmr.msra.gmra.mrb[140].mxu0 %vm337_vm6, %v4250_v21  ;;  %v4243_v49 = vmul.f32 %v8706_v15, %v10105_v20  ;;  %v4231_v53 = vpop.xlane.xlu1 %4230 }
0x189b   :  { %8056 = vmatpush3.bf16.msra.mxu0 %v4465_v55  ;;  %8057 = vmatprep.mubr.msk.bf16.mxu0 %vm8866_vm5, %v8865_v7  ;;  %8709 = vrcp.f32 %v4231_v53 }
0x189c   :  { %v4251_v34 = vpack.c.bf16 %v4243_v49, %v4243_v49  ;;  %8067 = vmatprep.subr.bf16.mxu0 %v8865_v7 }
0x189d   :  { %v8708_v25 = vpop.eup %8707 }
0x189e   :  { %8052 = vmatmul.mubr.msk.bf16.vlgmr.msra.gmra.mrb[132].mxu1 %vm337_vm6, %v4251_v34  ;;  %v4245_v35 = vmul.f32 %v8708_v25, %v10109_v48  ;;  %v4558_v0 = vpop.permute.xlu1 %4557 }
0x189f   :  { %8062 = vmatpush3.bf16.msra.mxu1 %v4514_v22  ;;  %8063 = vmatprep.mubr.msk.bf16.mxu1 %vm8866_vm5, %v8865_v7 }
0x18a0   :  { %8073 = vmatprep.subr.bf16.mxu1 %v8865_v7  ;;  %v4253_v20 = vpack.c.bf16 %v4245_v35, %v4245_v35 }
0x18a5   :  { %v8710_v52 = vpop.eup %8709 }
0x18a6   :  { %8064 = vmatmul.mubr.msk.bf16.vlgmr.msra.gmra.mrb[136].mxu1 %vm337_vm6, %v4253_v20  ;;  %v4247_v18 = vmul.f32 %v8710_v52, %v10113_v8  ;;  %v4563_v8 = vsel %vm834_vm7, %v4558_v0, 0 }
0x18a7   :  { %8075 = vmatprep.mubr.msk.bf16.mxu1 %vm8866_vm5, %v8865_v7 }
0x18a8   :  { %v4255_v23 = vpack.c.bf16 %v4247_v18, %v4247_v18 }
0x18bf   :  { %v4222_v61 = vpop.xlane.xlu0 %4221 }
0x18c0   :  { %8711 = vrcp.f32 %v4222_v61 }
0x18c3   :  { %v4228_v56 = vpop.xlane.xlu0 %4227 }
0x18c4   :  { %8713 = vrcp.f32 %v4228_v56 }
0x18c7   :  { %v4607_v13 = vpop.permute.xlu0 %4606 }
0x18c8   :  { %v4612_v48 = vsel %vm834_vm7, %v4607_v13, 0 }
0x18c9   :  { %8074 = vmatpush3.bf16.msra.mxu1 %v4612_v48 }
0x18ca   :  { %v8712_v17 = vpop.eup %8711  ;;  %8087 = vmatprep.subr.bf16.mxu1 %v8865_v7 }
0x18cb   :  { %v4244_v16 = vmul.f32 %v8712_v17, %v10123_v28 }
0x18cc   :  { %8076 = vmatmul.mubr.msk.bf16.vlgmr.msra.gmra.mrb[140].mxu1 %vm337_vm6, %v4255_v23 }
0x18cd   :  { %v4252_v40 = vpack.c.bf16 %v4244_v16, %v4244_v16  ;;  %8095 = vmatprep.mubr.msk.bf16.mxu1 %vm8866_vm5, %v8865_v7 }
0x18ce   :  { %v8714_v39 = vpop.eup %8713 }
0x18cf   :  { %8058 = vmatmul.mubr.msk.bf16.vlgmr.msra.gmra.mrb[144].mxu0 %vm337_vm6, %v4252_v40  ;;  %v4246_v32 = vmul.f32 %v8714_v39, %v10127_v30  ;;  %v2549_v39 = vld [vmem:[%s10854_s6 + $0x18] sm:$0xff] }
0x18d0   :  { %8068 = vmatpush3.bf16.msra.mxu0 %v4563_v8  ;;  %8069 = vmatprep.mubr.msk.bf16.mxu0 %vm8866_vm5, %v8865_v7  ;;  %v2553_v8 = vld [vmem:[%s10854_s6 + $0x38] sm:$0xff] }
0x18d1   :  { %8079 = vmatprep.subr.bf16.mxu0 %v8865_v7  ;;  %v4254_v28 = vpack.c.bf16 %v4246_v32, %v4246_v32  ;;  %v4694_v32 = vpack.c.bf16 %v2553_v8, %v2549_v39 }
0x18d7   :  { %8070 = vmatmul.mubr.msk.bf16.vlgmr.msra.gmra.mrb[148].mxu0 %vm337_vm6, %v4254_v28  ;;  %v2561_v28 = vld [vmem:[%s10854_s6 + $0x78] sm:$0xff] }
0x18d8   :  { %8083 = vmatprep.mubr.msk.bf16.mxu0 %vm8866_vm5, %v8865_v7  ;;  %8080 = vmatpush3.bf16.msra.mxu0 %v4694_v32 }
0x18d9   :  { %8081 = vmatprep.subr.bf16.mxu0 %v8865_v7 }
0x1914   :  { %v4305_v1 = vpop.f32.mrb[136].mxu0 }
0x1915   :  { %v4354_v42 = vpop.f32.mrb[128].mxu1  ;;  %v8035_v57 = vpop.f32.mrb[137].mxu0 }
0x1916   :  { %v8041_v37 = vpop.f32.mrb[129].mxu1  ;;  %v4308_v33 = vpop.f32.mrb[138].mxu0  ;;  %v7327_v57 = vld [vmem:[%s10855_s7 + $0x88] sm:$0xff] }
0x1917   :  { %v4357_v3 = vpop.f32.mrb[130].mxu1  ;;  %v8036_v31 = vpop.f32.mrb[139].mxu0  ;;  %v7328_v37 = vld [vmem:[%s10855_s7 + $0x90] sm:$0xff] }
0x1918   :  { %v8042_v29 = vpop.f32.mrb[131].mxu1  ;;  %v7329_v3 = vld [vmem:[%s10855_s7 + $0x98] sm:$0xff] }
0x1919   :  { %v4744_v31 = vpack.c.bf16 %v7329_v3, %v7328_v37  ;;  %v7345_v37 = vld [vmem:[%s10854_s6 + $0xc8] sm:$0xff]  ;;  %v7344_v3 = vld [vmem:[%s10854_s6 + $0xc0] sm:$0xff] }
0x196d   :  { %v4403_v12 = vpop.f32.mrb[140].mxu0 }
0x196e   :  { %v4654_v43 = vadd.f32 %v4403_v12, %v4305_v1  ;;  %v8047_v41 = vpop.f32.mrb[141].mxu0 }
0x196f   :  { %v4406_v30 = vpop.f32.mrb[142].mxu0 }
0x1970   :  { %v8048_v4 = vpop.f32.mrb[143].mxu0 }
0x1971   :  { %v4452_v38 = vpop.f32.mrb[132].mxu1 }
0x1972   :  { %v4655_v36 = vadd.f32 %v4452_v38, %v4354_v42  ;;  %v8053_v10 = vpop.f32.mrb[133].mxu1  ;;  %v7326_v42 = vld [vmem:[%s10855_s7 + $0x80] sm:$0xff]  ;;  %v4680_v38 = vsub.s32 7, %v9014_v46 }
0x1973   :  { %v4455_v14 = vpop.f32.mrb[134].mxu1  ;;  %v4743_v33 = vpack.c.bf16 %v7327_v57, %v7326_v42  ;;  %v7340_v42 = vld [vmem:[%s10854_s6 + $0xa0] sm:$0xff] }
0x1974   :  { %v8054_v51 = vpop.f32.mrb[135].mxu1  ;;  %v8810_v14 = vld [vmem:[%s10856_s8] sm:$0xff] }
0x1975   :  { %8088 = vmatpush3.bf16.msra.mxu1 %v4743_v33  ;;  %v4681_v51 = vrot.slane %v8810_v14, %v4680_v38  ;;  %v7349_v33 = vld [vmem:[%s10854_s6 + $0xe8] sm:$0xff] }
0x1976   :  { %8089 = vmatprep.subr.bf16.mxu1 %v8865_v7 }
0x1979   :  { %v4550_v50 = vpop.f32.mrb[136].mxu1  ;;  %8090 = vmatpush3.bf16.msra.mxu1 %v4744_v31  ;;  %v10277_v31 = vpack.c.bf16 %v7349_v33, %v7345_v37 }
0x197a   :  { %v4657_v19 = vadd.f32 %v4655_v36, %v4550_v50  ;;  %v8065_v27 = vpop.f32.mrb[137].mxu1  ;;  %8091 = vmatprep.subr.bf16.mxu1 %v8865_v7 }
0x197b   :  { %v4553_v21 = vpop.f32.mrb[138].mxu1 }
0x197c   :  { %v8066_v15 = vpop.f32.mrb[139].mxu1 }
0x199f   :  { %v4648_v55 = vpop.f32.mrb[140].mxu1 }
0x19a0   :  { %v4659_v49 = vadd.f32 %v4657_v19, %v4648_v55  ;;  %v8077_v58 = vpop.f32.mrb[141].mxu1  ;;  %v7330_v55 = vld [vmem:[%s10855_s7 + $0xa0] sm:$0xff] }
0x19a1   :  { %v4651_v34 = vpop.f32.mrb[142].mxu1 }
0x19a2   :  { %v10178_v25 = vadd.f32 %v4659_v49, %v9956_v11  ;;  %v4501_v22 = vpop.f32.mrb[144].mxu0  ;;  %v8078_v35 = vpop.f32.mrb[143].mxu1  ;;  %v7331_v49 = vld [vmem:[%s10855_s7 + $0xa8] sm:$0xff]  ;;  %v7332_v34 = vld [vmem:[%s10855_s7 + $0xb0] sm:$0xff] }
0x19a3   :  { %v4656_v20 = vadd.f32 %v4654_v43, %v4501_v22  ;;  %v8059_v53 = vpop.f32.mrb[145].mxu0  ;;  %v4745_v58 = vpack.c.bf16 %v7331_v49, %v7330_v55  ;;  %v7333_v22 = vld [vmem:[%s10855_s7 + $0xb8] sm:$0xff] }
0x19a4   :  { %v4504_v61 = vpop.f32.mrb[146].mxu0  ;;  %v4663_v52 = vmul.f32 %v10178_v25, %v10178_v25  ;;  %v4746_v35 = vpack.c.bf16 %v7333_v22, %v7332_v34 }
0x19a5   :  { %v8060_v56 = vpop.f32.mrb[147].mxu0  ;;  %8092 = vmatpush3.bf16.msra.mxu1 %v4745_v58 }
0x19a6   :  { %v4667_v18 = vsel %vm87_vm4, %v4663_v52, 0.0  ;;  %8093 = vmatprep.subr.bf16.mxu1 %v8865_v7 }
0x19a7   :  { %4668 = vadd.xlane.f32.xlu0 %v4667_v18 }
0x19a9   :  { %8094 = vmatpush3.bf16.msra.mxu1 %v4746_v35 }
0x19aa   :  { %v4599_v13 = vpop.f32.mrb[148].mxu0  ;;  %8105 = vmatprep.subr.bf16.mxu1 %v8865_v7 }
0x19ab   :  { %v4658_v48 = vadd.f32 %v4656_v20, %v4599_v13  ;;  %v8071_v17 = vpop.f32.mrb[149].mxu0 }
0x19ac   :  { %v4602_v23 = vpop.f32.mrb[150].mxu0 }
0x19ad   :  { %v10184_v16 = vadd.f32 %v4658_v48, %v9950_v6  ;;  %v8072_v11 = vpop.f32.mrb[151].mxu0  ;;  %v2557_v6 = vld [vmem:[%s10854_s6 + $0x58] sm:$0xff] }
0x19ae   :  { %v4695_v1 = vpack.c.bf16 %v2561_v28, %v2557_v6 }
0x19af   :  { %v4662_v0 = vmul.f32 %v10184_v16, %v10184_v16 }
0x19b0   :  { %8082 = vmatpush3.bf16.msra.mxu0 %v4695_v1  ;;  %v7336_v1 = vld [vmem:[%s10854_s6 + $0x80] sm:$0xff] }
0x19b1   :  { %v4664_v40 = vsel %vm87_vm4, %v4662_v0, 0.0  ;;  %v4833_v57 = vpack.c.bf16 %v7340_v42, %v7336_v1 }
0x19b2   :  { %4665 = vadd.xlane.f32.xlu1 %v4664_v40 }
0x1a34   :  { %v4669_v29 = vpop.xlane.xlu0 %4668 }
0x1a35   :  { %v4671_v12 = vmul.f32 0.03125, %v4669_v29  ;;  %v7348_v29 = vld [vmem:[%s10854_s6 + $0xe0] sm:$0xff] }
0x1a37   :  { %v4673_v43 = vadd.f32 1e-06, %v4671_v12  ;;  %v4835_v12 = vpack.c.bf16 %v7348_v29, %v7344_v3 }
0x1a39   :  { %8715 = vrsqrt.f32 %v4673_v43 }
0x1a3f   :  { %v4666_v41 = vpop.xlane.xlu1 %4665 }
0x1a40   :  { %v4670_v30 = vmul.f32 0.03125, %v4666_v41 }
0x1a42   :  { %v4672_v4 = vadd.f32 1e-06, %v4670_v30 }
0x1a43   :  { %v8716_v36 = vpop.eup %8715 }
0x1a44   :  { %8717 = vrsqrt.f32 %v4672_v4  ;;  %v4677_v10 = vmul.f32 %v8716_v36, %v10178_v25 }
0x1a46   :  { %v4683_v21 = vmul.f32 %v4681_v51, %v4677_v10  ;;  %v10287_v10 = vld [vmem:[%s10856_s8 + $0x8] sm:$0xf] }
0x1a4e   :  { %v8718_v50 = vpop.eup %8717 }
0x1a4f   :  { %v4676_v19 = vmul.f32 %v8718_v50, %v10184_v16  ;;  %v4829_v50 = vrot.slane %v10287_v10, %v9017_v47 }
0x1a51   :  { %v4682_v27 = vmul.f32 %v4681_v51, %v4676_v19 }
0x1a53   :  { %v4693_v15 = vpack.c.bf16 %v4683_v21, %v4682_v27 }
0x1a55   :  { %8084 = vmatmul.mubr.msk.bf16.vlgmr.msra.gmra.mrb[152].mxu0 %vm87_vm4, %v4693_v15 }
0x1a56   :  { %4872 = vmatprep.mubr.bf16.mxu0 %v8864_v2 }
0x1b28   :  { %v4733_v20 = vpop.f32.mrb[152].mxu0 }
0x1b29   :  { %v8085_v53 = vpop.f32.mrb[153].mxu0  ;;  %v4740_v52 = vmax.f32 %v4733_v20, 0.0 }
0x1b2a   :  { %v4736_v61 = vpop.f32.mrb[154].mxu0 }
0x1b2b   :  { %v4741_v56 = vmax.f32 %v4736_v61, 0.0  ;;  %v8086_v18 = vpop.f32.mrb[155].mxu0 }
0x1b2d   :  { %v4742_v13 = vpack.c.bf16 %v4741_v56, %v4740_v52 }
0x1b2f   :  { %8096 = vmatmul.mubr.msk.bf16.vlgmr.msra.gmra.mrb[144].mxu1 %vm1318_vm8, %v4742_v13 }
0x1b30   :  { %8107 = vmatprep.mubr.msk.bf16.mxu1 %vm8866_vm5, %v8865_v7 }
0x1c02   :  { %v4784_v48 = vpop.f32.mrb[144].mxu1 }
0x1c03   :  { %v10242_v17 = vadd.f32 %v4784_v48, %v10184_v16  ;;  %v8097_v23 = vpop.f32.mrb[145].mxu1  ;;  %v7337_v16 = vld [vmem:[%s10854_s6 + $0x88] sm:$0xff] }
0x1c04   :  { %v4787_v11 = vpop.f32.mrb[146].mxu1 }
0x1c05   :  { %v10245_v0 = vadd.f32 %v4787_v11, %v10178_v25  ;;  %v8098_v40 = vpop.f32.mrb[147].mxu1  ;;  %v4810_v39 = vmul.f32 %v10242_v17, %v10242_v17  ;;  %v7341_v25 = vld [vmem:[%s10854_s6 + $0xa8] sm:$0xff] }
0x1c06   :  { %v10259_v28 = vpack.c.bf16 %v7341_v25, %v7337_v16 }
0x1c07   :  { %v4812_v8 = vsel %vm87_vm4, %v4810_v39, 0.0  ;;  %v4811_v32 = vmul.f32 %v10245_v0, %v10245_v0 }
0x1c08   :  { %4813 = vadd.xlane.f32.xlu0 %v4812_v8  ;;  %4840 = vmatprep.subr.bf16.mxu0 %v10259_v28 }
0x1c09   :  { %v4815_v6 = vsel %vm87_vm4, %v4811_v32, 0.0  ;;  %4841 = vmatpush1.bf16.msra.mxu0 %v4833_v57 }
0x1c0a   :  { %4816 = vadd.xlane.f32.xlu1 %v4815_v6  ;;  %4842 = vmatprep.subr.bf16.mxu0 %v10277_v31 }
0x1c0d   :  { %4843 = vmatpush1.bf16.msra.mxu0 %v4835_v12 }
0x1c0e   :  { %8099 = vmatprep.subr.bf16.mxu0 %v8865_v7 }
0x1c95   :  { %v4814_v43 = vpop.xlane.xlu0 %4813 }
0x1c96   :  { %v4818_v41 = vmul.f32 0.03125, %v4814_v43 }
0x1c97   :  { %v4817_v30 = vpop.xlane.xlu1 %4816 }
0x1c98   :  { %v4820_v4 = vadd.f32 1e-06, %v4818_v41  ;;  %v4819_v38 = vmul.f32 0.03125, %v4817_v30 }
0x1c9a   :  { %8719 = vrsqrt.f32 %v4820_v4  ;;  %v4821_v36 = vadd.f32 1e-06, %v4819_v38 }
0x1c9c   :  { %8721 = vrsqrt.f32 %v4821_v36 }
0x1ca4   :  { %v8720_v14 = vpop.eup %8719 }
0x1ca5   :  { %v4824_v51 = vmul.f32 %v8720_v14, %v10242_v17 }
0x1ca6   :  { %v8722_v19 = vpop.eup %8721 }
0x1ca7   :  { %v4825_v27 = vmul.f32 %v8722_v19, %v10245_v0  ;;  %v4830_v21 = vmul.f32 %v4829_v50, %v4824_v51 }
0x1ca9   :  { %v4831_v15 = vmul.f32 %v4829_v50, %v4825_v27 }
0x1cab   :  { %v4832_v55 = vpack.c.bf16 %v4831_v15, %v4830_v21 }
0x1cad   :  { %7352 = vmatmul.mubr.msk.bf16.vlgmr.msra.gmra.mrb[156].mxu0 %vm87_vm4, %v4832_v55 }
0x1cae   :  { %8101 = vmatprep.mubr.msk.bf16.mxu0 %vm8866_vm5, %v8865_v7 }
0x1d80   :  { %v4874_v49 = vpop.f32.mrb[156].mxu0 }
0x1d81   :  { %v4876_v58 = vpop.f32.mrb[157].mxu0  ;;  %v4923_v47 = vpack.c.bf16 %v4874_v49, %v4874_v49 }
0x1d82   :  { %v4878_v34 = vpop.f32.mrb[158].mxu0 }
0x1d83   :  { %v4880_v22 = vpop.f32.mrb[159].mxu0  ;;  %v8485_v35 = vpack.i.bf16 %v4878_v34, %v4874_v49  ;;  %v4924_v53 = vpack.c.bf16 %v4878_v34, %v4878_v34 }
0x1d84   :  { %v8505_v20 = vpack.i.bf16 %v4880_v22, %v4876_v58 }
0x1d85   :  { %8486 = vrot.lane.b32.xlu1 %v8485_v35, %s8867_s23  ;;  %8481 = vrot.lane.b32.xlu0 %v8485_v35, %s8868_s24 }
0x1d89   :  { %8491 = vrot.lane.b32.xlu1 %v8485_v35, %s8870_s26  ;;  %4932 = vrot.lane.b32.xlu0 %v4923_v47, %s8869_s25 }
0x1d8d   :  { %4981 = vrot.lane.b32.xlu1 %v4924_v53, %s8869_s25 }
0x1df7   :  { %v8487_v61 = vpop.permute.xlu1 %8486  ;;  %v8482_v52 = vpop.permute.xlu0 %8481 }
0x1df8   :  { %v8484_v56 = vunpack.i.h.bf16 %v8482_v52  ;;  %v8483_v18 = vunpack.i.l.bf16 %v8482_v52  ;;  %v8489_v13 = vunpack.i.h.bf16 %v8487_v61  ;;  %v8488_v48 = vunpack.i.l.bf16 %v8487_v61 }
0x1dfa   :  { %v4926_v23 = vpack.c.bf16 %v8484_v56, %v8484_v56  ;;  %v4925_v11 = vpack.c.bf16 %v8483_v18, %v8483_v18  ;;  %v4928_v32 = vpack.c.bf16 %v8489_v13, %v8489_v13  ;;  %v4927_v6 = vpack.c.bf16 %v8488_v48, %v8488_v48 }
0x1dfb   :  { %v8492_v40 = vpop.permute.xlu1 %8491  ;;  %v4933_v39 = vpop.permute.xlu0 %4932 }
0x1dfc   :  { %v4938_v8 = vsel %vm337_vm6, %v4933_v39, 0  ;;  %5030 = vrot.lane.b32.xlu0 %v4925_v11, %s8869_s25  ;;  %5079 = vrot.lane.b32.xlu1 %v4926_v23, %s8869_s25  ;;  %v8493_v16 = vunpack.i.l.bf16 %v8492_v40  ;;  %v8494_v25 = vunpack.i.h.bf16 %v8492_v40 }
0x1dfd   :  { %8100 = vmatpush3.bf16.xpose.msra.mxu0 %v4938_v8 }
0x1dfe   :  { %8111 = vmatprep.subr.bf16.mxu0 %v8865_v7  ;;  %v4929_v57 = vpack.c.bf16 %v8493_v16, %v8493_v16  ;;  %v4930_v37 = vpack.c.bf16 %v8494_v25, %v8494_v25 }
0x1dff   :  { %v4982_v1 = vpop.permute.xlu1 %4981 }
0x1e00   :  { %v4987_v42 = vsel %vm337_vm6, %v4982_v1, 0  ;;  %5128 = vrot.lane.b32.xlu0 %v4927_v6, %s8869_s25  ;;  %5177 = vrot.lane.b32.xlu1 %v4928_v32, %s8869_s25 }
0x1e01   :  { %8106 = vmatpush3.bf16.xpose.msra.mxu1 %v4987_v42 }
0x1e02   :  { %8117 = vmatprep.subr.bf16.mxu1 %v8865_v7 }
0x1e04   :  { %8102 = vmatmul.mubr.msk.bf16.vlgmr.msra.gmra.mrb[160].mxu0 %vm337_vm6, %v4923_v47  ;;  %5226 = vrot.lane.b32.xlu0 %v4929_v57, %s8869_s25 }
0x1e05   :  { %5275 = vrot.lane.b32.xlu1 %v4930_v37, %s8869_s25  ;;  %8113 = vmatprep.mubr.msk.bf16.mxu0 %vm8866_vm5, %v8865_v7 }
0x1e08   :  { %8108 = vmatmul.mubr.msk.bf16.vlgmr.msra.gmra.mrb[148].mxu1 %vm337_vm6, %v4924_v53  ;;  %8501 = vrot.lane.b32.xlu0 %v8505_v20, %s8871_s27 }
0x1e09   :  { %8496 = vrot.lane.b32.xlu1 %v8485_v35, %s8869_s25  ;;  %8119 = vmatprep.mubr.msk.bf16.mxu1 %vm8866_vm5, %v8865_v7 }
0x1e0c   :  { %5425 = vrot.lane.b32.xlu0 %v4923_v47, %s8871_s27 }
0x1e0d   :  { %8506 = vrot.lane.b32.xlu1 %v8505_v20, %s8872_s28 }
0x1e11   :  { %5473 = vrot.lane.b32.xlu1 %v4924_v53, %s8871_s27 }
0x1e6e   :  { %v5031_v33 = vpop.permute.xlu0 %5030  ;;  %v5080_v3 = vpop.permute.xlu1 %5079 }
0x1e6f   :  { %v5036_v29 = vsel %vm337_vm6, %v5031_v33, 0  ;;  %v5085_v12 = vsel %vm337_vm6, %v5080_v3, 0 }
0x1e70   :  { %8112 = vmatpush3.bf16.xpose.msra.mxu0 %v5036_v29  ;;  %8118 = vmatpush3.bf16.xpose.msra.mxu1 %v5085_v12 }
0x1e71   :  { %8123 = vmatprep.subr.bf16.mxu0 %v8865_v7  ;;  %8129 = vmatprep.subr.bf16.mxu1 %v8865_v7 }
0x1e72   :  { %v5129_v43 = vpop.permute.xlu0 %5128  ;;  %v5178_v41 = vpop.permute.xlu1 %5177 }
0x1e73   :  { %v5134_v30 = vsel %vm337_vm6, %v5129_v43, 0  ;;  %v5183_v4 = vsel %vm337_vm6, %v5178_v41, 0 }
0x1e76   :  { %v5227_v36 = vpop.permute.xlu0 %5226 }
0x1e77   :  { %v5276_v38 = vpop.permute.xlu1 %5275  ;;  %8114 = vmatmul.mubr.msk.bf16.vlgmr.msra.gmra.mrb[164].mxu0 %vm337_vm6, %v4925_v11  ;;  %8120 = vmatmul.mubr.msk.bf16.vlgmr.msra.gmra.mrb[152].mxu1 %vm337_vm6, %v4926_v23  ;;  %v5232_v50 = vsel %vm337_vm6, %v5227_v36, 0 }
0x1e78   :  { %8124 = vmatpush3.bf16.xpose.msra.mxu0 %v5134_v30  ;;  %8130 = vmatpush3.bf16.xpose.msra.mxu1 %v5183_v4  ;;  %v5281_v19 = vsel %vm337_vm6, %v5276_v38, 0 }
0x1e79   :  { %8125 = vmatprep.mubr.msk.bf16.mxu0 %vm8866_vm5, %v8865_v7  ;;  %8131 = vmatprep.mubr.msk.bf16.mxu1 %vm8866_vm5, %v8865_v7 }
0x1e7a   :  { %8135 = vmatprep.subr.bf16.mxu0 %v8865_v7  ;;  %8141 = vmatprep.subr.bf16.mxu1 %v8865_v7  ;;  %v10338_v51 = vpop.permute.xlu0 %8501 }
0x1e7b   :  { %v10336_v14 = vpop.permute.xlu1 %8496 }
0x1e7e   :  { %v5426_v21 = vpop.permute.xlu0 %5425 }
0x1e7f   :  { %v10342_v27 = vpop.permute.xlu1 %8506  ;;  %8126 = vmatmul.mubr.msk.bf16.vlgmr.msra.gmra.mrb[168].mxu0 %vm337_vm6, %v4927_v6  ;;  %8132 = vmatmul.mubr.msk.bf16.vlgmr.msra.gmra.mrb[156].mxu1 %vm337_vm6, %v4928_v32  ;;  %v5431_v55 = vsel %vm834_vm7, %v5426_v21, 0 }
0x1e80   :  { %8136 = vmatpush3.bf16.xpose.msra.mxu0 %v5232_v50  ;;  %8142 = vmatpush3.bf16.xpose.msra.mxu1 %v5281_v19 }
0x1e81   :  { %8137 = vmatprep.mubr.msk.bf16.mxu0 %vm8866_vm5, %v8865_v7  ;;  %8143 = vmatprep.mubr.msk.bf16.mxu1 %vm8866_vm5, %v8865_v7 }
0x1e82   :  { %8147 = vmatprep.subr.bf16.mxu0 %v8865_v7  ;;  %8153 = vmatprep.subr.bf16.mxu1 %v8865_v7 }
0x1e83   :  { %v5474_v15 = vpop.permute.xlu1 %5473 }
0x1e84   :  { %v5479_v49 = vsel %vm834_vm7, %v5474_v15, 0 }
0x1e87   :  { %8138 = vmatmul.mubr.msk.bf16.vlgmr.msra.gmra.mrb[172].mxu0 %vm337_vm6, %v4929_v57  ;;  %8144 = vmatmul.mubr.msk.bf16.vlgmr.msra.gmra.mrb[160].mxu1 %vm337_vm6, %v4930_v37 }
0x1e88   :  { %8148 = vmatpush3.bf16.msra.mxu0 %v5431_v55  ;;  %8154 = vmatpush3.bf16.msra.mxu1 %v5479_v49 }
0x1e89   :  { %8149 = vmatprep.mubr.msk.bf16.mxu0 %vm8866_vm5, %v8865_v7  ;;  %8155 = vmatprep.mubr.msk.bf16.mxu1 %vm8866_vm5, %v8865_v7 }
0x1e8a   :  { %8159 = vmatprep.subr.bf16.mxu0 %v8865_v7  ;;  %8165 = vmatprep.subr.bf16.mxu1 %v8865_v7 }
0x1ed7   :  { %v4974_v58 = vpop.f32.mrb[160].mxu0 }
0x1ed8   :  { %v10363_v34 = vadd.f32 %v4974_v58, %v9757_v5  ;;  %v8103_v22 = vpop.f32.mrb[161].mxu0 }
0x1ed9   :  { %v4977_v35 = vpop.f32.mrb[162].mxu0 }
0x1eda   :  { %v8104_v20 = vpop.f32.mrb[163].mxu0  ;;  %v5323_v47 = vsel %vm337_vm6, %v10363_v34, -inf }
0x1edb   :  { %5324 = vmax.xlane.f32.xlu0 %v5323_v47  ;;  %v5023_v53 = vpop.f32.mrb[148].mxu1  ;;  %v8498_v20 = vunpack.i.l.bf16 %v10336_v14 }
0x1edc   :  { %v5024_v61 = vadd.f32 %v5023_v53, %v9757_v5  ;;  %v8109_v52 = vpop.f32.mrb[149].mxu1  ;;  %v8499_v53 = vunpack.i.h.bf16 %v10336_v14 }
0x1edd   :  { %v5026_v56 = vpop.f32.mrb[150].mxu1  ;;  %v5419_v47 = vpack.c.bf16 %v8498_v20, %v8498_v20 }
0x1ede   :  { %v8110_v18 = vpop.f32.mrb[151].mxu1  ;;  %v5326_v13 = vsel %vm337_vm6, %v5024_v61, -inf }
0x1edf   :  { %5327 = vmax.xlane.f32.xlu1 %v5326_v13 }
0x1f4a   :  { %v5072_v48 = vpop.f32.mrb[164].mxu0  ;;  %v5121_v23 = vpop.f32.mrb[152].mxu1 }
0x1f4b   :  { %v10370_v11 = vadd.f32 %v5072_v48, %v9769_v63  ;;  %v8115_v40 = vpop.f32.mrb[165].mxu0  ;;  %v8121_v39 = vpop.f32.mrb[153].mxu1  ;;  %v10373_v6 = vadd.f32 %v5121_v23, %v9769_v63 }
0x1f4c   :  { %v5075_v8 = vpop.f32.mrb[166].mxu0  ;;  %v5124_v32 = vpop.f32.mrb[154].mxu1 }
0x1f4d   :  { %v8116_v16 = vpop.f32.mrb[167].mxu0  ;;  %v8122_v5 = vpop.f32.mrb[155].mxu1  ;;  %v5329_v25 = vsel %vm337_vm6, %v10370_v11, -inf  ;;  %v5332_v1 = vsel %vm337_vm6, %v10373_v6, -inf  ;;  %v8503_v32 = vunpack.i.l.bf16 %v10338_v51 }
0x1f4e   :  { %5330 = vmax.xlane.f32.xlu0 %v5329_v25 }
0x1f52   :  { %v5170_v42 = vpop.f32.mrb[168].mxu0  ;;  %5333 = vmax.xlane.f32.xlu0 %v5332_v1  ;;  %v5219_v57 = vpop.f32.mrb[156].mxu1 }
0x1f53   :  { %v10380_v37 = vadd.f32 %v5170_v42, %v9784_v54  ;;  %v5220_v33 = vadd.f32 %v5219_v57, %v9784_v54  ;;  %v8127_v3 = vpop.f32.mrb[169].mxu0  ;;  %v8133_v63 = vpop.f32.mrb[157].mxu1 }
0x1f54   :  { %v5173_v29 = vpop.f32.mrb[170].mxu0  ;;  %v5222_v12 = vpop.f32.mrb[158].mxu1 }
0x1f55   :  { %v8128_v43 = vpop.f32.mrb[171].mxu0  ;;  %v8134_v41 = vpop.f32.mrb[159].mxu1  ;;  %v5335_v30 = vsel %vm337_vm6, %v10380_v37, -inf  ;;  %v5338_v4 = vsel %vm337_vm6, %v5220_v33, -inf }
0x1f56   :  { %5336 = vmax.xlane.f32.xlu1 %v5335_v30  ;;  %5339 = vmax.xlane.f32.xlu0 %v5338_v4 }
0x1f5a   :  { %v5268_v38 = vpop.f32.mrb[172].mxu0  ;;  %v5317_v36 = vpop.f32.mrb[160].mxu1 }
0x1f5b   :  { %v10387_v50 = vadd.f32 %v5268_v38, %v9799_v24  ;;  %v5318_v54 = vadd.f32 %v5317_v36, %v9799_v24  ;;  %v8139_v19 = vpop.f32.mrb[173].mxu0  ;;  %v8145_v21 = vpop.f32.mrb[161].mxu1  ;;  %v5420_v24 = vpack.c.bf16 %v8499_v53, %v8499_v53  ;;  %v8504_v36 = vunpack.i.h.bf16 %v10338_v51 }
0x1f5c   :  { %v5271_v15 = vpop.f32.mrb[174].mxu0  ;;  %v5320_v55 = vpop.f32.mrb[162].mxu1  ;;  %v8508_v21 = vunpack.i.l.bf16 %v10342_v27 }
0x1f5d   :  { %v8140_v49 = vpop.f32.mrb[175].mxu0  ;;  %v8146_v58 = vpop.f32.mrb[163].mxu1  ;;  %v5341_v22 = vsel %vm337_vm6, %v10387_v50, -inf  ;;  %v5344_v35 = vsel %vm337_vm6, %v5318_v54, -inf  ;;  %v5422_v19 = vpack.c.bf16 %v8504_v36, %v8504_v36 }
0x1f5e   :  { %5342 = vmax.xlane.f32.xlu1 %v5341_v22  ;;  %5345 = vmax.xlane.f32.xlu0 %v5344_v35  ;;  %v5423_v49 = vpack.c.bf16 %v8508_v21, %v8508_v21 }
0x1f68   :  { %v5325_v52 = vpop.xlane.xlu0 %5324 }
0x1f69   :  { %v5347_v18 = vsub.f32 %v10363_v34, %v5325_v52  ;;  %v5421_v34 = vpack.c.bf16 %v8503_v32, %v8503_v32 }
0x1f6b   :  { %v5355_v48 = vmul.f32 1.442695, %v5347_v18 }
0x1f6c   :  { %v5328_v56 = vpop.xlane.xlu1 %5327 }
0x1f6d   :  { %v5348_v13 = vsub.f32 %v5024_v61, %v5328_v56  ;;  %8723 = vpow2.f32 %v5355_v48 }
0x1f6f   :  { %5522 = vrot.lane.b32.xlu1 %v5419_v47, %s8871_s27  ;;  %v5357_v23 = vmul.f32 1.442695, %v5348_v13 }
0x1f71   :  { %8725 = vpow2.f32 %v5357_v23 }
0x1f74   :  { %5571 = vrot.lane.b32.xlu0 %v5420_v24, %s8871_s27 }
0x1f77   :  { %v10398_v40 = vpop.eup %8723 }
0x1f78   :  { %v5371_v14 = vsel %vm337_vm6, %v10398_v40, 0.0 }
0x1f7b   :  { %v10400_v39 = vpop.eup %8725 }
0x1f7c   :  { %v5374_v8 = vsel %vm337_vm6, %v10400_v39, 0.0 }
0x1f93   :  { %5372 = vadd.xlane.f32.xlu1 %v5371_v14  ;;  %5375 = vadd.xlane.f32.xlu0 %v5374_v8 }
0x1fa4   :  { %5620 = vrot.lane.b32.xlu1 %v5421_v34, %s8871_s27 }
0x1fdb   :  { %v5331_v61 = vpop.xlane.xlu0 %5330 }
0x1fdc   :  { %v5349_v16 = vsub.f32 %v10370_v11, %v5331_v61 }
0x1fde   :  { %v5359_v5 = vmul.f32 1.442695, %v5349_v16 }
0x1fdf   :  { %v5334_v25 = vpop.xlane.xlu0 %5333 }
0x1fe0   :  { %8727 = vpow2.f32 %v5359_v5  ;;  %v5350_v1 = vsub.f32 %v10373_v6, %v5334_v25 }
0x1fe2   :  { %v5361_v42 = vmul.f32 1.442695, %v5350_v1 }
0x1fe3   :  { %v5340_v57 = vpop.xlane.xlu0 %5339  ;;  %v5337_v15 = vpop.xlane.xlu1 %5336 }
0x1fe4   :  { %8729 = vpow2.f32 %v5361_v42  ;;  %v5352_v3 = vsub.f32 %v5220_v33, %v5340_v57  ;;  %v5351_v55 = vsub.f32 %v10380_v37, %v5337_v15 }
0x1fe6   :  { %v5365_v63 = vmul.f32 1.442695, %v5352_v3  ;;  %v5363_v22 = vmul.f32 1.442695, %v5351_v55 }
0x1fe8   :  { %8731 = vpow2.f32 %v5365_v63 }
0x1fea   :  { %v10410_v29 = vpop.eup %8727 }
0x1feb   :  { %v5346_v12 = vpop.xlane.xlu0 %5345  ;;  %v5377_v43 = vsel %vm337_vm6, %v10410_v29, 0.0  ;;  %v5343_v58 = vpop.xlane.xlu1 %5342 }
0x1fec   :  { %v5354_v41 = vsub.f32 %v5318_v54, %v5346_v12  ;;  %5378 = vadd.xlane.f32.xlu0 %v5377_v43  ;;  %v5353_v35 = vsub.f32 %v10387_v50, %v5343_v58 }
0x1fee   :  { %v10414_v11 = vpop.eup %8729  ;;  %v5369_v30 = vmul.f32 1.442695, %v5354_v41  ;;  %v5367_v51 = vmul.f32 1.442695, %v5353_v35 }
0x1fef   :  { %v5380_v6 = vsel %vm337_vm6, %v10414_v11, 0.0  ;;  %v5523_v20 = vpop.permute.xlu1 %5522  ;;  %v5572_v47 = vpop.permute.xlu0 %5571 }
0x1ff0   :  { %5381 = vadd.xlane.f32.xlu1 %v5380_v6  ;;  %8733 = vpow2.f32 %v5369_v30  ;;  %v5528_v32 = vsel %vm834_vm7, %v5523_v20, 0  ;;  %v5577_v34 = vsel %vm834_vm7, %v5572_v47, 0  ;;  %v7342_v47 = vld [vmem:[%s10854_s6 + $0xb0] sm:$0xff] }
0x1ff1   :  { %8735 = vpow2.f32 %v5363_v22 }
0x1ff2   :  { %v10418_v4 = vpop.eup %8731  ;;  %8737 = vpow2.f32 %v5367_v51 }
0x1ff3   :  { %v5386_v33 = vsel %vm337_vm6, %v10418_v4, 0.0 }
0x1ff4   :  { %5387 = vadd.xlane.f32.xlu1 %v5386_v33 }
0x1ffa   :  { %v10422_v38 = vpop.eup %8733 }
0x1ffb   :  { %v5392_v54 = vsel %vm337_vm6, %v10422_v38, 0.0  ;;  %v10432_v53 = vpop.eup %8735 }
0x1ffc   :  { %5393 = vadd.xlane.f32.xlu1 %v5392_v54  ;;  %v5383_v56 = vsel %vm337_vm6, %v10432_v53, 0.0  ;;  %v10436_v37 = vpop.eup %8737 }
0x1ffd   :  { %v5389_v50 = vsel %vm337_vm6, %v10436_v37, 0.0 }
0x2002   :  { %5669 = vrot.lane.b32.xlu0 %v5422_v19, %s8871_s27 }
0x200d   :  { %5718 = vrot.lane.b32.xlu1 %v5423_v49, %s8871_s27 }
0x2020   :  { %v5373_v24 = vpop.xlane.xlu1 %5372  ;;  %v5376_v52 = vpop.xlane.xlu0 %5375 }
0x2021   :  { %8739 = vrcp.f32 %v5373_v24  ;;  %5384 = vadd.xlane.f32.xlu0 %v5383_v56 }
0x2022   :  { %8741 = vrcp.f32 %v5376_v52 }
0x2024   :  { %v5621_v61 = vpop.permute.xlu1 %5620 }
0x2025   :  { %5390 = vadd.xlane.f32.xlu0 %v5389_v50 }
0x202b   :  { %v8740_v18 = vpop.eup %8739 }
0x202c   :  { %v8742_v13 = vpop.eup %8741  ;;  %v5403_v48 = vmul.f32 %v8740_v18, %v10398_v40  ;;  %v8509_v40 = vunpack.i.h.bf16 %v10342_v27  ;;  %v5626_v27 = vsel %vm834_vm7, %v5621_v61, 0 }
0x202d   :  { %v5404_v23 = vmul.f32 %v8742_v13, %v10400_v39 }
0x202e   :  { %v5411_v14 = vpack.c.bf16 %v5403_v48, %v5403_v48  ;;  %v5424_v39 = vpack.c.bf16 %v8509_v40, %v8509_v40 }
0x202f   :  { %v5412_v8 = vpack.c.bf16 %v5404_v23, %v5404_v23 }
0x2030   :  { %8150 = vmatmul.mubr.msk.bf16.vlgmr.msra.gmra.mrb[176].mxu0 %vm337_vm6, %v5411_v14 }
0x2031   :  { %8156 = vmatmul.mubr.msk.bf16.vlgmr.msra.gmra.mrb[164].mxu1 %vm337_vm6, %v5412_v8  ;;  %8160 = vmatpush3.bf16.msra.mxu0 %v5528_v32 }
0x2032   :  { %8166 = vmatpush3.bf16.msra.mxu1 %v5577_v34  ;;  %8161 = vmatprep.mubr.msk.bf16.mxu0 %vm8866_vm5, %v8865_v7 }
0x2033   :  { %8171 = vmatprep.subr.bf16.mxu0 %v8865_v7  ;;  %8167 = vmatprep.mubr.msk.bf16.mxu1 %vm8866_vm5, %v8865_v7 }
0x2034   :  { %8177 = vmatprep.subr.bf16.mxu1 %v8865_v7 }
0x203b   :  { %5767 = vrot.lane.b32.xlu0 %v5424_v39, %s8871_s27 }
0x203f   :  { %5902 = vrot.lane.b32.xlu0 %v10259_v28, %s8872_s28 }
0x2079   :  { %v5379_v16 = vpop.xlane.xlu0 %5378 }
0x207a   :  { %8743 = vrcp.f32 %v5379_v16 }
0x207d   :  { %v5382_v5 = vpop.xlane.xlu1 %5381  ;;  %v5670_v12 = vpop.permute.xlu0 %5669 }
0x207e   :  { %8745 = vrcp.f32 %v5382_v5  ;;  %v5675_v30 = vsel %vm834_vm7, %v5670_v12, 0 }
0x2081   :  { %v5388_v25 = vpop.xlane.xlu1 %5387 }
0x2082   :  { %8747 = vrcp.f32 %v5388_v25 }
0x2084   :  { %v8744_v1 = vpop.eup %8743 }
0x2085   :  { %v5405_v42 = vmul.f32 %v8744_v1, %v10410_v29 }
0x2087   :  { %v5413_v57 = vpack.c.bf16 %v5405_v42, %v5405_v42 }
0x2088   :  { %v8746_v3 = vpop.eup %8745 }
0x2089   :  { %v5406_v63 = vmul.f32 %v8746_v3, %v10414_v11  ;;  %8162 = vmatmul.mubr.msk.bf16.vlgmr.msra.gmra.mrb[180].mxu0 %vm337_vm6, %v5413_v57  ;;  %v5394_v6 = vpop.xlane.xlu1 %5393 }
0x208a   :  { %8172 = vmatpush3.bf16.msra.mxu0 %v5626_v27  ;;  %8173 = vmatprep.mubr.msk.bf16.mxu0 %vm8866_vm5, %v8865_v7  ;;  %8749 = vrcp.f32 %v5394_v6 }
0x208b   :  { %v5414_v43 = vpack.c.bf16 %v5406_v63, %v5406_v63  ;;  %8183 = vmatprep.subr.bf16.mxu0 %v8865_v7 }
0x208c   :  { %v8748_v41 = vpop.eup %8747 }
0x208d   :  { %8168 = vmatmul.mubr.msk.bf16.vlgmr.msra.gmra.mrb[168].mxu1 %vm337_vm6, %v5414_v43  ;;  %v5408_v29 = vmul.f32 %v8748_v41, %v10418_v4  ;;  %v5719_v58 = vpop.permute.xlu1 %5718 }
0x208e   :  { %8178 = vmatpush3.bf16.msra.mxu1 %v5675_v30  ;;  %8179 = vmatprep.mubr.msk.bf16.mxu1 %vm8866_vm5, %v8865_v7  ;;  %v5724_v51 = vsel %vm834_vm7, %v5719_v58, 0 }
0x208f   :  { %8189 = vmatprep.subr.bf16.mxu1 %v8865_v7  ;;  %v5416_v11 = vpack.c.bf16 %v5408_v29, %v5408_v29 }
0x2094   :  { %v8750_v36 = vpop.eup %8749 }
0x2095   :  { %8180 = vmatmul.mubr.msk.bf16.vlgmr.msra.gmra.mrb[172].mxu1 %vm337_vm6, %v5416_v11  ;;  %v5410_v19 = vmul.f32 %v8750_v36, %v10422_v38 }
0x2096   :  { %8191 = vmatprep.mubr.msk.bf16.mxu1 %vm8866_vm5, %v8865_v7 }
0x2097   :  { %v5418_v55 = vpack.c.bf16 %v5410_v19, %v5410_v19 }
0x20ae   :  { %v5385_v33 = vpop.xlane.xlu0 %5384 }
0x20af   :  { %8751 = vrcp.f32 %v5385_v33 }
0x20b2   :  { %v5391_v54 = vpop.xlane.xlu0 %5390 }
0x20b3   :  { %8753 = vrcp.f32 %v5391_v54 }
0x20b6   :  { %v5768_v21 = vpop.permute.xlu0 %5767 }
0x20b7   :  { %v5773_v4 = vsel %vm834_vm7, %v5768_v21, 0 }
0x20b8   :  { %8190 = vmatpush3.bf16.msra.mxu1 %v5773_v4 }
0x20b9   :  { %v8752_v15 = vpop.eup %8751 }
0x20ba   :  { %v5407_v49 = vmul.f32 %v8752_v15, %v10432_v53  ;;  %v5903_v34 = vpop.permute.xlu0 %5902 }
0x20bb   :  { %8192 = vmatmul.mubr.msk.bf16.vlgmr.msra.gmra.mrb[176].mxu1 %vm337_vm6, %v5418_v55 }
0x20bc   :  { %v5415_v22 = vpack.c.bf16 %v5407_v49, %v5407_v49  ;;  %5948 = vmatprep.mubr.bf16.mxu1 %v8864_v2  ;;  %v7338_v2 = vld [vmem:[%s10854_s6 + $0x90] sm:$0xff] }
0x20bd   :  { %v8754_v35 = vpop.eup %8753  ;;  %v5898_v53 = vpack.c.bf16 %v7342_v47, %v7338_v2  ;;  %v7350_v2 = vld [vmem:[%s10854_s6 + $0xf0] sm:$0xff] }
0x20be   :  { %8174 = vmatmul.mubr.msk.bf16.vlgmr.msra.gmra.mrb[184].mxu0 %vm337_vm6, %v5415_v22  ;;  %v5409_v38 = vmul.f32 %v8754_v35, %v10436_v37 }
0x20bf   :  { %8184 = vmatpush3.bf16.msra.mxu0 %v5724_v51  ;;  %8185 = vmatprep.mubr.msk.bf16.mxu0 %vm8866_vm5, %v8865_v7 }
0x20c0   :  { %8195 = vmatprep.subr.bf16.mxu0 %v8865_v7  ;;  %v5417_v20 = vpack.c.bf16 %v5409_v38, %v5409_v38  ;;  %5904 = vrot.lane.b32.xlu1 %v5898_v53, %s8872_s28 }
0x20c4   :  { %5906 = vrot.lane.b32.xlu1 %v10277_v31, %s8872_s28 }
0x20c6   :  { %8186 = vmatmul.mubr.msk.bf16.vlgmr.msra.gmra.mrb[188].mxu0 %vm337_vm6, %v5417_v20  ;;  %v7346_v20 = vld [vmem:[%s10854_s6 + $0xd0] sm:$0xff] }
0x20c7   :  { %8199 = vmatprep.mubr.msk.bf16.mxu0 %vm8866_vm5, %v8865_v7  ;;  %v5899_v47 = vpack.c.bf16 %v7350_v2, %v7346_v20 }
0x2103   :  { %v5467_v24 = vpop.f32.mrb[176].mxu0 }
0x2104   :  { %v5515_v52 = vpop.f32.mrb[164].mxu1  ;;  %v8151_v56 = vpop.f32.mrb[177].mxu0 }
0x2105   :  { %v8157_v37 = vpop.f32.mrb[165].mxu1  ;;  %v5470_v50 = vpop.f32.mrb[178].mxu0 }
0x2106   :  { %v5518_v18 = vpop.f32.mrb[166].mxu1  ;;  %v8152_v13 = vpop.f32.mrb[179].mxu0 }
0x2107   :  { %v8158_v48 = vpop.f32.mrb[167].mxu1 }
0x2132   :  { %v5905_v61 = vpop.permute.xlu1 %5904 }
0x2133   :  { %v5910_v25 = vsel %vm87_vm4, %v5903_v34, %v5905_v61  ;;  %5916 = vmatprep.subr.bf16.mxu1 %v5905_v61 }
0x2134   :  { %5917 = vmatpush1.bf16.msra.mxu1 %v5910_v25 }
0x2136   :  { %v5907_v53 = vpop.permute.xlu1 %5906 }
0x215c   :  { %v5564_v23 = vpop.f32.mrb[180].mxu0 }
0x215d   :  { %v5815_v14 = vadd.f32 %v5564_v23, %v5467_v24  ;;  %v8163_v8 = vpop.f32.mrb[181].mxu0 }
0x215e   :  { %v5567_v32 = vpop.f32.mrb[182].mxu0 }
0x215f   :  { %v8164_v40 = vpop.f32.mrb[183].mxu0 }
0x2160   :  { %v5613_v39 = vpop.f32.mrb[168].mxu1 }
0x2161   :  { %v5816_v16 = vadd.f32 %v5613_v39, %v5515_v52  ;;  %v8169_v5 = vpop.f32.mrb[169].mxu1 }
0x2162   :  { %v5616_v1 = vpop.f32.mrb[170].mxu1 }
0x2163   :  { %v8170_v42 = vpop.f32.mrb[171].mxu1 }
0x2168   :  { %v5711_v57 = vpop.f32.mrb[172].mxu1 }
0x2169   :  { %v5818_v3 = vadd.f32 %v5816_v16, %v5711_v57  ;;  %v8181_v27 = vpop.f32.mrb[173].mxu1 }
0x216a   :  { %v5714_v63 = vpop.f32.mrb[174].mxu1 }
0x216b   :  { %v8182_v12 = vpop.f32.mrb[175].mxu1 }
0x218e   :  { %v5809_v43 = vpop.f32.mrb[176].mxu1 }
0x218f   :  { %v5820_v41 = vadd.f32 %v5818_v3, %v5809_v43  ;;  %v8193_v30 = vpop.f32.mrb[177].mxu1 }
0x2190   :  { %v5812_v29 = vpop.f32.mrb[178].mxu1 }
0x2191   :  { %v10497_v11 = vadd.f32 %v5820_v41, %v10245_v0  ;;  %v5662_v6 = vpop.f32.mrb[184].mxu0  ;;  %v8194_v33 = vpop.f32.mrb[179].mxu1 }
0x2192   :  { %v5817_v36 = vadd.f32 %v5815_v14, %v5662_v6  ;;  %v8175_v54 = vpop.f32.mrb[185].mxu0 }
0x2193   :  { %v5665_v19 = vpop.f32.mrb[186].mxu0  ;;  %v5824_v21 = vmul.f32 %v10497_v11, %v10497_v11 }
0x2194   :  { %v8176_v4 = vpop.f32.mrb[187].mxu0 }
0x2195   :  { %v5828_v15 = vsel %vm87_vm4, %v5824_v21, 0.0 }
0x2196   :  { %5829 = vadd.xlane.f32.xlu0 %v5828_v15 }
0x2199   :  { %v5760_v55 = vpop.f32.mrb[188].mxu0 }
0x219a   :  { %v5819_v49 = vadd.f32 %v5817_v36, %v5760_v55  ;;  %v8187_v58 = vpop.f32.mrb[189].mxu0 }
0x219b   :  { %v5763_v22 = vpop.f32.mrb[190].mxu0 }
0x219c   :  { %v10503_v35 = vadd.f32 %v5819_v49, %v10242_v17  ;;  %v8188_v0 = vpop.f32.mrb[191].mxu0 }
0x219e   :  { %v5823_v51 = vmul.f32 %v10503_v35, %v10503_v35 }
0x21a0   :  { %v5825_v38 = vsel %vm87_vm4, %v5823_v51, 0.0 }
0x21a1   :  { %5826 = vadd.xlane.f32.xlu1 %v5825_v38 }
0x21ac   :  { %5908 = vrot.lane.b32.xlu0 %v5899_v47, %s8872_s28 }
0x21b0   :  { %5850 = vrot.lane.b32.xlu0 %v10277_v31, %s8871_s27 }
0x21b2   :  { %5848 = vrot.lane.b32.xlu1 %v10259_v28, %s8871_s27 }
0x2223   :  { %v5830_v17 = vpop.xlane.xlu0 %5829 }
0x2224   :  { %v5832_v24 = vmul.f32 0.03125, %v5830_v17 }
0x2226   :  { %v5834_v37 = vadd.f32 1e-06, %v5832_v24 }
0x2227   :  { %v5909_v52 = vpop.permute.xlu0 %5908 }
0x2228   :  { %v5911_v56 = vsel %vm87_vm4, %v5907_v53, %v5909_v52  ;;  %5918 = vmatprep.subr.bf16.mxu1 %v5909_v52  ;;  %8755 = vrsqrt.f32 %v5834_v37 }
0x2229   :  { %5919 = vmatpush1.bf16.msra.mxu1 %v5911_v56 }
0x222a   :  { %8209 = vmatprep.subr.bf16.mxu1 %v8865_v7 }
0x222b   :  { %v5851_v13 = vpop.permute.xlu0 %5850 }
0x222c   :  { %7370 = vmatmul.mubr.msk.bf16.vlgmr.msra.gmra.mrb[180].mxu1 %vm87_vm4, %v9943_v59  ;;  %v5842_v59 = vrot.slane %v10287_v10, %v1246_v26 }
0x222d   :  { %8211 = vmatprep.mubr.msk.bf16.mxu1 %vm8866_vm5, %v8865_v7 }
0x222e   :  { %v5827_v31 = vpop.xlane.xlu1 %5826 }
0x222f   :  { %v5831_v28 = vmul.f32 0.03125, %v5827_v31 }
0x2231   :  { %v5833_v50 = vadd.f32 1e-06, %v5831_v28 }
0x2232   :  { %v5849_v18 = vpop.permute.xlu1 %5848  ;;  %v8756_v48 = vpop.eup %8755 }
0x2233   :  { %8757 = vrsqrt.f32 %v5833_v50  ;;  %8196 = vmatpush3.bf16.msra.mxu0 %v5849_v18  ;;  %v5838_v23 = vmul.f32 %v8756_v48, %v10497_v11 }
0x2234   :  { %8197 = vmatprep.subr.bf16.mxu0 %v8865_v7 }
0x2235   :  { %v5844_v34 = vmul.f32 %v5842_v59, %v5838_v23 }
0x2237   :  { %8198 = vmatpush3.bf16.msra.mxu0 %v5851_v13 }
0x2238   :  { %8203 = vmatprep.subr.bf16.mxu0 %v8865_v7 }
0x223d   :  { %v8758_v14 = vpop.eup %8757 }
0x223e   :  { %v5837_v8 = vmul.f32 %v8758_v14, %v10503_v35 }
0x2240   :  { %v5843_v32 = vmul.f32 %v5842_v59, %v5837_v8 }
0x2242   :  { %v5845_v40 = vpack.c.bf16 %v5844_v34, %v5843_v32 }
0x2244   :  { %8200 = vmatmul.mubr.msk.bf16.vlgmr.msra.gmra.mrb[192].mxu0 %vm87_vm4, %v5845_v40 }
0x2245   :  { %8205 = vmatprep.mubr.msk.bf16.mxu0 %vm8866_vm5, %v8865_v7 }
0x22ff   :  { %v5950_v39 = vpop.f32.mrb[180].mxu1 }
0x2300   :  { %v5952_v61 = vpop.f32.mrb[181].mxu1  ;;  %v6027_v16 = vpack.c.bf16 %v5950_v39, %v5950_v39 }
0x2301   :  { %v5954_v5 = vpop.f32.mrb[182].mxu1 }
0x2302   :  { %v5956_v25 = vpop.f32.mrb[183].mxu1  ;;  %v6039_v1 = vsel %vm337_vm6, %v6027_v16, 0  ;;  %v8510_v42 = vpack.i.bf16 %v5954_v5, %v5950_v39  ;;  %v10536_v26 = vpack.c.bf16 %v5954_v5, %v5954_v5 }
0x2303   :  { %v8550_v10 = vpack.i.bf16 %v5956_v25, %v5952_v61  ;;  %8204 = vmatpush3.bf16.xpose.msra.mxu0 %v6039_v1 }
0x2304   :  { %8511 = vrot.lane.b32.xlu1 %v8510_v42, %s8868_s24  ;;  %v6085_v57 = vsel %vm337_vm6, %v10536_v26, 0  ;;  %8215 = vmatprep.subr.bf16.mxu0 %v8865_v7 }
0x2305   :  { %8210 = vmatpush3.bf16.xpose.msra.mxu1 %v6085_v57 }
0x2306   :  { %8221 = vmatprep.subr.bf16.mxu1 %v8865_v7 }
0x2308   :  { %8521 = vrot.lane.b32.xlu1 %v8510_v42, %s8867_s23 }
0x230c   :  { %8531 = vrot.lane.b32.xlu1 %v8510_v42, %s8870_s26 }
0x2310   :  { %8546 = vrot.lane.b32.xlu1 %v8510_v42, %s8871_s27 }
0x2314   :  { %8551 = vrot.lane.b32.xlu1 %v8550_v10, %s8872_s28 }
0x2317   :  { %v5891_v3 = vpop.f32.mrb[192].mxu0 }
0x2318   :  { %v6019_v27 = vpack.c.bf16 %v5891_v3, %v5891_v3  ;;  %v8201_v63 = vpop.f32.mrb[193].mxu0  ;;  %6506 = vrot.lane.b32.xlu1 %v6027_v16, %s8869_s25 }
0x2319   :  { %v5894_v12 = vpop.f32.mrb[194].mxu0 }
0x231a   :  { %v8535_v43 = vpack.i.bf16 %v5894_v12, %v5891_v3  ;;  %v6020_v41 = vpack.c.bf16 %v5894_v12, %v5894_v12  ;;  %v8202_v30 = vpop.f32.mrb[195].mxu0  ;;  %8206 = vmatmul.mubr.msk.bf16.vlgmr.msra.gmra.mrb[196].mxu0 %vm337_vm6, %v6019_v27 }
0x231b   :  { %8217 = vmatprep.mubr.msk.bf16.mxu0 %vm8866_vm5, %v8865_v7 }
0x231c   :  { %8516 = vrot.lane.b32.xlu0 %v8535_v43, %s8868_s24  ;;  %8212 = vmatmul.mubr.msk.bf16.vlgmr.msra.gmra.mrb[184].mxu1 %vm337_vm6, %v6020_v41 }
0x231d   :  { %8223 = vmatprep.mubr.msk.bf16.mxu1 %vm8866_vm5, %v8865_v7 }
0x2320   :  { %8526 = vrot.lane.b32.xlu0 %v8535_v43, %s8867_s23 }
0x2324   :  { %8536 = vrot.lane.b32.xlu0 %v8535_v43, %s8870_s26 }
0x2328   :  { %8541 = vrot.lane.b32.xlu0 %v8510_v42, %s8869_s25 }
0x2376   :  { %v8512_v29 = vpop.permute.xlu1 %8511 }
0x2377   :  { %v8514_v6 = vunpack.i.h.bf16 %v8512_v29  ;;  %v8513_v33 = vunpack.i.l.bf16 %v8512_v29 }
0x2379   :  { %v6030_v36 = vpack.c.bf16 %v8514_v6, %v8514_v6  ;;  %v6029_v54 = vpack.c.bf16 %v8513_v33, %v8513_v33 }
0x237a   :  { %v8522_v4 = vpop.permute.xlu1 %8521 }
0x237b   :  { %v6131_v19 = vsel %vm337_vm6, %v6029_v54, 0  ;;  %v6177_v21 = vsel %vm337_vm6, %v6030_v36, 0  ;;  %v8524_v15 = vunpack.i.h.bf16 %v8522_v4  ;;  %v8523_v55 = vunpack.i.l.bf16 %v8522_v4 }
0x237c   :  { %8216 = vmatpush3.bf16.xpose.msra.mxu0 %v6131_v19  ;;  %8222 = vmatpush3.bf16.xpose.msra.mxu1 %v6177_v21 }
0x237d   :  { %8227 = vmatprep.subr.bf16.mxu0 %v8865_v7  ;;  %8233 = vmatprep.subr.bf16.mxu1 %v8865_v7  ;;  %v6032_v22 = vpack.c.bf16 %v8524_v15, %v8524_v15  ;;  %v6031_v0 = vpack.c.bf16 %v8523_v55, %v8523_v55 }
0x237e   :  { %v8532_v49 = vpop.permute.xlu1 %8531 }
0x237f   :  { %v8534_v17 = vunpack.i.h.bf16 %v8532_v49  ;;  %v8533_v53 = vunpack.i.l.bf16 %v8532_v49  ;;  %v6223_v24 = vsel %vm337_vm6, %v6031_v0, 0  ;;  %v6269_v52 = vsel %vm337_vm6, %v6032_v22, 0 }
0x2381   :  { %v6034_v28 = vpack.c.bf16 %v8534_v17, %v8534_v17  ;;  %v6033_v50 = vpack.c.bf16 %v8533_v53, %v8533_v53 }
0x2382   :  { %v10566_v56 = vpop.permute.xlu1 %8546 }
0x2383   :  { %v6315_v59 = vsel %vm337_vm6, %v6033_v50, 0  ;;  %v6361_v14 = vsel %vm337_vm6, %v6034_v28, 0 }
0x2386   :  { %v10574_v48 = vpop.permute.xlu1 %8551 }
0x238a   :  { %v6507_v34 = vpop.permute.xlu1 %6506 }
0x238b   :  { %v6512_v61 = vsel %vm834_vm7, %v6507_v34, 0 }
0x238e   :  { %v8517_v58 = vpop.permute.xlu0 %8516 }
0x238f   :  { %v8519_v51 = vunpack.i.h.bf16 %v8517_v58  ;;  %v8518_v38 = vunpack.i.l.bf16 %v8517_v58 }
0x2391   :  { %v6022_v20 = vpack.c.bf16 %v8519_v51, %v8519_v51  ;;  %v6021_v2 = vpack.c.bf16 %v8518_v38, %v8518_v38 }
0x2392   :  { %v8527_v47 = vpop.permute.xlu0 %8526 }
0x2393   :  { %8218 = vmatmul.mubr.msk.bf16.vlgmr.msra.gmra.mrb[200].mxu0 %vm337_vm6, %v6021_v2  ;;  %8224 = vmatmul.mubr.msk.bf16.vlgmr.msra.gmra.mrb[188].mxu1 %vm337_vm6, %v6022_v20  ;;  %v8529_v37 = vunpack.i.h.bf16 %v8527_v47  ;;  %v8528_v31 = vunpack.i.l.bf16 %v8527_v47 }
0x2394   :  { %8228 = vmatpush3.bf16.xpose.msra.mxu0 %v6223_v24  ;;  %8234 = vmatpush3.bf16.xpose.msra.mxu1 %v6269_v52 }
0x2395   :  { %8229 = vmatprep.mubr.msk.bf16.mxu0 %vm8866_vm5, %v8865_v7  ;;  %8235 = vmatprep.mubr.msk.bf16.mxu1 %vm8866_vm5, %v8865_v7  ;;  %v6024_v18 = vpack.c.bf16 %v8529_v37, %v8529_v37  ;;  %v6023_v13 = vpack.c.bf16 %v8528_v31, %v8528_v31 }
0x2396   :  { %8239 = vmatprep.subr.bf16.mxu0 %v8865_v7  ;;  %8245 = vmatprep.subr.bf16.mxu1 %v8865_v7  ;;  %v8537_v23 = vpop.permute.xlu0 %8536 }
0x2397   :  { %v8539_v8 = vunpack.i.h.bf16 %v8537_v23  ;;  %v8538_v32 = vunpack.i.l.bf16 %v8537_v23 }
0x2399   :  { %v6026_v40 = vpack.c.bf16 %v8539_v8, %v8539_v8  ;;  %v6025_v39 = vpack.c.bf16 %v8538_v32, %v8538_v32 }
0x239a   :  { %v8542_v8 = vpop.permute.xlu0 %8541 }
0x239b   :  { %8230 = vmatmul.mubr.msk.bf16.vlgmr.msra.gmra.mrb[204].mxu0 %vm337_vm6, %v6023_v13  ;;  %8236 = vmatmul.mubr.msk.bf16.vlgmr.msra.gmra.mrb[192].mxu1 %vm337_vm6, %v6024_v18  ;;  %v8543_v32 = vunpack.i.l.bf16 %v8542_v8 }
0x239c   :  { %8240 = vmatpush3.bf16.xpose.msra.mxu0 %v6315_v59  ;;  %8246 = vmatpush3.bf16.xpose.msra.mxu1 %v6361_v14 }
0x239d   :  { %8241 = vmatprep.mubr.msk.bf16.mxu0 %vm8866_vm5, %v8865_v7  ;;  %8247 = vmatprep.mubr.msk.bf16.mxu1 %vm8866_vm5, %v8865_v7  ;;  %v6499_v34 = vpack.c.bf16 %v8543_v32, %v8543_v32 }
0x239e   :  { %8251 = vmatprep.subr.bf16.mxu0 %v8865_v7  ;;  %8257 = vmatprep.subr.bf16.mxu1 %v8865_v7 }
0x23a3   :  { %8242 = vmatmul.mubr.msk.bf16.vlgmr.msra.gmra.mrb[208].mxu0 %vm337_vm6, %v6025_v39  ;;  %8248 = vmatmul.mubr.msk.bf16.vlgmr.msra.gmra.mrb[196].mxu1 %vm337_vm6, %v6026_v40 }
0x23a4   :  { %8252 = vmatpush3.bf16.msra.mxu0 %v6512_v61  ;;  %8253 = vmatprep.mubr.msk.bf16.mxu0 %vm8866_vm5, %v8865_v7 }
0x23a5   :  { %8263 = vmatprep.subr.bf16.mxu0 %v8865_v7  ;;  %8259 = vmatprep.mubr.msk.bf16.mxu1 %vm8866_vm5, %v8865_v7 }
0x23ed   :  { %v6075_v16 = vpop.f32.mrb[196].mxu0 }
0x23ee   :  { %v6076_v5 = vadd.f32 %v6075_v16, %v9103_v60  ;;  %v8207_v25 = vpop.f32.mrb[197].mxu0 }
0x23ef   :  { %v6078_v1 = vpop.f32.mrb[198].mxu0  ;;  %v6121_v42 = vpop.f32.mrb[184].mxu1 }
0x23f0   :  { %v10596_v10 = vadd.f32 %v6121_v42, %v9109_v62  ;;  %v8208_v57 = vpop.f32.mrb[199].mxu0  ;;  %v8213_v3 = vpop.f32.mrb[185].mxu1  ;;  %v6403_v27 = vsel %vm337_vm6, %v6076_v5, -inf  ;;  %v8544_v42 = vunpack.i.h.bf16 %v8542_v8 }
0x23f1   :  { %6404 = vmax.xlane.f32.xlu1 %v6403_v27  ;;  %v6124_v63 = vpop.f32.mrb[186].mxu1 }
0x23f2   :  { %v8214_v12 = vpop.f32.mrb[187].mxu1  ;;  %v6406_v43 = vsel %vm337_vm6, %v10596_v10, -inf  ;;  %v6500_v57 = vpack.c.bf16 %v8544_v42, %v8544_v42  ;;  %v8549_v63 = vunpack.i.h.bf16 %v10566_v56 }
0x23f3   :  { %6407 = vmax.xlane.f32.xlu0 %v6406_v43 }
0x23f4   :  { %v6502_v12 = vpack.c.bf16 %v8549_v63, %v8549_v63 }
0x2466   :  { %v6167_v41 = vpop.f32.mrb[200].mxu0  ;;  %v6213_v30 = vpop.f32.mrb[188].mxu1 }
0x2467   :  { %v10602_v29 = vadd.f32 %v6167_v41, %v9103_v60  ;;  %v10605_v6 = vadd.f32 %v6213_v30, %v9109_v62  ;;  %v8219_v33 = vpop.f32.mrb[201].mxu0  ;;  %v8225_v36 = vpop.f32.mrb[189].mxu1 }
0x2468   :  { %v6170_v54 = vpop.f32.mrb[202].mxu0  ;;  %v6216_v19 = vpop.f32.mrb[190].mxu1 }
0x2469   :  { %v8220_v21 = vpop.f32.mrb[203].mxu0  ;;  %v8226_v4 = vpop.f32.mrb[191].mxu1  ;;  %v6409_v15 = vsel %vm337_vm6, %v10602_v29, -inf  ;;  %v6412_v55 = vsel %vm337_vm6, %v10605_v6, -inf }
0x246a   :  { %6410 = vmax.xlane.f32.xlu0 %v6409_v15  ;;  %6413 = vmax.xlane.f32.xlu1 %v6412_v55 }
0x246e   :  { %v6259_v49 = vpop.f32.mrb[204].mxu0  ;;  %v6305_v58 = vpop.f32.mrb[192].mxu1 }
0x246f   :  { %v6260_v22 = vadd.f32 %v6259_v49, %v9103_v60  ;;  %v10613_v0 = vadd.f32 %v6305_v58, %v9109_v62  ;;  %v8231_v51 = vpop.f32.mrb[205].mxu0  ;;  %v8237_v38 = vpop.f32.mrb[193].mxu1 }
0x2470   :  { %v6262_v20 = vpop.f32.mrb[206].mxu0  ;;  %v6308_v2 = vpop.f32.mrb[194].mxu1 }
0x2471   :  { %v8232_v47 = vpop.f32.mrb[207].mxu0  ;;  %v8238_v17 = vpop.f32.mrb[195].mxu1  ;;  %v6415_v53 = vsel %vm337_vm6, %v6260_v22, -inf  ;;  %v6418_v24 = vsel %vm337_vm6, %v10613_v0, -inf }
0x2472   :  { %6416 = vmax.xlane.f32.xlu0 %v6415_v53  ;;  %6419 = vmax.xlane.f32.xlu1 %v6418_v24  ;;  %v8548_v17 = vunpack.i.l.bf16 %v10566_v56  ;;  %v8554_v24 = vunpack.i.h.bf16 %v10574_v48 }
0x2474   :  { %v6501_v53 = vpack.c.bf16 %v8548_v17, %v8548_v17 }
0x2476   :  { %v6351_v52 = vpop.f32.mrb[208].mxu0  ;;  %v6397_v37 = vpop.f32.mrb[196].mxu1 }
0x2477   :  { %v6352_v31 = vadd.f32 %v6351_v52, %v9103_v60  ;;  %v8243_v28 = vpop.f32.mrb[209].mxu0  ;;  %v8249_v50 = vpop.f32.mrb[197].mxu1  ;;  %v10624_v61 = vadd.f32 %v6397_v37, %v9109_v62  ;;  %v6504_v52 = vpack.c.bf16 %v8554_v24, %v8554_v24 }
0x2478   :  { %v6354_v18 = vpop.f32.mrb[210].mxu0  ;;  %v6400_v13 = vpop.f32.mrb[198].mxu1 }
0x2479   :  { %v8244_v23 = vpop.f32.mrb[211].mxu0  ;;  %v8250_v59 = vpop.f32.mrb[199].mxu1  ;;  %v6421_v14 = vsel %vm337_vm6, %v6352_v31, -inf  ;;  %v6424_v16 = vsel %vm337_vm6, %v10624_v61, -inf }
0x247a   :  { %6422 = vmax.xlane.f32.xlu0 %v6421_v14 }
0x247e   :  { %v6405_v40 = vpop.xlane.xlu1 %6404 }
0x247f   :  { %v6427_v39 = vsub.f32 %v6076_v5, %v6405_v40 }
0x2481   :  { %v6435_v60 = vmul.f32 1.442695, %v6427_v39 }
0x2483   :  { %6604 = vrot.lane.b32.xlu1 %v6499_v34, %s8869_s25  ;;  %8759 = vpow2.f32 %v6435_v60  ;;  %v8553_v60 = vunpack.i.l.bf16 %v10574_v48 }
0x248d   :  { %v10628_v25 = vpop.eup %8759 }
0x248e   :  { %v6451_v1 = vsel %vm337_vm6, %v10628_v25, 0.0 }
0x2490   :  { %6555 = vrot.lane.b32.xlu0 %v10536_v26, %s8869_s25  ;;  %v6408_v26 = vpop.xlane.xlu0 %6407 }
0x2491   :  { %v6428_v5 = vsub.f32 %v10596_v10, %v6408_v26 }
0x2493   :  { %v6437_v3 = vmul.f32 1.442695, %v6428_v5 }
0x2495   :  { %8761 = vpow2.f32 %v6437_v3 }
0x249f   :  { %v10634_v62 = vpop.eup %8761 }
0x24a0   :  { %v6454_v27 = vsel %vm337_vm6, %v10634_v62, 0.0 }
0x24a7   :  { %6425 = vmax.xlane.f32.xlu1 %v6424_v16 }
0x24af   :  { %6452 = vadd.xlane.f32.xlu0 %v6451_v1 }
0x24b8   :  { %6653 = vrot.lane.b32.xlu1 %v6500_v57, %s8869_s25 }
0x24dc   :  { %6455 = vadd.xlane.f32.xlu1 %v6454_v27 }
0x24ed   :  { %6751 = vrot.lane.b32.xlu1 %v6502_v12, %s8869_s25 }
0x24f7   :  { %v6411_v43 = vpop.xlane.xlu0 %6410  ;;  %v6414_v41 = vpop.xlane.xlu1 %6413 }
0x24f8   :  { %v6429_v30 = vsub.f32 %v10602_v29, %v6411_v43  ;;  %v6430_v33 = vsub.f32 %v10605_v6, %v6414_v41 }
0x24fa   :  { %v6439_v10 = vmul.f32 1.442695, %v6429_v30  ;;  %v6441_v36 = vmul.f32 1.442695, %v6430_v33 }
0x24fc   :  { %8763 = vpow2.f32 %v6439_v10 }
0x24fd   :  { %8765 = vpow2.f32 %v6441_v36 }
0x24ff   :  { %v6417_v54 = vpop.xlane.xlu0 %6416  ;;  %v6420_v37 = vpop.xlane.xlu1 %6419 }
0x2500   :  { %v6431_v19 = vsub.f32 %v6260_v22, %v6417_v54 }
0x2502   :  { %v6443_v21 = vmul.f32 1.442695, %v6431_v19 }
0x2503   :  { %v6605_v50 = vpop.permute.xlu1 %6604 }
0x2504   :  { %8767 = vpow2.f32 %v6443_v21  ;;  %v6610_v39 = vsel %vm834_vm7, %v6605_v50, 0 }
0x2506   :  { %v10642_v4 = vpop.eup %8763 }
0x2507   :  { %v6423_v15 = vpop.xlane.xlu0 %6422  ;;  %v6457_v55 = vsel %vm337_vm6, %v10642_v4, 0.0  ;;  %v10646_v49 = vpop.eup %8765 }
0x2508   :  { %v6433_v58 = vsub.f32 %v6352_v31, %v6423_v15  ;;  %6458 = vadd.xlane.f32.xlu0 %v6457_v55  ;;  %v6460_v51 = vsel %vm337_vm6, %v10646_v49, 0.0  ;;  %v6432_v31 = vsub.f32 %v10613_v0, %v6420_v37 }
0x250a   :  { %v6447_v29 = vmul.f32 1.442695, %v6433_v58  ;;  %v6445_v28 = vmul.f32 1.442695, %v6432_v31 }
0x250b   :  { %v6556_v6 = vpop.permute.xlu0 %6555 }
0x250c   :  { %8769 = vpow2.f32 %v6447_v29  ;;  %v6561_v22 = vsel %vm834_vm7, %v6556_v6, 0  ;;  %6461 = vadd.xlane.f32.xlu0 %v6460_v51 }
0x250d   :  { %8258 = vmatpush3.bf16.msra.mxu1 %v6561_v22  ;;  %8771 = vpow2.f32 %v6445_v28 }
0x250e   :  { %v10651_v38 = vpop.eup %8767  ;;  %8269 = vmatprep.subr.bf16.mxu1 %v8865_v7 }
0x250f   :  { %v6463_v20 = vsel %vm337_vm6, %v10651_v38, 0.0 }
0x2511   :  { %6464 = vadd.xlane.f32.xlu1 %v6463_v20 }
0x2516   :  { %v10656_v2 = vpop.eup %8769 }
0x2517   :  { %v6469_v47 = vsel %vm337_vm6, %v10656_v2, 0.0  ;;  %v10666_v59 = vpop.eup %8771 }
0x2518   :  { %6470 = vadd.xlane.f32.xlu1 %v6469_v47  ;;  %v6466_v14 = vsel %vm337_vm6, %v10666_v59, 0.0 }
0x2522   :  { %6702 = vrot.lane.b32.xlu0 %v6501_v53, %s8869_s25 }
0x2529   :  { %6849 = vrot.lane.b32.xlu1 %v6504_v52, %s8869_s25 }
0x2534   :  { %v6426_v18 = vpop.xlane.xlu1 %6425 }
0x2535   :  { %v6434_v13 = vsub.f32 %v10624_v61, %v6426_v18  ;;  %v6503_v61 = vpack.c.bf16 %v8553_v60, %v8553_v60 }
0x2537   :  { %v6449_v23 = vmul.f32 1.442695, %v6434_v13 }
0x2538   :  { %v6654_v16 = vpop.permute.xlu1 %6653 }
0x2539   :  { %8773 = vpow2.f32 %v6449_v23  ;;  %v6659_v26 = vsel %vm834_vm7, %v6654_v16, 0 }
0x253c   :  { %v6453_v56 = vpop.xlane.xlu0 %6452 }
0x253d   :  { %8775 = vrcp.f32 %v6453_v56 }
0x2541   :  { %6467 = vadd.xlane.f32.xlu0 %v6466_v14 }
0x2543   :  { %v10670_v8 = vpop.eup %8773 }
0x2544   :  { %v6472_v0 = vsel %vm337_vm6, %v10670_v8, 0.0 }
0x2545   :  { %6473 = vadd.xlane.f32.xlu0 %v6472_v0 }
0x2547   :  { %v8776_v32 = vpop.eup %8775 }
0x2548   :  { %v6483_v34 = vmul.f32 %v8776_v32, %v10628_v25 }
0x254a   :  { %v6491_v40 = vpack.c.bf16 %v6483_v34, %v6483_v34 }
0x254c   :  { %8254 = vmatmul.mubr.msk.bf16.vlgmr.msra.gmra.mrb[212].mxu0 %vm337_vm6, %v6491_v40 }
0x254d   :  { %8264 = vmatpush3.bf16.msra.mxu0 %v6610_v39  ;;  %8265 = vmatprep.mubr.msk.bf16.mxu0 %vm8866_vm5, %v8865_v7 }
0x254e   :  { %8275 = vmatprep.subr.bf16.mxu0 %v8865_v7 }
0x255b   :  { %6800 = vrot.lane.b32.xlu0 %v6503_v61, %s8869_s25 }
0x2569   :  { %v6456_v1 = vpop.xlane.xlu1 %6455 }
0x256a   :  { %8777 = vrcp.f32 %v6456_v1 }
0x256d   :  { %v6752_v3 = vpop.permute.xlu1 %6751 }
0x256e   :  { %v6757_v54 = vsel %vm834_vm7, %v6752_v3, 0 }
0x2574   :  { %v8778_v25 = vpop.eup %8777 }
0x2575   :  { %v6484_v42 = vmul.f32 %v8778_v25, %v10634_v62 }
0x2577   :  { %v6492_v57 = vpack.c.bf16 %v6484_v42, %v6484_v42 }
0x2579   :  { %8260 = vmatmul.mubr.msk.bf16.vlgmr.msra.gmra.mrb[200].mxu1 %vm337_vm6, %v6492_v57 }
0x257a   :  { %8270 = vmatpush3.bf16.msra.mxu1 %v6659_v26  ;;  %8271 = vmatprep.mubr.msk.bf16.mxu1 %vm8866_vm5, %v8865_v7 }
0x257b   :  { %8281 = vmatprep.subr.bf16.mxu1 %v8865_v7 }
0x2595   :  { %v6459_v48 = vpop.xlane.xlu0 %6458 }
0x2596   :  { %8779 = vrcp.f32 %v6459_v48 }
0x2599   :  { %v6462_v5 = vpop.xlane.xlu0 %6461 }
0x259a   :  { %8781 = vrcp.f32 %v6462_v5 }
0x259d   :  { %v6703_v12 = vpop.permute.xlu0 %6702 }
0x259e   :  { %v6465_v27 = vpop.xlane.xlu1 %6464  ;;  %v6708_v33 = vsel %vm834_vm7, %v6703_v12, 0 }
0x259f   :  { %8783 = vrcp.f32 %v6465_v27 }
0x25a0   :  { %v8780_v63 = vpop.eup %8779 }
0x25a1   :  { %v6485_v62 = vmul.f32 %v8780_v63, %v10642_v4 }
0x25a3   :  { %v6493_v43 = vpack.c.bf16 %v6485_v62, %v6485_v62 }
0x25a4   :  { %v8782_v41 = vpop.eup %8781 }
0x25a5   :  { %v6486_v30 = vmul.f32 %v8782_v41, %v10646_v49  ;;  %8266 = vmatmul.mubr.msk.bf16.vlgmr.msra.gmra.mrb[216].mxu0 %vm337_vm6, %v6493_v43  ;;  %v6471_v4 = vpop.xlane.xlu1 %6470 }
0x25a6   :  { %8276 = vmatpush3.bf16.msra.mxu0 %v6708_v33  ;;  %8277 = vmatprep.mubr.msk.bf16.mxu0 %vm8866_vm5, %v8865_v7  ;;  %8785 = vrcp.f32 %v6471_v4 }
0x25a7   :  { %v6494_v10 = vpack.c.bf16 %v6486_v30, %v6486_v30  ;;  %8287 = vmatprep.subr.bf16.mxu0 %v8865_v7 }
0x25a9   :  { %v8784_v36 = vpop.eup %8783  ;;  %8272 = vmatmul.mubr.msk.bf16.vlgmr.msra.gmra.mrb[204].mxu1 %vm337_vm6, %v6494_v10  ;;  %v6850_v20 = vpop.permute.xlu1 %6849 }
0x25aa   :  { %v6487_v19 = vmul.f32 %v8784_v36, %v10651_v38  ;;  %8282 = vmatpush3.bf16.msra.mxu1 %v6757_v54  ;;  %8283 = vmatprep.mubr.msk.bf16.mxu1 %vm8866_vm5, %v8865_v7 }
0x25ab   :  { %8293 = vmatprep.subr.bf16.mxu1 %v8865_v7 }
0x25ac   :  { %v6495_v21 = vpack.c.bf16 %v6487_v19, %v6487_v19 }
0x25ae   :  { %8278 = vmatmul.mubr.msk.bf16.vlgmr.msra.gmra.mrb[220].mxu0 %vm337_vm6, %v6495_v21 }
0x25af   :  { %8289 = vmatprep.mubr.msk.bf16.mxu0 %vm8866_vm5, %v8865_v7 }
0x25b0   :  { %v8786_v55 = vpop.eup %8785 }
0x25b1   :  { %v6489_v58 = vmul.f32 %v8786_v55, %v10656_v2  ;;  %v6855_v2 = vsel %vm834_vm7, %v6850_v20, 0  ;;  %v7339_v55 = vld [vmem:[%s10854_s6 + $0x98] sm:$0xff] }
0x25b3   :  { %v6497_v22 = vpack.c.bf16 %v6489_v58, %v6489_v58 }
0x25ce   :  { %v6468_v15 = vpop.xlane.xlu0 %6467 }
0x25cf   :  { %8787 = vrcp.f32 %v6468_v15 }
0x25d2   :  { %v6474_v49 = vpop.xlane.xlu0 %6473 }
0x25d3   :  { %8789 = vrcp.f32 %v6474_v49  ;;  %v7343_v49 = vld [vmem:[%s10854_s6 + $0xb8] sm:$0xff] }
0x25d4   :  { %v6937_v58 = vpack.c.bf16 %v7343_v49, %v7339_v55 }
0x25d6   :  { %v6801_v29 = vpop.permute.xlu0 %6800 }
0x25d7   :  { %v6806_v6 = vsel %vm834_vm7, %v6801_v29, 0  ;;  %v7351_v29 = vld [vmem:[%s10854_s6 + $0xf8] sm:$0xff] }
0x25d8   :  { %8288 = vmatpush3.bf16.msra.mxu0 %v6806_v6 }
0x25d9   :  { %v8788_v51 = vpop.eup %8787  ;;  %8299 = vmatprep.subr.bf16.mxu0 %v8865_v7 }
0x25da   :  { %v6488_v38 = vmul.f32 %v8788_v51, %v10666_v59  ;;  %v7387_v51 = vld [vmem:[%s10855_s7 + $0xc0] sm:$0xff] }
0x25db   :  { %8290 = vmatmul.mubr.msk.bf16.vlgmr.msra.gmra.mrb[224].mxu0 %vm337_vm6, %v6497_v22  ;;  %v7388_v22 = vld [vmem:[%s10855_s7 + $0xc8] sm:$0xff] }
0x25dc   :  { %v6496_v47 = vpack.c.bf16 %v6488_v38, %v6488_v38  ;;  %8303 = vmatprep.mubr.msk.bf16.mxu0 %vm8866_vm5, %v8865_v7  ;;  %8300 = vmatpush3.bf16.msra.mxu0 %v6937_v58  ;;  %v7389_v38 = vld [vmem:[%s10855_s7 + $0xd0] sm:$0xff]  ;;  %v6986_v20 = vpack.c.bf16 %v7388_v22, %v7387_v51 }
0x25dd   :  { %v8790_v17 = vpop.eup %8789  ;;  %8301 = vmatprep.subr.bf16.mxu0 %v8865_v7 }
0x25de   :  { %8284 = vmatmul.mubr.msk.bf16.vlgmr.msra.gmra.mrb[208].mxu1 %vm337_vm6, %v6496_v47  ;;  %v6490_v53 = vmul.f32 %v8790_v17, %v10670_v8  ;;  %v7390_v47 = vld [vmem:[%s10855_s7 + $0xd8] sm:$0xff] }
0x25df   :  { %8294 = vmatpush3.bf16.msra.mxu1 %v6855_v2  ;;  %8295 = vmatprep.mubr.msk.bf16.mxu1 %vm8866_vm5, %v8865_v7  ;;  %v6987_v17 = vpack.c.bf16 %v7390_v47, %v7389_v38  ;;  %v8874_v47 = vmov 1  }
0x25e0   :  { %8307 = vmatprep.subr.bf16.mxu1 %v8865_v7  ;;  %v6498_v24 = vpack.c.bf16 %v6490_v53, %v6490_v53  ;;  %8555 = vset.pattern.permute.xlu1 %v8874_v47 }
0x25e1   :  { %8556 = vset.pattern.permute.xlu0 %v8874_v47 }
0x25e6   :  { %8296 = vmatmul.mubr.msk.bf16.vlgmr.msra.gmra.mrb[212].mxu1 %vm337_vm6, %v6498_v24 }
0x25e7   :  { %8315 = vmatprep.mubr.msk.bf16.mxu1 %vm8866_vm5, %v8865_v7  ;;  %8308 = vmatpush3.bf16.msra.mxu1 %v6986_v20 }
0x25e8   :  { %8309 = vmatprep.subr.bf16.mxu1 %v8865_v7 }
0x25eb   :  { %8310 = vmatpush3.bf16.msra.mxu1 %v6987_v17 }
0x25ec   :  { %8311 = vmatprep.subr.bf16.mxu1 %v8865_v7 }
0x261f   :  { %v6548_v52 = vpop.f32.mrb[212].mxu0 }
0x2620   :  { %v8255_v37 = vpop.f32.mrb[213].mxu0 }
0x2621   :  { %v6551_v31 = vpop.f32.mrb[214].mxu0 }
0x2622   :  { %v8256_v28 = vpop.f32.mrb[215].mxu0 }
0x264c   :  { %v6597_v50 = vpop.f32.mrb[200].mxu1 }
0x264d   :  { %v8261_v18 = vpop.f32.mrb[201].mxu1 }
0x264e   :  { %v6600_v13 = vpop.f32.mrb[202].mxu1  ;;  %v8811_v18 = vld [vmem:[%s10856_s8 + $0x8] sm:$0xf] }
0x264f   :  { %v8262_v23 = vpop.f32.mrb[203].mxu1  ;;  %v6924_v13 = vrot.slane %v8811_v18, %v1392_v45  ;;  %v7055_v58 = vrot.slane %v8811_v18, %v2405_v44 }
0x2678   :  { %v6646_v56 = vpop.f32.mrb[216].mxu0 }
0x2679   :  { %v6897_v59 = vadd.f32 %v6646_v56, %v6548_v52  ;;  %v8267_v14 = vpop.f32.mrb[217].mxu0 }
0x267a   :  { %v6649_v8 = vpop.f32.mrb[218].mxu0 }
0x267b   :  { %v8268_v0 = vpop.f32.mrb[219].mxu0 }
0x267c   :  { %v6695_v32 = vpop.f32.mrb[204].mxu1  ;;  %v7391_v0 = vld [vmem:[%s10855_s7 + $0xe0] sm:$0xff] }
0x267d   :  { %v6898_v34 = vadd.f32 %v6695_v32, %v6597_v50  ;;  %v8273_v40 = vpop.f32.mrb[205].mxu1  ;;  %v7392_v32 = vld [vmem:[%s10855_s7 + $0xe8] sm:$0xff] }
0x267e   :  { %v6698_v39 = vpop.f32.mrb[206].mxu1  ;;  %v6988_v45 = vpack.c.bf16 %v7392_v32, %v7391_v0  ;;  %v7394_v40 = vld [vmem:[%s10855_s7 + $0xf8] sm:$0xff] }
0x267f   :  { %v8274_v60 = vpop.f32.mrb[207].mxu1 }
0x2680   :  { %8312 = vmatpush3.bf16.msra.mxu1 %v6988_v45 }
0x2681   :  { %v6744_v61 = vpop.f32.mrb[220].mxu0  ;;  %8313 = vmatprep.subr.bf16.mxu1 %v8865_v7 }
0x2682   :  { %v6899_v16 = vadd.f32 %v6897_v59, %v6744_v61  ;;  %v8279_v1 = vpop.f32.mrb[221].mxu0 }
0x2683   :  { %v6747_v25 = vpop.f32.mrb[222].mxu0 }
0x2684   :  { %v8280_v42 = vpop.f32.mrb[223].mxu0 }
0x26ae   :  { %v6842_v57 = vpop.f32.mrb[224].mxu0 }
0x26af   :  { %v6901_v26 = vadd.f32 %v6899_v16, %v6842_v57  ;;  %v8291_v48 = vpop.f32.mrb[225].mxu0 }
0x26b0   :  { %v6845_v5 = vpop.f32.mrb[226].mxu0 }
0x26b1   :  { %v10721_v3 = vadd.f32 %v6901_v26, %v10503_v35  ;;  %v6793_v27 = vpop.f32.mrb[208].mxu1  ;;  %v8292_v63 = vpop.f32.mrb[227].mxu0 }
0x26b2   :  { %v6900_v62 = vadd.f32 %v6898_v34, %v6793_v27  ;;  %v8285_v12 = vpop.f32.mrb[209].mxu1  ;;  %v7393_v34 = vld [vmem:[%s10855_s7 + $0xf0] sm:$0xff] }
0x26b3   :  { %v6796_v43 = vpop.f32.mrb[210].mxu1  ;;  %v6905_v41 = vmul.f32 %v10721_v3, %v10721_v3  ;;  %v6989_v39 = vpack.c.bf16 %v7394_v40, %v7393_v34 }
0x26b4   :  { %v8286_v30 = vpop.f32.mrb[211].mxu1 }
0x26b5   :  { %v6907_v33 = vsel %vm87_vm4, %v6905_v41, 0.0  ;;  %8314 = vmatpush3.bf16.msra.mxu1 %v6989_v39 }
0x26b6   :  { %6908 = vadd.xlane.f32.xlu0 %v6907_v33  ;;  %v8812_v33 = vld [vmem:[%s10852_s4] sm:$0xff]  }
0x26b9   :  { %v6891_v10 = vpop.f32.mrb[212].mxu1 }
0x26ba   :  { %v6902_v36 = vadd.f32 %v6900_v62, %v6891_v10  ;;  %v8297_v54 = vpop.f32.mrb[213].mxu1  ;;  %v7065_v10 = vsel %vm87_vm4, %v8812_v33, 0 }
0x26bb   :  { %v6894_v19 = vpop.f32.mrb[214].mxu1 }
0x26bc   :  { %v10727_v21 = vadd.f32 %v6902_v36, %v10497_v11  ;;  %v8298_v35 = vpop.f32.mrb[215].mxu1  ;;  %v7347_v11 = vld [vmem:[%s10854_s6 + $0xd8] sm:$0xff] }
0x26bd   :  { %v6938_v6 = vpack.c.bf16 %v7351_v29, %v7347_v11 }
0x26be   :  { %v6906_v4 = vmul.f32 %v10727_v21, %v10727_v21 }
0x26bf   :  { %8302 = vmatpush3.bf16.msra.mxu0 %v6938_v6 }
0x26c0   :  { %v6910_v15 = vsel %vm87_vm4, %v6906_v4, 0.0  ;;  %8319 = vmatprep.subr.bf16.mxu0 %v8865_v7 }
0x26c1   :  { %6911 = vadd.xlane.f32.xlu1 %v6910_v15 }
0x2743   :  { %v6909_v2 = vpop.xlane.xlu0 %6908 }
0x2744   :  { %v6913_v53 = vmul.f32 0.03125, %v6909_v2 }
0x2746   :  { %v6915_v24 = vadd.f32 1e-06, %v6913_v53 }
0x2748   :  { %8791 = vrsqrt.f32 %v6915_v24 }
0x274e   :  { %v6912_v52 = vpop.xlane.xlu1 %6911 }
0x274f   :  { %v6914_v37 = vmul.f32 0.03125, %v6912_v52  ;;  %v8814_v52 = vld [vmem:[%s10848_s0] sm:$0xff] }
0x2750   :  { %vm7137_vm10 = vcmp.lt.s32.totalorder %v8814_v52, 0  ;;  %vm7163_vm14 = vcmp.ne.s32.totalorder %v8814_v52, 4294967196 }
0x2751   :  { %v6916_v31 = vadd.f32 1e-06, %v6914_v37  ;;  %v7139_v37 = vsel %vm7137_vm10, 0, %v8814_v52 }
0x2752   :  { %v8792_v28 = vpop.eup %8791 }
0x2753   :  { %8793 = vrsqrt.f32 %v6916_v31  ;;  %v6919_v50 = vmul.f32 %v8792_v28, %v10721_v3  ;;  %v8815_v31 = vld [vmem:[%s10848_s0 + $0x8] sm:$0xff]  ;;  %s8875_s0 = smov [#allocation2]  }
0x2754   :  { %vm7138_vm11 = vcmp.lt.s32.totalorder %v8815_v31, 0  ;;  %vm7164_vm15 = vcmp.ne.s32.totalorder %v8815_v31, 4294967196  ;;  %s7204_s14 = sshll.u32 %s8875_s0, 4  ;;  %s7205_s14 = int_to_ptr.vmem [resolvable:$true] %s7204_s14 }
0x2755   :  { %v6925_v59 = vmul.f32 %v6924_v13, %v6919_v50  ;;  %v7140_v28 = vsel %vm7138_vm11, 0, %v8815_v31  ;;  %s8816_s15 = scalar_lea.vmem %s7205_s14, 256  ;;  %p8821_p1 = scmp.lt.s32.totalorder %s7205_s14, %s7205_s14 }
0x2756   :  { %p8817_p0 = scmp.ne.s32.totalorder %s7205_s14, %s8816_s15  ;;  %p8822_p2 = scmp.lt.s32.totalorder %s8816_s15, %s8816_s15 }
0x2758   :  { %p8823_p3 = por %p8822_p2, %p8821_p1 }
0x275a   :  { %p8824_p4 = pnand %p8823_p3, %p8817_p0 }
0x275d   :  { %v8794_v23 = vpop.eup %8793 }
0x275e   :  { %v6920_v56 = vmul.f32 %v8794_v23, %v10727_v21 }
0x2760   :  { %v6926_v14 = vmul.f32 %v6924_v13, %v6920_v56 }
0x2762   :  { %v6936_v8 = vpack.c.bf16 %v6926_v14, %v6925_v59 }
0x2764   :  { %8304 = vmatmul.mubr.msk.bf16.vlgmr.msra.gmra.mrb[228].mxu0 %vm87_vm4, %v6936_v8 }
0x2765   :  { %8323 = vmatprep.mubr.msk.bf16.mxu0 %vm8866_vm5, %v8865_v7  ;;  %8320 = vmatpush3.bf16.xpose.msra.mxu0 %v7065_v10 }
0x2766   :  { %8321 = vmatprep.subr.bf16.mxu0 %v8865_v7 }
0x2837   :  { %v6976_v60 = vpop.f32.mrb[228].mxu0 }
0x2838   :  { %v8305_v61 = vpop.f32.mrb[229].mxu0  ;;  %v6983_v1 = vmax.f32 %v6976_v60, 0.0 }
0x2839   :  { %v6979_v16 = vpop.f32.mrb[230].mxu0 }
0x283a   :  { %v6984_v25 = vmax.f32 %v6979_v16, 0.0  ;;  %v8306_v42 = vpop.f32.mrb[231].mxu0 }
0x283c   :  { %v6985_v57 = vpack.c.bf16 %v6984_v25, %v6983_v1  ;;  %v7401_v25 = vsel %vm7164_vm15, 1.0, %v8865_v7 }
0x283e   :  { %8316 = vmatmul.mubr.msk.bf16.vlgmr.msra.gmra.mrb[216].mxu1 %vm1318_vm8, %v6985_v57  ;;  %v7182_v57 = vsel %vm7171_vm0, %v7401_v25, 0.0 }
0x2911   :  { %v7027_v26 = vpop.f32.mrb[216].mxu1 }
0x2912   :  { %v7034_v48 = vadd.f32 %v7027_v26, %v10721_v3  ;;  %v8317_v5 = vpop.f32.mrb[217].mxu1  ;;  %v8813_v3 = vld [vmem:[%s10852_s4 + $0x8] sm:$0xff]  }
0x2913   :  { %v7030_v27 = vpop.f32.mrb[218].mxu1  ;;  %v7068_v36 = vsel %vm87_vm4, %v8813_v3, 0 }
0x2914   :  { %v7036_v63 = vmul.f32 %v7034_v48, %v7034_v48  ;;  %v7035_v62 = vadd.f32 %v7030_v27, %v10727_v21  ;;  %v8318_v12 = vpop.f32.mrb[219].mxu1  ;;  %8322 = vmatpush3.bf16.xpose.msra.mxu0 %v7068_v36 }
0x2916   :  { %v7037_v43 = vmul.f32 %v7035_v62, %v7035_v62  ;;  %v7038_v41 = vsel %vm87_vm4, %v7036_v63, 0.0 }
0x2917   :  { %7039 = vadd.xlane.f32.xlu0 %v7038_v41 }
0x2918   :  { %v7041_v30 = vsel %vm87_vm4, %v7037_v43, 0.0 }
0x291b   :  { %7042 = vadd.xlane.f32.xlu0 %v7041_v30 }
0x29a4   :  { %v7040_v54 = vpop.xlane.xlu0 %7039 }
0x29a5   :  { %v7044_v19 = vmul.f32 0.03125, %v7040_v54 }
0x29a7   :  { %v7046_v21 = vadd.f32 1e-06, %v7044_v19 }
0x29a8   :  { %v7043_v35 = vpop.xlane.xlu0 %7042 }
0x29a9   :  { %8795 = vrsqrt.f32 %v7046_v21  ;;  %v7045_v4 = vmul.f32 0.03125, %v7043_v35 }
0x29ab   :  { %v7047_v15 = vadd.f32 1e-06, %v7045_v4 }
0x29ad   :  { %8797 = vrsqrt.f32 %v7047_v15 }
0x29b3   :  { %v8796_v55 = vpop.eup %8795 }
0x29b4   :  { %v7050_v49 = vmul.f32 %v8796_v55, %v7034_v48 }
0x29b6   :  { %v7056_v6 = vmul.f32 %v7055_v58, %v7050_v49 }
0x29b7   :  { %v8798_v11 = vpop.eup %8797 }
0x29b8   :  { %v7051_v29 = vmul.f32 %v8798_v11, %v7035_v62  ;;  %v7058_v22 = vmul.f32 0.17677669, %v7056_v6 }
0x29ba   :  { %v7057_v51 = vmul.f32 %v7055_v58, %v7051_v29 }
0x29bc   :  { %v7059_v38 = vmul.f32 0.17677669, %v7057_v51 }
0x29be   :  { %v7060_v20 = vpack.c.bf16 %v7059_v38, %v7058_v22 }
0x29c0   :  { %8324 = vmatmul.mubr.msk.bf16.vlgmr.msra.gmra.mrb[232].mxu0 %vm87_vm4, %v7060_v20 }
0x2a93   :  { %v7104_v17 = vpop.f32.mrb[232].mxu0 }
0x2a94   :  { %7111 = vst.msk [vmem:[#allocation2] sm:$0xff] %vm87_vm4, %v7104_v17  ;;  %v8325_v2 = vpop.f32.mrb[233].mxu0  ;;  %v7113_v53 = vsel %vm87_vm4, %v7104_v17, -inf }
0x2a95   :  { %7114 = vmax.xlane.f32.xlu1 %v7113_v53  ;;  %v7107_v46 = vpop.f32.mrb[234].mxu0 }
0x2a96   :  { %7112 = vst.msk [vmem:[#allocation2 + $0x8] sm:$0xff] %vm87_vm4, %v7107_v46  ;;  %v8326_v44 = vpop.f32.mrb[235].mxu0  ;;  %v7116_v24 = vsel %vm87_vm4, %v7107_v46, -inf }
0x2a97   :  { %7117 = vmax.xlane.f32.xlu0 %v7116_v24 }
0x2aa6   :  { %7142 = vperm.xlu1 %8555, %v7139_v37  }
0x2aad   :  { %7145 = vperm.xlu0 %8556, %v7140_v28  }
0x2b22   :  { %v7115_v50 = vpop.xlane.xlu1 %7114 }
0x2b23   :  { %v7119_v18 = vsub.f32 %v7104_v17, %v7115_v50 }
0x2b24   :  { %v7118_v13 = vpop.xlane.xlu0 %7117 }
0x2b25   :  { %v7121_v23 = vmul.f32 1.442695, %v7119_v18  ;;  %v7120_v56 = vsub.f32 %v7107_v46, %v7118_v13 }
0x2b26   :  { %v7143_v14 = vpop.permute.xlu1 %7142 }
0x2b27   :  { %8799 = vpow2.f32 %v7121_v23  ;;  %v7123_v59 = vmul.f32 1.442695, %v7120_v56  ;;  %vm7147_vm12 = vcmp.eq.s32.totalorder %v8957_v9, %v7143_v14 }
0x2b28   :  { %v7398_v0 = vsel %vm7147_vm12, 1.0, %v8865_v7 }
0x2b29   :  { %8801 = vpow2.f32 %v7123_v59  ;;  %v7153_v45 = vmul.f32 %v7398_v0, %v7104_v17 }
0x2b2b   :  { %v7155_v16 = vsel %vm87_vm4, %v7153_v45, 0.0 }
0x2b2c   :  { %v7146_v8 = vpop.permute.xlu0 %7145 }
0x2b2d   :  { %vm7148_vm13 = vcmp.eq.s32.totalorder %v8957_v9, %v7146_v8  ;;  %v7400_v9 = vsel %vm7163_vm14, 1.0, %v8865_v7 }
0x2b2e   :  { %v7399_v39 = vsel %vm7148_vm13, 1.0, %v8865_v7  ;;  %v7181_v42 = vsel %vm7171_vm0, %v7400_v9, 0.0 }
0x2b2f   :  { %v7154_v61 = vmul.f32 %v7399_v39, %v7107_v46  ;;  %v7183_v26 = vadd.f32 %v7182_v57, %v7181_v42 }
0x2b31   :  { %v8800_v32 = vpop.eup %8799  ;;  %v7158_v1 = vsel %vm87_vm4, %v7154_v61, 0.0  ;;  %v7184_v48 = vrot.slane %v7183_v26, 4 }
0x2b32   :  { %v7125_v34 = vsel %vm87_vm4, %v8800_v32, 0.0 }
0x2b33   :  { %v8802_v40 = vpop.eup %8801  ;;  %7126 = vadd.xlane.f32.xlu1 %v7125_v34  ;;  %v7185_v27 = vadd.f32 %v7184_v48, %v7183_v26 }
0x2b34   :  { %v7128_v60 = vsel %vm87_vm4, %v8802_v40, 0.0 }
0x2b35   :  { %7129 = vadd.xlane.f32.xlu0 %v7128_v60  ;;  %v7186_v62 = vrot.slane %v7185_v27, 2 }
0x2b37   :  { %7156 = vadd.xlane.f32.xlu1 %v7155_v16  ;;  %v7187_v12 = vadd.f32 %v7186_v62, %v7185_v27 }
0x2b39   :  { %v7188_v33 = vrot.slane %v7187_v12, 1 }
0x2b3b   :  { %7159 = vadd.xlane.f32.xlu1 %v7158_v1  ;;  %v7189_v54 = vadd.f32 %v7188_v33, %v7187_v12 }
0x2b3d   :  { %v7190_v15 = vmax.f32 %v7189_v54, 1.0 }
0x2bc0   :  { %v7127_v5 = vpop.xlane.xlu1 %7126 }
0x2bc1   :  { %8803 = vlog2.f32 %v7127_v5 }
0x2bc2   :  { %v7130_v63 = vpop.xlane.xlu0 %7129 }
0x2bc3   :  { %8805 = vlog2.f32 %v7130_v63 }
0x2bc4   :  { %v7157_v41 = vpop.xlane.xlu1 %7156  ;;  %8807 = vrcp.f32 %v7190_v15 }
0x2bc8   :  { %v7160_v21 = vpop.xlane.xlu1 %7159 }
0x2bcb   :  { %v8804_v43 = vpop.eup %8803 }
0x2bcc   :  { %v7132_v30 = vmul.f32 0.6931472, %v8804_v43 }
0x2bcd   :  { %v8806_v10 = vpop.eup %8805 }
0x2bce   :  { %v7134_v3 = vmul.f32 0.6931472, %v8806_v10  ;;  %v7135_v7 = vadd.f32 %v7132_v30, %v7115_v50 }
0x2bd0   :  { %v7161_v36 = vsub.f32 %v7135_v7, %v7157_v41  ;;  %v7136_v19 = vadd.f32 %v7134_v3, %v7118_v13 }
0x2bd2   :  { %v7169_v35 = vmul.f32 %v7400_v9, %v7161_v36  ;;  %v7162_v4 = vsub.f32 %v7136_v19, %v7160_v21 }
0x2bd4   :  { %v7170_v55 = vmul.f32 %v7401_v25, %v7162_v4  ;;  %v7172_v49 = vsel %vm7171_vm0, %v7169_v35, 0.0 }
0x2bd6   :  { %v7173_v58 = vsel %vm7171_vm0, %v7170_v55, 0.0 }
0x2bd7   :  { %v7174_v11 = vadd.f32 %v7173_v58, %v7172_v49 }
0x2bd9   :  { %v7175_v29 = vrot.slane %v7174_v11, 4 }
0x2bdb   :  { %v7176_v6 = vadd.f32 %v7175_v29, %v7174_v11 }
0x2bdd   :  { %v7177_v51 = vrot.slane %v7176_v6, 2 }
0x2bde   :  { %8827 = shalt.err (!%p8824_p4)
}
0x2bdf   :  { %s8828_s5 = scalar_lea.hbm %s10857_s9, 256 }
0x2be0   :  { %p8829_p5 = scmp.ne.s32.totalorder %s10857_s9, %s8828_s5  ;;  %p8832_p6 = scmp.lt.u32.totalorder %s8828_s5, %s10857_s9 }
0x2be2   :  { %p8834_p7 = pnand %p8832_p6, %p8829_p5 }
0x2be4   :  { %8837 = shalt.err (!%p8834_p7)
}
0x2be5   :  { %s8876_s20 = smov 128   ;;  %s8877_s21 = smov 8   ;;  %v7178_v22 = vadd.f32 %v7177_v51, %v7176_v6  ;;  %v8808_v20 = vpop.eup %8807  ;;  %vm7197_vm1 = vcmask 0  }
0x2be6   :  { %7210 = dma.vmem_to_hbm [thread:$0]  %s7205_s14, 256, %s10857_s9, [#allocation3], %s8876_s20, %s8876_s20, %s8877_s21  }
0x2be7   :  { %v7179_v38 = vrot.slane %v7178_v22, 1  ;;  %s8878_s3 = smov 127   ;;  %s8879_s30 = smov [#allocation4]  }
0x2be8   :  { %s7217_s8 = sshll.u32 %s8879_s30, 4  ;;  %s7218_s8 = int_to_ptr.vmem [resolvable:$true] %s7217_s8 }
0x2be9   :  { %v7180_v47 = vadd.f32 %v7179_v38, %v7178_v22  ;;  %s8838_s11 = scalar_lea.vmem %s7218_s8, 16  ;;  %s8842_s12 = scalar_lea.vmem %s7218_s8, 32 }
0x2bea   :  { %p8839_p8 = scmp.ne.s32.totalorder %s7218_s8, %s8838_s11  ;;  %p8843_p9 = scmp.lt.s32.totalorder %s7218_s8, %s7218_s8 }
0x2beb   :  { %v7192_v17 = vmul.f32 %v8808_v20, %v7180_v47  ;;  %p8844_p10 = scmp.lt.s32.totalorder %s8842_s12, %s8838_s11 }
0x2bed   :  { %7194 = vrot.lane.b32.xlu1 %v7192_v17, %s8878_s3  ;;  %p8845_p11 = por %p8844_p10, %p8843_p9 }
0x2bef   :  { %p8846_p12 = pnand %p8845_p11, %p8839_p8 }
0x2c5f   :  { %v7195_v2 = vpop.permute.xlu1 %7194 }
0x2c60   :  { %7198 = vst.msk [vmem:[#allocation4] sm:$0x1] %vm7197_vm1, %v7195_v2 }
0x2c61   :  { %8849 = shalt.err (!%p8846_p12)
}
0x2c62   :  { %s8850_s13 = scalar_lea.hbm %s10858_s10, 16 }
0x2c63   :  { %p8851_p13 = scmp.ne.s32.totalorder %s10858_s10, %s8850_s13  ;;  %p8854_p0 = scmp.lt.u32.totalorder %s8850_s13, %s10858_s10 }
0x2c65   :  { %p8856_p1 = pnand %p8854_p0, %p8851_p13 }
0x2c67   :  { %8859 = shalt.err (!%p8856_p1)
}
0x2c68   :  { %7220 = dma.vmem_to_hbm [thread:$0]  %s7218_s8, 16, %s10858_s10, [#allocation5]  }
0x2c69   :  { %8860 = dma.done.wait [#allocation3], 256  }
0x2c6a   :  { %8861 = vsyncadd [#allocation3], 4294967040 }
0x2c6b   :  { %8862 = dma.done.wait [#allocation5], 16  }
0x2c6c   :  { %8863 = vsyncadd [#allocation5], 4294967280 }
0x2c6d   :  { %7227 = vsyncpa [#allocation3], 1 }
0x2c6e   :  { %7228 = vsyncpa [#allocation5], 1 }

</bundles_post_ra>
